<compile_context>
chip_gen: v6e
topology: v6e:2x2x1
jax: 0.10.0
libtpu: 0.0.40
codegen_flags: <defaults>
</compile_context>

<pallas_src>
import functools

import jax
import jax.numpy as jnp
from jax.experimental import pallas as pl
from jax.experimental.pallas import tpu as pltpu


# ----------------------------------------------------------------------------- helpers

def _layer_norm(y, gamma, beta, eps=1e-5):
    mean = jnp.mean(y, axis=-1, keepdims=True)
    var = jnp.mean(jnp.square(y - mean), axis=-1, keepdims=True)
    return (y - mean) * jax.lax.rsqrt(var + eps) * gamma + beta


# ----------------------------------------------------------------------------- fused kernel

def _stacked_encoder_kernel(
        x_ref, mask_ref, bias_ref, particle_ref,
        emb_w_ref, emb_b_ref, emb_g_ref, emb_bt_ref,
        wq_ref, bq_ref, wk_ref, bk_ref, wv_ref, bv_ref, wo_ref, bo_ref,
        g1_ref, bt1_ref, w1_ref, b1_ref, w2_ref, b2_ref, g2_ref, bt2_ref,
        o_ref, *, num_heads):
    """One grid step == one batch element, entire forward pass fused.

    x    : [1, T1, D]  batch-major activations; slot 0 is a placeholder row.
    mask : [1, T1, 1]  sequence mask (1 = valid), slot 0 always valid.
    bias : [1, 1, T1]  additive key-padding bias (0 valid / -1e9 padded).
    Stacked weights carry the layer dimension on axis 0 and stay resident
    across the (parallel) batch grid.
    """
    x = x_ref[0].astype(jnp.float32)          # [T1, D]
    mask = mask_ref[0]                         # [T1, 1]
    bias = bias_ref[0]                         # [1, T1]
    t1, d = x.shape
    dh = d // num_heads
    scale = 1.0 / (float(dh) ** 0.5)

    # ---- embedding stack: LayerNorm(x + GELU(xW + b)) * mask  (row-wise).
    for l in range(emb_w_ref.shape[0]):
        h = jnp.dot(x, emb_w_ref[l], preferred_element_type=jnp.float32) + emb_b_ref[l]
        h = jax.nn.gelu(h, approximate=True)
        x = _layer_norm(x + h, emb_g_ref[l], emb_bt_ref[l]) * mask

    # ---- overwrite slot 0 with the learned particle vector (prepend, fused).
    row = jax.lax.broadcasted_iota(jnp.int32, (t1, 1), 0)
    x = jnp.where(row == 0, particle_ref[...], x)

    # ---- transformer encoder layers (post-norm residual, masked).
    for l in range(wq_ref.shape[0]):
        # --- multi-head self-attention sub-layer
        q = jnp.dot(x, wq_ref[l], preferred_element_type=jnp.float32) + bq_ref[l]
        k = jnp.dot(x, wk_ref[l], preferred_element_type=jnp.float32) + bk_ref[l]
        v = jnp.dot(x, wv_ref[l], preferred_element_type=jnp.float32) + bv_ref[l]
        wo = wo_ref[l]

        attn = jnp.zeros((t1, d), jnp.float32)
        for hh in range(num_heads):
            lo, hi = hh * dh, (hh + 1) * dh
            qh, kh, vh = q[:, lo:hi], k[:, lo:hi], v[:, lo:hi]
            s = jax.lax.dot_general(qh, kh, (((1,), (1,)), ((), ())),
                                    preferred_element_type=jnp.float32) * scale + bias
            s = s - jnp.max(s, axis=-1, keepdims=True)
            p = jnp.exp(s)
            p = p * pl.reciprocal(jnp.sum(p, axis=-1, keepdims=True), approx=True)
            oh = jnp.dot(p, vh, preferred_element_type=jnp.float32)           # [T1, dh]
            # Fold the head output straight into the output projection: no concat.
            attn = attn + jnp.dot(oh, wo[lo:hi, :], preferred_element_type=jnp.float32)

        x = _layer_norm(x + attn + bo_ref[l], g1_ref[l], bt1_ref[l]) * mask

        # --- feed-forward sub-layer
        hmid = jnp.dot(x, w1_ref[l], preferred_element_type=jnp.float32) + b1_ref[l]
        hmid = jax.nn.gelu(hmid, approximate=True)
        ff = jnp.dot(hmid, w2_ref[l], preferred_element_type=jnp.float32) + b2_ref[l]
        x = _layer_norm(x + ff, g2_ref[l], bt2_ref[l]) * mask

    o_ref[0] = x.astype(o_ref.dtype)


# ----------------------------------------------------------------------------- wrapper

def _resident_spec(shape):
    """Full-array block with a constant index_map: loaded once, resident over grid."""
    if len(shape) == 2:
        return pl.BlockSpec(shape, lambda i: (0, 0))
    return pl.BlockSpec(shape, lambda i: (0, 0, 0))


def stacked_encoder_forward(params, encoded_vectors, padding_mask, sequence_mask, num_heads):
    """encoded_vectors:[T,B,D]  padding_mask:[B,T] (True=pad)  sequence_mask:[T,B,1] (True=valid)."""
    t, b, d = encoded_vectors.shape
    t1 = t + 1

    # Single batch-major layout for the whole fused kernel (only glue left in XLA).
    xb = jnp.transpose(encoded_vectors.astype(jnp.float32), (1, 0, 2))            # [B,T,D]
    combined = jnp.concatenate([jnp.zeros((b, 1, d), jnp.float32), xb], axis=1)   # [B,T1,D]
    seq_b = jnp.transpose(sequence_mask.astype(jnp.float32), (1, 0, 2))           # [B,T,1]
    mask_b = jnp.concatenate([jnp.ones((b, 1, 1), jnp.float32), seq_b], axis=1)   # [B,T1,1]
    pad_b = jnp.concatenate([jnp.zeros((b, 1), padding_mask.dtype), padding_mask], axis=1)
    bias_b = jnp.where(pad_b, jnp.float32(-1e9), jnp.float32(0.0))[:, None, :]    # [B,1,T1]

    weight_names = ("emb_w", "emb_b", "emb_g", "emb_beta",
                    "wq", "bq", "wk", "bk", "wv", "bv", "wo", "bo",
                    "g1", "bt1", "w1", "b1", "w2", "b2", "g2", "bt2")
    weights = [params[n] for n in weight_names]

    out = pl.pallas_call(
        functools.partial(_stacked_encoder_kernel, num_heads=num_heads),
        out_shape=jax.ShapeDtypeStruct((b, t1, d), jnp.float32),
        grid=(b,),
        in_specs=[
            pl.BlockSpec((1, t1, d), lambda i: (i, 0, 0)),    # activations
            pl.BlockSpec((1, t1, 1), lambda i: (i, 0, 0)),    # sequence mask
            pl.BlockSpec((1, 1, t1), lambda i: (i, 0, 0)),    # key-padding bias
            _resident_spec(params["particle"].shape),         # particle vector [1,D]
        ] + [_resident_spec(w.shape) for w in weights],
        out_specs=pl.BlockSpec((1, t1, d), lambda i: (i, 0, 0)),
        compiler_params=pltpu.CompilerParams(dimension_semantics=("parallel",)),
    )(combined, mask_b, bias_b, params["particle"], *weights)

    particle_out = out[:, 0, :]                                   # [B,D]
    encoded_out = jnp.transpose(out[:, 1:, :], (1, 0, 2))         # [T,B,D]
    return encoded_out, particle_out


# ----------------------------------------------------------------------------- params

def init_params(key, hidden_dim, num_heads, ffn_dim, num_linear_layers, num_encoder_layers):
    d, f = hidden_dim, ffn_dim
    le, lenc = num_linear_layers, num_encoder_layers
    keys = iter(jax.random.split(key, 1 + le + 8 * lenc))   # generous: never StopIteration

    def dense(fan_in, fan_out):
        return jax.random.normal(next(keys), (fan_in, fan_out), jnp.float32) / jnp.sqrt(float(fan_in))

    def stack(fan_in, fan_out, n):
        return jnp.stack([dense(fan_in, fan_out) for _ in range(n)])

    params = {"particle": jax.random.normal(next(keys), (1, d), jnp.float32)}

    # embedding stack (stacked along layer axis)
    params["emb_w"] = stack(d, d, le)
    params["emb_b"] = jnp.zeros((le, 1, d), jnp.float32)
    params["emb_g"] = jnp.ones((le, 1, d), jnp.float32)
    params["emb_beta"] = jnp.zeros((le, 1, d), jnp.float32)

    # encoder layers (stacked along layer axis)
    params["wq"] = stack(d, d, lenc); params["bq"] = jnp.zeros((lenc, 1, d), jnp.float32)
    params["wk"] = stack(d, d, lenc); params["bk"] = jnp.zeros((lenc, 1, d), jnp.float32)
    params["wv"] = stack(d, d, lenc); params["bv"] = jnp.zeros((lenc, 1, d), jnp.float32)
    params["wo"] = stack(d, d, lenc); params["bo"] = jnp.zeros((lenc, 1, d), jnp.float32)
    params["g1"] = jnp.ones((lenc, 1, d), jnp.float32)
    params["bt1"] = jnp.zeros((lenc, 1, d), jnp.float32)
    params["w1"] = stack(d, f, lenc); params["b1"] = jnp.zeros((lenc, 1, f), jnp.float32)
    params["w2"] = stack(f, d, lenc); params["b2"] = jnp.zeros((lenc, 1, d), jnp.float32)
    params["g2"] = jnp.ones((lenc, 1, d), jnp.float32)
    params["bt2"] = jnp.zeros((lenc, 1, d), jnp.float32)
    return params


# ----------------------------------------------------------------------------- main

if __name__ == "__main__":
    T, B, D = 8, 2, 32
    NUM_HEADS, FFN = 4, 64
    NUM_LINEAR_LAYERS, NUM_ENCODER_LAYERS = 2, 2

    key = jax.random.PRNGKey(0)
    k_par, k_x = jax.random.split(key)
    params = init_params(k_par, D, NUM_HEADS, FFN, NUM_LINEAR_LAYERS, NUM_ENCODER_LAYERS)

    # padding_mask: True = padded position. batch 0 full length, batch 1 length 5.
    lengths = jnp.array([T, 5], dtype=jnp.int32)
    padding_mask = jnp.arange(T)[None, :] >= lengths[:, None]          # [B, T] bool
    sequence_mask = jnp.transpose(~padding_mask)[:, :, None]           # [T, B, 1] bool
    encoded_vectors = (jax.random.normal(k_x, (T, B, D), jnp.float32)
                       * sequence_mask.astype(jnp.float32))

    fwd = jax.jit(functools.partial(stacked_encoder_forward, num_heads=NUM_HEADS))
    encoded_out, particle_out = fwd(params, encoded_vectors, padding_mask, sequence_mask)
    jax.block_until_ready((encoded_out, particle_out))

    assert encoded_out.shape == (T, B, D)
    assert particle_out.shape == (B, D)
    assert bool(jnp.all(jnp.isfinite(encoded_out))) and bool(jnp.all(jnp.isfinite(particle_out)))
    print("KERNEL_OK")
</pallas_src>

<mosaic_0001>
module attributes {stable_mosaic.version = 11 : i64} {
  func.func @_stacked_encoder_kernel(%arg0: i32, %arg1: memref<1x9x32xf32, #tpu.memory_space<vmem>>, %arg2: memref<1x9x1xf32, #tpu.memory_space<vmem>>, %arg3: memref<1x1x9xf32, #tpu.memory_space<vmem>>, %arg4: memref<1x32xf32, #tpu.memory_space<vmem>>, %arg5: memref<2x32x32xf32, #tpu.memory_space<vmem>>, %arg6: memref<2x1x32xf32, #tpu.memory_space<vmem>>, %arg7: memref<2x1x32xf32, #tpu.memory_space<vmem>>, %arg8: memref<2x1x32xf32, #tpu.memory_space<vmem>>, %arg9: memref<2x32x32xf32, #tpu.memory_space<vmem>>, %arg10: memref<2x1x32xf32, #tpu.memory_space<vmem>>, %arg11: memref<2x32x32xf32, #tpu.memory_space<vmem>>, %arg12: memref<2x1x32xf32, #tpu.memory_space<vmem>>, %arg13: memref<2x32x32xf32, #tpu.memory_space<vmem>>, %arg14: memref<2x1x32xf32, #tpu.memory_space<vmem>>, %arg15: memref<2x32x32xf32, #tpu.memory_space<vmem>>, %arg16: memref<2x1x32xf32, #tpu.memory_space<vmem>>, %arg17: memref<2x1x32xf32, #tpu.memory_space<vmem>>, %arg18: memref<2x1x32xf32, #tpu.memory_space<vmem>>, %arg19: memref<2x32x64xf32, #tpu.memory_space<vmem>>, %arg20: memref<2x1x64xf32, #tpu.memory_space<vmem>>, %arg21: memref<2x64x32xf32, #tpu.memory_space<vmem>>, %arg22: memref<2x1x32xf32, #tpu.memory_space<vmem>>, %arg23: memref<2x1x32xf32, #tpu.memory_space<vmem>>, %arg24: memref<2x1x32xf32, #tpu.memory_space<vmem>>, %arg25: memref<1x9x32xf32, #tpu.memory_space<vmem>>) attributes {dimension_semantics = [#tpu.dimension_semantics<parallel>], iteration_bounds = array<i64: 2>, scalar_prefetch = 0 : i64, scratch_operands = 0 : i64, tpu.core_type = #tpu.core_type<tc>, window_params = [{transform_indices = @transform_0, window_bounds = array<i64: 1, 9, 32>}, {transform_indices = @transform_1, window_bounds = array<i64: 1, 9, 1>}, {transform_indices = @transform_2, window_bounds = array<i64: 1, 1, 9>}, {pipeline_mode = #tpu.pipeline_mode<synchronous>, transform_indices = @transform_3, window_bounds = array<i64: 1, 32>}, {pipeline_mode = #tpu.pipeline_mode<synchronous>, transform_indices = @transform_4, window_bounds = array<i64: 2, 32, 32>}, {pipeline_mode = #tpu.pipeline_mode<synchronous>, transform_indices = @transform_5, window_bounds = array<i64: 2, 1, 32>}, {pipeline_mode = #tpu.pipeline_mode<synchronous>, transform_indices = @transform_6, window_bounds = array<i64: 2, 1, 32>}, {pipeline_mode = #tpu.pipeline_mode<synchronous>, transform_indices = @transform_7, window_bounds = array<i64: 2, 1, 32>}, {pipeline_mode = #tpu.pipeline_mode<synchronous>, transform_indices = @transform_8, window_bounds = array<i64: 2, 32, 32>}, {pipeline_mode = #tpu.pipeline_mode<synchronous>, transform_indices = @transform_9, window_bounds = array<i64: 2, 1, 32>}, {pipeline_mode = #tpu.pipeline_mode<synchronous>, transform_indices = @transform_10, window_bounds = array<i64: 2, 32, 32>}, {pipeline_mode = #tpu.pipeline_mode<synchronous>, transform_indices = @transform_11, window_bounds = array<i64: 2, 1, 32>}, {pipeline_mode = #tpu.pipeline_mode<synchronous>, transform_indices = @transform_12, window_bounds = array<i64: 2, 32, 32>}, {pipeline_mode = #tpu.pipeline_mode<synchronous>, transform_indices = @transform_13, window_bounds = array<i64: 2, 1, 32>}, {pipeline_mode = #tpu.pipeline_mode<synchronous>, transform_indices = @transform_14, window_bounds = array<i64: 2, 32, 32>}, {pipeline_mode = #tpu.pipeline_mode<synchronous>, transform_indices = @transform_15, window_bounds = array<i64: 2, 1, 32>}, {pipeline_mode = #tpu.pipeline_mode<synchronous>, transform_indices = @transform_16, window_bounds = array<i64: 2, 1, 32>}, {pipeline_mode = #tpu.pipeline_mode<synchronous>, transform_indices = @transform_17, window_bounds = array<i64: 2, 1, 32>}, {pipeline_mode = #tpu.pipeline_mode<synchronous>, transform_indices = @transform_18, window_bounds = array<i64: 2, 32, 64>}, {pipeline_mode = #tpu.pipeline_mode<synchronous>, transform_indices = @transform_19, window_bounds = array<i64: 2, 1, 64>}, {pipeline_mode = #tpu.pipeline_mode<synchronous>, transform_indices = @transform_20, window_bounds = array<i64: 2, 64, 32>}, {pipeline_mode = #tpu.pipeline_mode<synchronous>, transform_indices = @transform_21, window_bounds = array<i64: 2, 1, 32>}, {pipeline_mode = #tpu.pipeline_mode<synchronous>, transform_indices = @transform_22, window_bounds = array<i64: 2, 1, 32>}, {pipeline_mode = #tpu.pipeline_mode<synchronous>, transform_indices = @transform_23, window_bounds = array<i64: 2, 1, 32>}, {transform_indices = @transform_24, window_bounds = array<i64: 1, 9, 32>}]} {
    %c0 = arith.constant 0 : index
    %c0_0 = arith.constant 0 : index
    %c0_1 = arith.constant 0 : index
    %0 = vector.load %arg1[%c0, %c0_0, %c0_1] : memref<1x9x32xf32, #tpu.memory_space<vmem>>, vector<1x9x32xf32>
    %1 = vector.shape_cast %0 : vector<1x9x32xf32> to vector<9x32xf32>
    %c0_2 = arith.constant 0 : index
    %c0_3 = arith.constant 0 : index
    %c0_4 = arith.constant 0 : index
    %2 = vector.load %arg2[%c0_2, %c0_3, %c0_4] : memref<1x9x1xf32, #tpu.memory_space<vmem>>, vector<1x9x1xf32>
    %3 = vector.shape_cast %2 : vector<1x9x1xf32> to vector<9x1xf32>
    %c0_5 = arith.constant 0 : index
    %c0_6 = arith.constant 0 : index
    %c0_7 = arith.constant 0 : index
    %4 = vector.load %arg3[%c0_5, %c0_6, %c0_7] : memref<1x1x9xf32, #tpu.memory_space<vmem>>, vector<1x1x9xf32>
    %5 = vector.shape_cast %4 : vector<1x1x9xf32> to vector<1x9xf32>
    %c0_8 = arith.constant 0 : index
    %c0_9 = arith.constant 0 : index
    %c0_10 = arith.constant 0 : index
    %6 = vector.load %arg5[%c0_8, %c0_9, %c0_10] : memref<2x32x32xf32, #tpu.memory_space<vmem>>, vector<1x32x32xf32>
    %7 = vector.shape_cast %6 : vector<1x32x32xf32> to vector<32x32xf32>
    %cst = arith.constant dense<0.000000e+00> : vector<9x32xf32>
    %8 = tpu.matmul %1, %7, %cst {dimension_numbers = #tpu.dot_dimension_numbers<[1], [0], [0], [1], [0, 0, 1, 1], [], []>} : vector<9x32xf32>, vector<32x32xf32>, vector<9x32xf32> -> vector<9x32xf32>
    %c0_11 = arith.constant 0 : index
    %c0_12 = arith.constant 0 : index
    %c0_13 = arith.constant 0 : index
    %9 = vector.load %arg6[%c0_11, %c0_12, %c0_13] : memref<2x1x32xf32, #tpu.memory_space<vmem>>, vector<1x1x32xf32>
    %10 = vector.shape_cast %9 : vector<1x1x32xf32> to vector<1x32xf32>
    %11 = vector.broadcast %10 : vector<1x32xf32> to vector<9x32xf32>
    %12 = arith.addf %8, %11 : vector<9x32xf32>
    %13 = arith.mulf %12, %12 : vector<9x32xf32>
    %14 = arith.mulf %12, %13 : vector<9x32xf32>
    %cst_14 = arith.constant 4.471500e-02 : f32
    %15 = vector.broadcast %cst_14 : f32 to vector<9x32xf32>
    %16 = arith.mulf %15, %14 : vector<9x32xf32>
    %17 = arith.addf %12, %16 : vector<9x32xf32>
    %cst_15 = arith.constant 0.797884583 : f32
    %18 = vector.broadcast %cst_15 : f32 to vector<9x32xf32>
    %19 = arith.mulf %18, %17 : vector<9x32xf32>
    %20 = math.tanh %19 : vector<9x32xf32>
    %cst_16 = arith.constant 1.000000e+00 : f32
    %21 = vector.broadcast %cst_16 : f32 to vector<9x32xf32>
    %22 = arith.addf %21, %20 : vector<9x32xf32>
    %cst_17 = arith.constant 5.000000e-01 : f32
    %23 = vector.broadcast %cst_17 : f32 to vector<9x32xf32>
    %24 = arith.mulf %23, %22 : vector<9x32xf32>
    %25 = arith.mulf %12, %24 : vector<9x32xf32>
    %26 = arith.addf %1, %25 : vector<9x32xf32>
    %c0_18 = arith.constant 0 : index
    %c0_19 = arith.constant 0 : index
    %c0_20 = arith.constant 0 : index
    %27 = vector.load %arg7[%c0_18, %c0_19, %c0_20] : memref<2x1x32xf32, #tpu.memory_space<vmem>>, vector<1x1x32xf32>
    %28 = vector.shape_cast %27 : vector<1x1x32xf32> to vector<1x32xf32>
    %c0_21 = arith.constant 0 : index
    %c0_22 = arith.constant 0 : index
    %c0_23 = arith.constant 0 : index
    %29 = vector.load %arg8[%c0_21, %c0_22, %c0_23] : memref<2x1x32xf32, #tpu.memory_space<vmem>>, vector<1x1x32xf32>
    %30 = vector.shape_cast %29 : vector<1x1x32xf32> to vector<1x32xf32>
    %cst_24 = arith.constant dense<0.000000e+00> : vector<9xf32>
    %31 = vector.multi_reduction <add>, %26, %cst_24 [1] : vector<9x32xf32> to vector<9xf32>
    %32 = vector.shape_cast %31 : vector<9xf32> to vector<9x1xf32>
    %cst_25 = arith.constant 3.200000e+01 : f32
    %33 = vector.broadcast %cst_25 : f32 to vector<9x1xf32>
    %34 = arith.divf %32, %33 : vector<9x1xf32>
    %35 = vector.broadcast %34 : vector<9x1xf32> to vector<9x32xf32>
    %36 = arith.subf %26, %35 : vector<9x32xf32>
    %37 = arith.mulf %36, %36 : vector<9x32xf32>
    %cst_26 = arith.constant dense<0.000000e+00> : vector<9xf32>
    %38 = vector.multi_reduction <add>, %37, %cst_26 [1] : vector<9x32xf32> to vector<9xf32>
    %39 = vector.shape_cast %38 : vector<9xf32> to vector<9x1xf32>
    %cst_27 = arith.constant 3.200000e+01 : f32
    %40 = vector.broadcast %cst_27 : f32 to vector<9x1xf32>
    %41 = arith.divf %39, %40 : vector<9x1xf32>
    %42 = vector.broadcast %34 : vector<9x1xf32> to vector<9x32xf32>
    %43 = arith.subf %26, %42 : vector<9x32xf32>
    %cst_28 = arith.constant 9.99999974E-6 : f32
    %44 = vector.broadcast %cst_28 : f32 to vector<9x1xf32>
    %45 = arith.addf %41, %44 : vector<9x1xf32>
    %46 = math.rsqrt %45 : vector<9x1xf32>
    %47 = vector.broadcast %46 : vector<9x1xf32> to vector<9x32xf32>
    %48 = arith.mulf %43, %47 : vector<9x32xf32>
    %49 = vector.broadcast %28 : vector<1x32xf32> to vector<9x32xf32>
    %50 = arith.mulf %48, %49 : vector<9x32xf32>
    %51 = vector.broadcast %30 : vector<1x32xf32> to vector<9x32xf32>
    %52 = arith.addf %50, %51 : vector<9x32xf32>
    %53 = vector.broadcast %3 : vector<9x1xf32> to vector<9x32xf32>
    %54 = arith.mulf %52, %53 : vector<9x32xf32>
    %c1 = arith.constant 1 : index
    %c0_29 = arith.constant 0 : index
    %c0_30 = arith.constant 0 : index
    %55 = vector.load %arg5[%c1, %c0_29, %c0_30] : memref<2x32x32xf32, #tpu.memory_space<vmem>>, vector<1x32x32xf32>
    %56 = vector.shape_cast %55 : vector<1x32x32xf32> to vector<32x32xf32>
    %cst_31 = arith.constant dense<0.000000e+00> : vector<9x32xf32>
    %57 = tpu.matmul %54, %56, %cst_31 {dimension_numbers = #tpu.dot_dimension_numbers<[1], [0], [0], [1], [0, 0, 1, 1], [], []>} : vector<9x32xf32>, vector<32x32xf32>, vector<9x32xf32> -> vector<9x32xf32>
    %c1_32 = arith.constant 1 : index
    %c0_33 = arith.constant 0 : index
    %c0_34 = arith.constant 0 : index
    %58 = vector.load %arg6[%c1_32, %c0_33, %c0_34] : memref<2x1x32xf32, #tpu.memory_space<vmem>>, vector<1x1x32xf32>
    %59 = vector.shape_cast %58 : vector<1x1x32xf32> to vector<1x32xf32>
    %60 = vector.broadcast %59 : vector<1x32xf32> to vector<9x32xf32>
    %61 = arith.addf %57, %60 : vector<9x32xf32>
    %62 = arith.mulf %61, %61 : vector<9x32xf32>
    %63 = arith.mulf %61, %62 : vector<9x32xf32>
    %cst_35 = arith.constant 4.471500e-02 : f32
    %64 = vector.broadcast %cst_35 : f32 to vector<9x32xf32>
    %65 = arith.mulf %64, %63 : vector<9x32xf32>
    %66 = arith.addf %61, %65 : vector<9x32xf32>
    %cst_36 = arith.constant 0.797884583 : f32
    %67 = vector.broadcast %cst_36 : f32 to vector<9x32xf32>
    %68 = arith.mulf %67, %66 : vector<9x32xf32>
    %69 = math.tanh %68 : vector<9x32xf32>
    %cst_37 = arith.constant 1.000000e+00 : f32
    %70 = vector.broadcast %cst_37 : f32 to vector<9x32xf32>
    %71 = arith.addf %70, %69 : vector<9x32xf32>
    %cst_38 = arith.constant 5.000000e-01 : f32
    %72 = vector.broadcast %cst_38 : f32 to vector<9x32xf32>
    %73 = arith.mulf %72, %71 : vector<9x32xf32>
    %74 = arith.mulf %61, %73 : vector<9x32xf32>
    %75 = arith.addf %54, %74 : vector<9x32xf32>
    %c1_39 = arith.constant 1 : index
    %c0_40 = arith.constant 0 : index
    %c0_41 = arith.constant 0 : index
    %76 = vector.load %arg7[%c1_39, %c0_40, %c0_41] : memref<2x1x32xf32, #tpu.memory_space<vmem>>, vector<1x1x32xf32>
    %77 = vector.shape_cast %76 : vector<1x1x32xf32> to vector<1x32xf32>
    %c1_42 = arith.constant 1 : index
    %c0_43 = arith.constant 0 : index
    %c0_44 = arith.constant 0 : index
    %78 = vector.load %arg8[%c1_42, %c0_43, %c0_44] : memref<2x1x32xf32, #tpu.memory_space<vmem>>, vector<1x1x32xf32>
    %79 = vector.shape_cast %78 : vector<1x1x32xf32> to vector<1x32xf32>
    %cst_45 = arith.constant dense<0.000000e+00> : vector<9xf32>
    %80 = vector.multi_reduction <add>, %75, %cst_45 [1] : vector<9x32xf32> to vector<9xf32>
    %81 = vector.shape_cast %80 : vector<9xf32> to vector<9x1xf32>
    %cst_46 = arith.constant 3.200000e+01 : f32
    %82 = vector.broadcast %cst_46 : f32 to vector<9x1xf32>
    %83 = arith.divf %81, %82 : vector<9x1xf32>
    %84 = vector.broadcast %83 : vector<9x1xf32> to vector<9x32xf32>
    %85 = arith.subf %75, %84 : vector<9x32xf32>
    %86 = arith.mulf %85, %85 : vector<9x32xf32>
    %cst_47 = arith.constant dense<0.000000e+00> : vector<9xf32>
    %87 = vector.multi_reduction <add>, %86, %cst_47 [1] : vector<9x32xf32> to vector<9xf32>
    %88 = vector.shape_cast %87 : vector<9xf32> to vector<9x1xf32>
    %cst_48 = arith.constant 3.200000e+01 : f32
    %89 = vector.broadcast %cst_48 : f32 to vector<9x1xf32>
    %90 = arith.divf %88, %89 : vector<9x1xf32>
    %91 = vector.broadcast %83 : vector<9x1xf32> to vector<9x32xf32>
    %92 = arith.subf %75, %91 : vector<9x32xf32>
    %cst_49 = arith.constant 9.99999974E-6 : f32
    %93 = vector.broadcast %cst_49 : f32 to vector<9x1xf32>
    %94 = arith.addf %90, %93 : vector<9x1xf32>
    %95 = math.rsqrt %94 : vector<9x1xf32>
    %96 = vector.broadcast %95 : vector<9x1xf32> to vector<9x32xf32>
    %97 = arith.mulf %92, %96 : vector<9x32xf32>
    %98 = vector.broadcast %77 : vector<1x32xf32> to vector<9x32xf32>
    %99 = arith.mulf %97, %98 : vector<9x32xf32>
    %100 = vector.broadcast %79 : vector<1x32xf32> to vector<9x32xf32>
    %101 = arith.addf %99, %100 : vector<9x32xf32>
    %102 = vector.broadcast %3 : vector<9x1xf32> to vector<9x32xf32>
    %103 = arith.mulf %101, %102 : vector<9x32xf32>
    %104 = tpu.iota {dimensions = array<i32: 0>} : vector<9x1xi32>
    %c0_i32 = arith.constant 0 : i32
    %105 = vector.broadcast %c0_i32 : i32 to vector<9x1xi32>
    %106 = arith.cmpi eq, %104, %105 : vector<9x1xi32>
    %c0_50 = arith.constant 0 : index
    %c0_51 = arith.constant 0 : index
    %107 = vector.load %arg4[%c0_50, %c0_51] : memref<1x32xf32, #tpu.memory_space<vmem>>, vector<1x32xf32>
    %108 = vector.shape_cast %106 : vector<9x1xi1> to vector<9x1xi1>
    %109 = vector.broadcast %108 : vector<9x1xi1> to vector<9x32xi1>
    %110 = vector.shape_cast %107 : vector<1x32xf32> to vector<1x32xf32>
    %111 = vector.broadcast %110 : vector<1x32xf32> to vector<9x32xf32>
    %112 = arith.select %109, %111, %103 : vector<9x32xi1>, vector<9x32xf32>
    %c0_52 = arith.constant 0 : index
    %c0_53 = arith.constant 0 : index
    %c0_54 = arith.constant 0 : index
    %113 = vector.load %arg9[%c0_52, %c0_53, %c0_54] : memref<2x32x32xf32, #tpu.memory_space<vmem>>, vector<1x32x32xf32>
    %114 = vector.shape_cast %113 : vector<1x32x32xf32> to vector<32x32xf32>
    %cst_55 = arith.constant dense<0.000000e+00> : vector<9x32xf32>
    %115 = tpu.matmul %112, %114, %cst_55 {dimension_numbers = #tpu.dot_dimension_numbers<[1], [0], [0], [1], [0, 0, 1, 1], [], []>} : vector<9x32xf32>, vector<32x32xf32>, vector<9x32xf32> -> vector<9x32xf32>
    %c0_56 = arith.constant 0 : index
    %c0_57 = arith.constant 0 : index
    %c0_58 = arith.constant 0 : index
    %116 = vector.load %arg10[%c0_56, %c0_57, %c0_58] : memref<2x1x32xf32, #tpu.memory_space<vmem>>, vector<1x1x32xf32>
    %117 = vector.shape_cast %116 : vector<1x1x32xf32> to vector<1x32xf32>
    %118 = vector.broadcast %117 : vector<1x32xf32> to vector<9x32xf32>
    %119 = arith.addf %115, %118 : vector<9x32xf32>
    %c0_59 = arith.constant 0 : index
    %c0_60 = arith.constant 0 : index
    %c0_61 = arith.constant 0 : index
    %120 = vector.load %arg11[%c0_59, %c0_60, %c0_61] : memref<2x32x32xf32, #tpu.memory_space<vmem>>, vector<1x32x32xf32>
    %121 = vector.shape_cast %120 : vector<1x32x32xf32> to vector<32x32xf32>
    %cst_62 = arith.constant dense<0.000000e+00> : vector<9x32xf32>
    %122 = tpu.matmul %112, %121, %cst_62 {dimension_numbers = #tpu.dot_dimension_numbers<[1], [0], [0], [1], [0, 0, 1, 1], [], []>} : vector<9x32xf32>, vector<32x32xf32>, vector<9x32xf32> -> vector<9x32xf32>
    %c0_63 = arith.constant 0 : index
    %c0_64 = arith.constant 0 : index
    %c0_65 = arith.constant 0 : index
    %123 = vector.load %arg12[%c0_63, %c0_64, %c0_65] : memref<2x1x32xf32, #tpu.memory_space<vmem>>, vector<1x1x32xf32>
    %124 = vector.shape_cast %123 : vector<1x1x32xf32> to vector<1x32xf32>
    %125 = vector.broadcast %124 : vector<1x32xf32> to vector<9x32xf32>
    %126 = arith.addf %122, %125 : vector<9x32xf32>
    %c0_66 = arith.constant 0 : index
    %c0_67 = arith.constant 0 : index
    %c0_68 = arith.constant 0 : index
    %127 = vector.load %arg13[%c0_66, %c0_67, %c0_68] : memref<2x32x32xf32, #tpu.memory_space<vmem>>, vector<1x32x32xf32>
    %128 = vector.shape_cast %127 : vector<1x32x32xf32> to vector<32x32xf32>
    %cst_69 = arith.constant dense<0.000000e+00> : vector<9x32xf32>
    %129 = tpu.matmul %112, %128, %cst_69 {dimension_numbers = #tpu.dot_dimension_numbers<[1], [0], [0], [1], [0, 0, 1, 1], [], []>} : vector<9x32xf32>, vector<32x32xf32>, vector<9x32xf32> -> vector<9x32xf32>
    %c0_70 = arith.constant 0 : index
    %c0_71 = arith.constant 0 : index
    %c0_72 = arith.constant 0 : index
    %130 = vector.load %arg14[%c0_70, %c0_71, %c0_72] : memref<2x1x32xf32, #tpu.memory_space<vmem>>, vector<1x1x32xf32>
    %131 = vector.shape_cast %130 : vector<1x1x32xf32> to vector<1x32xf32>
    %132 = vector.broadcast %131 : vector<1x32xf32> to vector<9x32xf32>
    %133 = arith.addf %129, %132 : vector<9x32xf32>
    %c0_73 = arith.constant 0 : index
    %c0_74 = arith.constant 0 : index
    %c0_75 = arith.constant 0 : index
    %134 = vector.load %arg15[%c0_73, %c0_74, %c0_75] : memref<2x32x32xf32, #tpu.memory_space<vmem>>, vector<1x32x32xf32>
    %135 = vector.shape_cast %134 : vector<1x32x32xf32> to vector<32x32xf32>
    %cst_76 = arith.constant 0.000000e+00 : f32
    %136 = vector.broadcast %cst_76 : f32 to vector<9x32xf32>
    %137 = vector.extract_strided_slice %119 {offsets = [0, 0], sizes = [9, 8], strides = [1, 1]} : vector<9x32xf32> to vector<9x8xf32>
    %138 = vector.extract_strided_slice %126 {offsets = [0, 0], sizes = [9, 8], strides = [1, 1]} : vector<9x32xf32> to vector<9x8xf32>
    %139 = vector.extract_strided_slice %133 {offsets = [0, 0], sizes = [9, 8], strides = [1, 1]} : vector<9x32xf32> to vector<9x8xf32>
    %cst_77 = arith.constant dense<0.000000e+00> : vector<9x9xf32>
    %140 = tpu.matmul %137, %138, %cst_77 {dimension_numbers = #tpu.dot_dimension_numbers<[1], [1], [0], [0], [0, 0, 1, 0], [], []>} : vector<9x8xf32>, vector<9x8xf32>, vector<9x9xf32> -> vector<9x9xf32>
    %cst_78 = arith.constant 0.353553385 : f32
    %141 = vector.broadcast %cst_78 : f32 to vector<9x9xf32>
    %142 = arith.mulf %140, %141 : vector<9x9xf32>
    %143 = vector.broadcast %5 : vector<1x9xf32> to vector<9x9xf32>
    %144 = arith.addf %142, %143 : vector<9x9xf32>
    %cst_79 = arith.constant dense<0xFF800000> : vector<9xf32>
    %145 = vector.multi_reduction <maximumf>, %144, %cst_79 [1] : vector<9x9xf32> to vector<9xf32>
    %146 = vector.shape_cast %145 : vector<9xf32> to vector<9x1xf32>
    %147 = vector.broadcast %146 : vector<9x1xf32> to vector<9x9xf32>
    %148 = arith.subf %144, %147 : vector<9x9xf32>
    %149 = math.exp %148 : vector<9x9xf32>
    %cst_80 = arith.constant dense<0.000000e+00> : vector<9xf32>
    %150 = vector.multi_reduction <add>, %149, %cst_80 [1] : vector<9x9xf32> to vector<9xf32>
    %151 = vector.shape_cast %150 : vector<9xf32> to vector<9x1xf32>
    %152 = tpu.reciprocal %151 {approx = true} : vector<9x1xf32> -> vector<9x1xf32>
    %153 = vector.broadcast %152 : vector<9x1xf32> to vector<9x9xf32>
    %154 = arith.mulf %149, %153 : vector<9x9xf32>
    %cst_81 = arith.constant dense<0.000000e+00> : vector<9x8xf32>
    %155 = tpu.matmul %154, %139, %cst_81 {dimension_numbers = #tpu.dot_dimension_numbers<[1], [0], [0], [1], [0, 0, 1, 1], [], []>} : vector<9x9xf32>, vector<9x8xf32>, vector<9x8xf32> -> vector<9x8xf32>
    %156 = vector.extract_strided_slice %135 {offsets = [0, 0], sizes = [8, 32], strides = [1, 1]} : vector<32x32xf32> to vector<8x32xf32>
    %cst_82 = arith.constant dense<0.000000e+00> : vector<9x32xf32>
    %157 = tpu.matmul %155, %156, %cst_82 {dimension_numbers = #tpu.dot_dimension_numbers<[1], [0], [0], [1], [0, 0, 1, 1], [], []>} : vector<9x8xf32>, vector<8x32xf32>, vector<9x32xf32> -> vector<9x32xf32>
    %158 = arith.addf %136, %157 : vector<9x32xf32>
    %159 = vector.extract_strided_slice %119 {offsets = [0, 8], sizes = [9, 8], strides = [1, 1]} : vector<9x32xf32> to vector<9x8xf32>
    %160 = vector.extract_strided_slice %126 {offsets = [0, 8], sizes = [9, 8], strides = [1, 1]} : vector<9x32xf32> to vector<9x8xf32>
    %161 = vector.extract_strided_slice %133 {offsets = [0, 8], sizes = [9, 8], strides = [1, 1]} : vector<9x32xf32> to vector<9x8xf32>
    %cst_83 = arith.constant dense<0.000000e+00> : vector<9x9xf32>
    %162 = tpu.matmul %159, %160, %cst_83 {dimension_numbers = #tpu.dot_dimension_numbers<[1], [1], [0], [0], [0, 0, 1, 0], [], []>} : vector<9x8xf32>, vector<9x8xf32>, vector<9x9xf32> -> vector<9x9xf32>
    %cst_84 = arith.constant 0.353553385 : f32
    %163 = vector.broadcast %cst_84 : f32 to vector<9x9xf32>
    %164 = arith.mulf %162, %163 : vector<9x9xf32>
    %165 = vector.broadcast %5 : vector<1x9xf32> to vector<9x9xf32>
    %166 = arith.addf %164, %165 : vector<9x9xf32>
    %cst_85 = arith.constant dense<0xFF800000> : vector<9xf32>
    %167 = vector.multi_reduction <maximumf>, %166, %cst_85 [1] : vector<9x9xf32> to vector<9xf32>
    %168 = vector.shape_cast %167 : vector<9xf32> to vector<9x1xf32>
    %169 = vector.broadcast %168 : vector<9x1xf32> to vector<9x9xf32>
    %170 = arith.subf %166, %169 : vector<9x9xf32>
    %171 = math.exp %170 : vector<9x9xf32>
    %cst_86 = arith.constant dense<0.000000e+00> : vector<9xf32>
    %172 = vector.multi_reduction <add>, %171, %cst_86 [1] : vector<9x9xf32> to vector<9xf32>
    %173 = vector.shape_cast %172 : vector<9xf32> to vector<9x1xf32>
    %174 = tpu.reciprocal %173 {approx = true} : vector<9x1xf32> -> vector<9x1xf32>
    %175 = vector.broadcast %174 : vector<9x1xf32> to vector<9x9xf32>
    %176 = arith.mulf %171, %175 : vector<9x9xf32>
    %cst_87 = arith.constant dense<0.000000e+00> : vector<9x8xf32>
    %177 = tpu.matmul %176, %161, %cst_87 {dimension_numbers = #tpu.dot_dimension_numbers<[1], [0], [0], [1], [0, 0, 1, 1], [], []>} : vector<9x9xf32>, vector<9x8xf32>, vector<9x8xf32> -> vector<9x8xf32>
    %178 = vector.extract_strided_slice %135 {offsets = [8, 0], sizes = [8, 32], strides = [1, 1]} : vector<32x32xf32> to vector<8x32xf32>
    %cst_88 = arith.constant dense<0.000000e+00> : vector<9x32xf32>
    %179 = tpu.matmul %177, %178, %cst_88 {dimension_numbers = #tpu.dot_dimension_numbers<[1], [0], [0], [1], [0, 0, 1, 1], [], []>} : vector<9x8xf32>, vector<8x32xf32>, vector<9x32xf32> -> vector<9x32xf32>
    %180 = arith.addf %158, %179 : vector<9x32xf32>
    %181 = vector.extract_strided_slice %119 {offsets = [0, 16], sizes = [9, 8], strides = [1, 1]} : vector<9x32xf32> to vector<9x8xf32>
    %182 = vector.extract_strided_slice %126 {offsets = [0, 16], sizes = [9, 8], strides = [1, 1]} : vector<9x32xf32> to vector<9x8xf32>
    %183 = vector.extract_strided_slice %133 {offsets = [0, 16], sizes = [9, 8], strides = [1, 1]} : vector<9x32xf32> to vector<9x8xf32>
    %cst_89 = arith.constant dense<0.000000e+00> : vector<9x9xf32>
    %184 = tpu.matmul %181, %182, %cst_89 {dimension_numbers = #tpu.dot_dimension_numbers<[1], [1], [0], [0], [0, 0, 1, 0], [], []>} : vector<9x8xf32>, vector<9x8xf32>, vector<9x9xf32> -> vector<9x9xf32>
    %cst_90 = arith.constant 0.353553385 : f32
    %185 = vector.broadcast %cst_90 : f32 to vector<9x9xf32>
    %186 = arith.mulf %184, %185 : vector<9x9xf32>
    %187 = vector.broadcast %5 : vector<1x9xf32> to vector<9x9xf32>
    %188 = arith.addf %186, %187 : vector<9x9xf32>
    %cst_91 = arith.constant dense<0xFF800000> : vector<9xf32>
    %189 = vector.multi_reduction <maximumf>, %188, %cst_91 [1] : vector<9x9xf32> to vector<9xf32>
    %190 = vector.shape_cast %189 : vector<9xf32> to vector<9x1xf32>
    %191 = vector.broadcast %190 : vector<9x1xf32> to vector<9x9xf32>
    %192 = arith.subf %188, %191 : vector<9x9xf32>
    %193 = math.exp %192 : vector<9x9xf32>
    %cst_92 = arith.constant dense<0.000000e+00> : vector<9xf32>
    %194 = vector.multi_reduction <add>, %193, %cst_92 [1] : vector<9x9xf32> to vector<9xf32>
    %195 = vector.shape_cast %194 : vector<9xf32> to vector<9x1xf32>
    %196 = tpu.reciprocal %195 {approx = true} : vector<9x1xf32> -> vector<9x1xf32>
    %197 = vector.broadcast %196 : vector<9x1xf32> to vector<9x9xf32>
    %198 = arith.mulf %193, %197 : vector<9x9xf32>
    %cst_93 = arith.constant dense<0.000000e+00> : vector<9x8xf32>
    %199 = tpu.matmul %198, %183, %cst_93 {dimension_numbers = #tpu.dot_dimension_numbers<[1], [0], [0], [1], [0, 0, 1, 1], [], []>} : vector<9x9xf32>, vector<9x8xf32>, vector<9x8xf32> -> vector<9x8xf32>
    %200 = vector.extract_strided_slice %135 {offsets = [16, 0], sizes = [8, 32], strides = [1, 1]} : vector<32x32xf32> to vector<8x32xf32>
    %cst_94 = arith.constant dense<0.000000e+00> : vector<9x32xf32>
    %201 = tpu.matmul %199, %200, %cst_94 {dimension_numbers = #tpu.dot_dimension_numbers<[1], [0], [0], [1], [0, 0, 1, 1], [], []>} : vector<9x8xf32>, vector<8x32xf32>, vector<9x32xf32> -> vector<9x32xf32>
    %202 = arith.addf %180, %201 : vector<9x32xf32>
    %203 = vector.extract_strided_slice %119 {offsets = [0, 24], sizes = [9, 8], strides = [1, 1]} : vector<9x32xf32> to vector<9x8xf32>
    %204 = vector.extract_strided_slice %126 {offsets = [0, 24], sizes = [9, 8], strides = [1, 1]} : vector<9x32xf32> to vector<9x8xf32>
    %205 = vector.extract_strided_slice %133 {offsets = [0, 24], sizes = [9, 8], strides = [1, 1]} : vector<9x32xf32> to vector<9x8xf32>
    %cst_95 = arith.constant dense<0.000000e+00> : vector<9x9xf32>
    %206 = tpu.matmul %203, %204, %cst_95 {dimension_numbers = #tpu.dot_dimension_numbers<[1], [1], [0], [0], [0, 0, 1, 0], [], []>} : vector<9x8xf32>, vector<9x8xf32>, vector<9x9xf32> -> vector<9x9xf32>
    %cst_96 = arith.constant 0.353553385 : f32
    %207 = vector.broadcast %cst_96 : f32 to vector<9x9xf32>
    %208 = arith.mulf %206, %207 : vector<9x9xf32>
    %209 = vector.broadcast %5 : vector<1x9xf32> to vector<9x9xf32>
    %210 = arith.addf %208, %209 : vector<9x9xf32>
    %cst_97 = arith.constant dense<0xFF800000> : vector<9xf32>
    %211 = vector.multi_reduction <maximumf>, %210, %cst_97 [1] : vector<9x9xf32> to vector<9xf32>
    %212 = vector.shape_cast %211 : vector<9xf32> to vector<9x1xf32>
    %213 = vector.broadcast %212 : vector<9x1xf32> to vector<9x9xf32>
    %214 = arith.subf %210, %213 : vector<9x9xf32>
    %215 = math.exp %214 : vector<9x9xf32>
    %cst_98 = arith.constant dense<0.000000e+00> : vector<9xf32>
    %216 = vector.multi_reduction <add>, %215, %cst_98 [1] : vector<9x9xf32> to vector<9xf32>
    %217 = vector.shape_cast %216 : vector<9xf32> to vector<9x1xf32>
    %218 = tpu.reciprocal %217 {approx = true} : vector<9x1xf32> -> vector<9x1xf32>
    %219 = vector.broadcast %218 : vector<9x1xf32> to vector<9x9xf32>
    %220 = arith.mulf %215, %219 : vector<9x9xf32>
    %cst_99 = arith.constant dense<0.000000e+00> : vector<9x8xf32>
    %221 = tpu.matmul %220, %205, %cst_99 {dimension_numbers = #tpu.dot_dimension_numbers<[1], [0], [0], [1], [0, 0, 1, 1], [], []>} : vector<9x9xf32>, vector<9x8xf32>, vector<9x8xf32> -> vector<9x8xf32>
    %222 = vector.extract_strided_slice %135 {offsets = [24, 0], sizes = [8, 32], strides = [1, 1]} : vector<32x32xf32> to vector<8x32xf32>
    %cst_100 = arith.constant dense<0.000000e+00> : vector<9x32xf32>
    %223 = tpu.matmul %221, %222, %cst_100 {dimension_numbers = #tpu.dot_dimension_numbers<[1], [0], [0], [1], [0, 0, 1, 1], [], []>} : vector<9x8xf32>, vector<8x32xf32>, vector<9x32xf32> -> vector<9x32xf32>
    %224 = arith.addf %202, %223 : vector<9x32xf32>
    %225 = arith.addf %112, %224 : vector<9x32xf32>
    %c0_101 = arith.constant 0 : index
    %c0_102 = arith.constant 0 : index
    %c0_103 = arith.constant 0 : index
    %226 = vector.load %arg16[%c0_101, %c0_102, %c0_103] : memref<2x1x32xf32, #tpu.memory_space<vmem>>, vector<1x1x32xf32>
    %227 = vector.shape_cast %226 : vector<1x1x32xf32> to vector<1x32xf32>
    %228 = vector.broadcast %227 : vector<1x32xf32> to vector<9x32xf32>
    %229 = arith.addf %225, %228 : vector<9x32xf32>
    %c0_104 = arith.constant 0 : index
    %c0_105 = arith.constant 0 : index
    %c0_106 = arith.constant 0 : index
    %230 = vector.load %arg17[%c0_104, %c0_105, %c0_106] : memref<2x1x32xf32, #tpu.memory_space<vmem>>, vector<1x1x32xf32>
    %231 = vector.shape_cast %230 : vector<1x1x32xf32> to vector<1x32xf32>
    %c0_107 = arith.constant 0 : index
    %c0_108 = arith.constant 0 : index
    %c0_109 = arith.constant 0 : index
    %232 = vector.load %arg18[%c0_107, %c0_108, %c0_109] : memref<2x1x32xf32, #tpu.memory_space<vmem>>, vector<1x1x32xf32>
    %233 = vector.shape_cast %232 : vector<1x1x32xf32> to vector<1x32xf32>
    %cst_110 = arith.constant dense<0.000000e+00> : vector<9xf32>
    %234 = vector.multi_reduction <add>, %229, %cst_110 [1] : vector<9x32xf32> to vector<9xf32>
    %235 = vector.shape_cast %234 : vector<9xf32> to vector<9x1xf32>
    %cst_111 = arith.constant 3.200000e+01 : f32
    %236 = vector.broadcast %cst_111 : f32 to vector<9x1xf32>
    %237 = arith.divf %235, %236 : vector<9x1xf32>
    %238 = vector.broadcast %237 : vector<9x1xf32> to vector<9x32xf32>
    %239 = arith.subf %229, %238 : vector<9x32xf32>
    %240 = arith.mulf %239, %239 : vector<9x32xf32>
    %cst_112 = arith.constant dense<0.000000e+00> : vector<9xf32>
    %241 = vector.multi_reduction <add>, %240, %cst_112 [1] : vector<9x32xf32> to vector<9xf32>
    %242 = vector.shape_cast %241 : vector<9xf32> to vector<9x1xf32>
    %cst_113 = arith.constant 3.200000e+01 : f32
    %243 = vector.broadcast %cst_113 : f32 to vector<9x1xf32>
    %244 = arith.divf %242, %243 : vector<9x1xf32>
    %245 = vector.broadcast %237 : vector<9x1xf32> to vector<9x32xf32>
    %246 = arith.subf %229, %245 : vector<9x32xf32>
    %cst_114 = arith.constant 9.99999974E-6 : f32
    %247 = vector.broadcast %cst_114 : f32 to vector<9x1xf32>
    %248 = arith.addf %244, %247 : vector<9x1xf32>
    %249 = math.rsqrt %248 : vector<9x1xf32>
    %250 = vector.broadcast %249 : vector<9x1xf32> to vector<9x32xf32>
    %251 = arith.mulf %246, %250 : vector<9x32xf32>
    %252 = vector.broadcast %231 : vector<1x32xf32> to vector<9x32xf32>
    %253 = arith.mulf %251, %252 : vector<9x32xf32>
    %254 = vector.broadcast %233 : vector<1x32xf32> to vector<9x32xf32>
    %255 = arith.addf %253, %254 : vector<9x32xf32>
    %256 = vector.broadcast %3 : vector<9x1xf32> to vector<9x32xf32>
    %257 = arith.mulf %255, %256 : vector<9x32xf32>
    %c0_115 = arith.constant 0 : index
    %c0_116 = arith.constant 0 : index
    %c0_117 = arith.constant 0 : index
    %258 = vector.load %arg19[%c0_115, %c0_116, %c0_117] : memref<2x32x64xf32, #tpu.memory_space<vmem>>, vector<1x32x64xf32>
    %259 = vector.shape_cast %258 : vector<1x32x64xf32> to vector<32x64xf32>
    %cst_118 = arith.constant dense<0.000000e+00> : vector<9x64xf32>
    %260 = tpu.matmul %257, %259, %cst_118 {dimension_numbers = #tpu.dot_dimension_numbers<[1], [0], [0], [1], [0, 0, 1, 1], [], []>} : vector<9x32xf32>, vector<32x64xf32>, vector<9x64xf32> -> vector<9x64xf32>
    %c0_119 = arith.constant 0 : index
    %c0_120 = arith.constant 0 : index
    %c0_121 = arith.constant 0 : index
    %261 = vector.load %arg20[%c0_119, %c0_120, %c0_121] : memref<2x1x64xf32, #tpu.memory_space<vmem>>, vector<1x1x64xf32>
    %262 = vector.shape_cast %261 : vector<1x1x64xf32> to vector<1x64xf32>
    %263 = vector.broadcast %262 : vector<1x64xf32> to vector<9x64xf32>
    %264 = arith.addf %260, %263 : vector<9x64xf32>
    %265 = arith.mulf %264, %264 : vector<9x64xf32>
    %266 = arith.mulf %264, %265 : vector<9x64xf32>
    %cst_122 = arith.constant 4.471500e-02 : f32
    %267 = vector.broadcast %cst_122 : f32 to vector<9x64xf32>
    %268 = arith.mulf %267, %266 : vector<9x64xf32>
    %269 = arith.addf %264, %268 : vector<9x64xf32>
    %cst_123 = arith.constant 0.797884583 : f32
    %270 = vector.broadcast %cst_123 : f32 to vector<9x64xf32>
    %271 = arith.mulf %270, %269 : vector<9x64xf32>
    %272 = math.tanh %271 : vector<9x64xf32>
    %cst_124 = arith.constant 1.000000e+00 : f32
    %273 = vector.broadcast %cst_124 : f32 to vector<9x64xf32>
    %274 = arith.addf %273, %272 : vector<9x64xf32>
    %cst_125 = arith.constant 5.000000e-01 : f32
    %275 = vector.broadcast %cst_125 : f32 to vector<9x64xf32>
    %276 = arith.mulf %275, %274 : vector<9x64xf32>
    %277 = arith.mulf %264, %276 : vector<9x64xf32>
    %c0_126 = arith.constant 0 : index
    %c0_127 = arith.constant 0 : index
    %c0_128 = arith.constant 0 : index
    %278 = vector.load %arg21[%c0_126, %c0_127, %c0_128] : memref<2x64x32xf32, #tpu.memory_space<vmem>>, vector<1x64x32xf32>
    %279 = vector.shape_cast %278 : vector<1x64x32xf32> to vector<64x32xf32>
    %cst_129 = arith.constant dense<0.000000e+00> : vector<9x32xf32>
    %280 = tpu.matmul %277, %279, %cst_129 {dimension_numbers = #tpu.dot_dimension_numbers<[1], [0], [0], [1], [0, 0, 1, 1], [], []>} : vector<9x64xf32>, vector<64x32xf32>, vector<9x32xf32> -> vector<9x32xf32>
    %c0_130 = arith.constant 0 : index
    %c0_131 = arith.constant 0 : index
    %c0_132 = arith.constant 0 : index
    %281 = vector.load %arg22[%c0_130, %c0_131, %c0_132] : memref<2x1x32xf32, #tpu.memory_space<vmem>>, vector<1x1x32xf32>
    %282 = vector.shape_cast %281 : vector<1x1x32xf32> to vector<1x32xf32>
    %283 = vector.broadcast %282 : vector<1x32xf32> to vector<9x32xf32>
    %284 = arith.addf %280, %283 : vector<9x32xf32>
    %285 = arith.addf %257, %284 : vector<9x32xf32>
    %c0_133 = arith.constant 0 : index
    %c0_134 = arith.constant 0 : index
    %c0_135 = arith.constant 0 : index
    %286 = vector.load %arg23[%c0_133, %c0_134, %c0_135] : memref<2x1x32xf32, #tpu.memory_space<vmem>>, vector<1x1x32xf32>
    %287 = vector.shape_cast %286 : vector<1x1x32xf32> to vector<1x32xf32>
    %c0_136 = arith.constant 0 : index
    %c0_137 = arith.constant 0 : index
    %c0_138 = arith.constant 0 : index
    %288 = vector.load %arg24[%c0_136, %c0_137, %c0_138] : memref<2x1x32xf32, #tpu.memory_space<vmem>>, vector<1x1x32xf32>
    %289 = vector.shape_cast %288 : vector<1x1x32xf32> to vector<1x32xf32>
    %cst_139 = arith.constant dense<0.000000e+00> : vector<9xf32>
    %290 = vector.multi_reduction <add>, %285, %cst_139 [1] : vector<9x32xf32> to vector<9xf32>
    %291 = vector.shape_cast %290 : vector<9xf32> to vector<9x1xf32>
    %cst_140 = arith.constant 3.200000e+01 : f32
    %292 = vector.broadcast %cst_140 : f32 to vector<9x1xf32>
    %293 = arith.divf %291, %292 : vector<9x1xf32>
    %294 = vector.broadcast %293 : vector<9x1xf32> to vector<9x32xf32>
    %295 = arith.subf %285, %294 : vector<9x32xf32>
    %296 = arith.mulf %295, %295 : vector<9x32xf32>
    %cst_141 = arith.constant dense<0.000000e+00> : vector<9xf32>
    %297 = vector.multi_reduction <add>, %296, %cst_141 [1] : vector<9x32xf32> to vector<9xf32>
    %298 = vector.shape_cast %297 : vector<9xf32> to vector<9x1xf32>
    %cst_142 = arith.constant 3.200000e+01 : f32
    %299 = vector.broadcast %cst_142 : f32 to vector<9x1xf32>
    %300 = arith.divf %298, %299 : vector<9x1xf32>
    %301 = vector.broadcast %293 : vector<9x1xf32> to vector<9x32xf32>
    %302 = arith.subf %285, %301 : vector<9x32xf32>
    %cst_143 = arith.constant 9.99999974E-6 : f32
    %303 = vector.broadcast %cst_143 : f32 to vector<9x1xf32>
    %304 = arith.addf %300, %303 : vector<9x1xf32>
    %305 = math.rsqrt %304 : vector<9x1xf32>
    %306 = vector.broadcast %305 : vector<9x1xf32> to vector<9x32xf32>
    %307 = arith.mulf %302, %306 : vector<9x32xf32>
    %308 = vector.broadcast %287 : vector<1x32xf32> to vector<9x32xf32>
    %309 = arith.mulf %307, %308 : vector<9x32xf32>
    %310 = vector.broadcast %289 : vector<1x32xf32> to vector<9x32xf32>
    %311 = arith.addf %309, %310 : vector<9x32xf32>
    %312 = vector.broadcast %3 : vector<9x1xf32> to vector<9x32xf32>
    %313 = arith.mulf %311, %312 : vector<9x32xf32>
    %c1_144 = arith.constant 1 : index
    %c0_145 = arith.constant 0 : index
    %c0_146 = arith.constant 0 : index
    %314 = vector.load %arg9[%c1_144, %c0_145, %c0_146] : memref<2x32x32xf32, #tpu.memory_space<vmem>>, vector<1x32x32xf32>
    %315 = vector.shape_cast %314 : vector<1x32x32xf32> to vector<32x32xf32>
    %cst_147 = arith.constant dense<0.000000e+00> : vector<9x32xf32>
    %316 = tpu.matmul %313, %315, %cst_147 {dimension_numbers = #tpu.dot_dimension_numbers<[1], [0], [0], [1], [0, 0, 1, 1], [], []>} : vector<9x32xf32>, vector<32x32xf32>, vector<9x32xf32> -> vector<9x32xf32>
    %c1_148 = arith.constant 1 : index
    %c0_149 = arith.constant 0 : index
    %c0_150 = arith.constant 0 : index
    %317 = vector.load %arg10[%c1_148, %c0_149, %c0_150] : memref<2x1x32xf32, #tpu.memory_space<vmem>>, vector<1x1x32xf32>
    %318 = vector.shape_cast %317 : vector<1x1x32xf32> to vector<1x32xf32>
    %319 = vector.broadcast %318 : vector<1x32xf32> to vector<9x32xf32>
    %320 = arith.addf %316, %319 : vector<9x32xf32>
    %c1_151 = arith.constant 1 : index
    %c0_152 = arith.constant 0 : index
    %c0_153 = arith.constant 0 : index
    %321 = vector.load %arg11[%c1_151, %c0_152, %c0_153] : memref<2x32x32xf32, #tpu.memory_space<vmem>>, vector<1x32x32xf32>
    %322 = vector.shape_cast %321 : vector<1x32x32xf32> to vector<32x32xf32>
    %cst_154 = arith.constant dense<0.000000e+00> : vector<9x32xf32>
    %323 = tpu.matmul %313, %322, %cst_154 {dimension_numbers = #tpu.dot_dimension_numbers<[1], [0], [0], [1], [0, 0, 1, 1], [], []>} : vector<9x32xf32>, vector<32x32xf32>, vector<9x32xf32> -> vector<9x32xf32>
    %c1_155 = arith.constant 1 : index
    %c0_156 = arith.constant 0 : index
    %c0_157 = arith.constant 0 : index
    %324 = vector.load %arg12[%c1_155, %c0_156, %c0_157] : memref<2x1x32xf32, #tpu.memory_space<vmem>>, vector<1x1x32xf32>
    %325 = vector.shape_cast %324 : vector<1x1x32xf32> to vector<1x32xf32>
    %326 = vector.broadcast %325 : vector<1x32xf32> to vector<9x32xf32>
    %327 = arith.addf %323, %326 : vector<9x32xf32>
    %c1_158 = arith.constant 1 : index
    %c0_159 = arith.constant 0 : index
    %c0_160 = arith.constant 0 : index
    %328 = vector.load %arg13[%c1_158, %c0_159, %c0_160] : memref<2x32x32xf32, #tpu.memory_space<vmem>>, vector<1x32x32xf32>
    %329 = vector.shape_cast %328 : vector<1x32x32xf32> to vector<32x32xf32>
    %cst_161 = arith.constant dense<0.000000e+00> : vector<9x32xf32>
    %330 = tpu.matmul %313, %329, %cst_161 {dimension_numbers = #tpu.dot_dimension_numbers<[1], [0], [0], [1], [0, 0, 1, 1], [], []>} : vector<9x32xf32>, vector<32x32xf32>, vector<9x32xf32> -> vector<9x32xf32>
    %c1_162 = arith.constant 1 : index
    %c0_163 = arith.constant 0 : index
    %c0_164 = arith.constant 0 : index
    %331 = vector.load %arg14[%c1_162, %c0_163, %c0_164] : memref<2x1x32xf32, #tpu.memory_space<vmem>>, vector<1x1x32xf32>
    %332 = vector.shape_cast %331 : vector<1x1x32xf32> to vector<1x32xf32>
    %333 = vector.broadcast %332 : vector<1x32xf32> to vector<9x32xf32>
    %334 = arith.addf %330, %333 : vector<9x32xf32>
    %c1_165 = arith.constant 1 : index
    %c0_166 = arith.constant 0 : index
    %c0_167 = arith.constant 0 : index
    %335 = vector.load %arg15[%c1_165, %c0_166, %c0_167] : memref<2x32x32xf32, #tpu.memory_space<vmem>>, vector<1x32x32xf32>
    %336 = vector.shape_cast %335 : vector<1x32x32xf32> to vector<32x32xf32>
    %cst_168 = arith.constant 0.000000e+00 : f32
    %337 = vector.broadcast %cst_168 : f32 to vector<9x32xf32>
    %338 = vector.extract_strided_slice %320 {offsets = [0, 0], sizes = [9, 8], strides = [1, 1]} : vector<9x32xf32> to vector<9x8xf32>
    %339 = vector.extract_strided_slice %327 {offsets = [0, 0], sizes = [9, 8], strides = [1, 1]} : vector<9x32xf32> to vector<9x8xf32>
    %340 = vector.extract_strided_slice %334 {offsets = [0, 0], sizes = [9, 8], strides = [1, 1]} : vector<9x32xf32> to vector<9x8xf32>
    %cst_169 = arith.constant dense<0.000000e+00> : vector<9x9xf32>
    %341 = tpu.matmul %338, %339, %cst_169 {dimension_numbers = #tpu.dot_dimension_numbers<[1], [1], [0], [0], [0, 0, 1, 0], [], []>} : vector<9x8xf32>, vector<9x8xf32>, vector<9x9xf32> -> vector<9x9xf32>
    %cst_170 = arith.constant 0.353553385 : f32
    %342 = vector.broadcast %cst_170 : f32 to vector<9x9xf32>
    %343 = arith.mulf %341, %342 : vector<9x9xf32>
    %344 = vector.broadcast %5 : vector<1x9xf32> to vector<9x9xf32>
    %345 = arith.addf %343, %344 : vector<9x9xf32>
    %cst_171 = arith.constant dense<0xFF800000> : vector<9xf32>
    %346 = vector.multi_reduction <maximumf>, %345, %cst_171 [1] : vector<9x9xf32> to vector<9xf32>
    %347 = vector.shape_cast %346 : vector<9xf32> to vector<9x1xf32>
    %348 = vector.broadcast %347 : vector<9x1xf32> to vector<9x9xf32>
    %349 = arith.subf %345, %348 : vector<9x9xf32>
    %350 = math.exp %349 : vector<9x9xf32>
    %cst_172 = arith.constant dense<0.000000e+00> : vector<9xf32>
    %351 = vector.multi_reduction <add>, %350, %cst_172 [1] : vector<9x9xf32> to vector<9xf32>
    %352 = vector.shape_cast %351 : vector<9xf32> to vector<9x1xf32>
    %353 = tpu.reciprocal %352 {approx = true} : vector<9x1xf32> -> vector<9x1xf32>
    %354 = vector.broadcast %353 : vector<9x1xf32> to vector<9x9xf32>
    %355 = arith.mulf %350, %354 : vector<9x9xf32>
    %cst_173 = arith.constant dense<0.000000e+00> : vector<9x8xf32>
    %356 = tpu.matmul %355, %340, %cst_173 {dimension_numbers = #tpu.dot_dimension_numbers<[1], [0], [0], [1], [0, 0, 1, 1], [], []>} : vector<9x9xf32>, vector<9x8xf32>, vector<9x8xf32> -> vector<9x8xf32>
    %357 = vector.extract_strided_slice %336 {offsets = [0, 0], sizes = [8, 32], strides = [1, 1]} : vector<32x32xf32> to vector<8x32xf32>
    %cst_174 = arith.constant dense<0.000000e+00> : vector<9x32xf32>
    %358 = tpu.matmul %356, %357, %cst_174 {dimension_numbers = #tpu.dot_dimension_numbers<[1], [0], [0], [1], [0, 0, 1, 1], [], []>} : vector<9x8xf32>, vector<8x32xf32>, vector<9x32xf32> -> vector<9x32xf32>
    %359 = arith.addf %337, %358 : vector<9x32xf32>
    %360 = vector.extract_strided_slice %320 {offsets = [0, 8], sizes = [9, 8], strides = [1, 1]} : vector<9x32xf32> to vector<9x8xf32>
    %361 = vector.extract_strided_slice %327 {offsets = [0, 8], sizes = [9, 8], strides = [1, 1]} : vector<9x32xf32> to vector<9x8xf32>
    %362 = vector.extract_strided_slice %334 {offsets = [0, 8], sizes = [9, 8], strides = [1, 1]} : vector<9x32xf32> to vector<9x8xf32>
    %cst_175 = arith.constant dense<0.000000e+00> : vector<9x9xf32>
    %363 = tpu.matmul %360, %361, %cst_175 {dimension_numbers = #tpu.dot_dimension_numbers<[1], [1], [0], [0], [0, 0, 1, 0], [], []>} : vector<9x8xf32>, vector<9x8xf32>, vector<9x9xf32> -> vector<9x9xf32>
    %cst_176 = arith.constant 0.353553385 : f32
    %364 = vector.broadcast %cst_176 : f32 to vector<9x9xf32>
    %365 = arith.mulf %363, %364 : vector<9x9xf32>
    %366 = vector.broadcast %5 : vector<1x9xf32> to vector<9x9xf32>
    %367 = arith.addf %365, %366 : vector<9x9xf32>
    %cst_177 = arith.constant dense<0xFF800000> : vector<9xf32>
    %368 = vector.multi_reduction <maximumf>, %367, %cst_177 [1] : vector<9x9xf32> to vector<9xf32>
    %369 = vector.shape_cast %368 : vector<9xf32> to vector<9x1xf32>
    %370 = vector.broadcast %369 : vector<9x1xf32> to vector<9x9xf32>
    %371 = arith.subf %367, %370 : vector<9x9xf32>
    %372 = math.exp %371 : vector<9x9xf32>
    %cst_178 = arith.constant dense<0.000000e+00> : vector<9xf32>
    %373 = vector.multi_reduction <add>, %372, %cst_178 [1] : vector<9x9xf32> to vector<9xf32>
    %374 = vector.shape_cast %373 : vector<9xf32> to vector<9x1xf32>
    %375 = tpu.reciprocal %374 {approx = true} : vector<9x1xf32> -> vector<9x1xf32>
    %376 = vector.broadcast %375 : vector<9x1xf32> to vector<9x9xf32>
    %377 = arith.mulf %372, %376 : vector<9x9xf32>
    %cst_179 = arith.constant dense<0.000000e+00> : vector<9x8xf32>
    %378 = tpu.matmul %377, %362, %cst_179 {dimension_numbers = #tpu.dot_dimension_numbers<[1], [0], [0], [1], [0, 0, 1, 1], [], []>} : vector<9x9xf32>, vector<9x8xf32>, vector<9x8xf32> -> vector<9x8xf32>
    %379 = vector.extract_strided_slice %336 {offsets = [8, 0], sizes = [8, 32], strides = [1, 1]} : vector<32x32xf32> to vector<8x32xf32>
    %cst_180 = arith.constant dense<0.000000e+00> : vector<9x32xf32>
    %380 = tpu.matmul %378, %379, %cst_180 {dimension_numbers = #tpu.dot_dimension_numbers<[1], [0], [0], [1], [0, 0, 1, 1], [], []>} : vector<9x8xf32>, vector<8x32xf32>, vector<9x32xf32> -> vector<9x32xf32>
    %381 = arith.addf %359, %380 : vector<9x32xf32>
    %382 = vector.extract_strided_slice %320 {offsets = [0, 16], sizes = [9, 8], strides = [1, 1]} : vector<9x32xf32> to vector<9x8xf32>
    %383 = vector.extract_strided_slice %327 {offsets = [0, 16], sizes = [9, 8], strides = [1, 1]} : vector<9x32xf32> to vector<9x8xf32>
    %384 = vector.extract_strided_slice %334 {offsets = [0, 16], sizes = [9, 8], strides = [1, 1]} : vector<9x32xf32> to vector<9x8xf32>
    %cst_181 = arith.constant dense<0.000000e+00> : vector<9x9xf32>
    %385 = tpu.matmul %382, %383, %cst_181 {dimension_numbers = #tpu.dot_dimension_numbers<[1], [1], [0], [0], [0, 0, 1, 0], [], []>} : vector<9x8xf32>, vector<9x8xf32>, vector<9x9xf32> -> vector<9x9xf32>
    %cst_182 = arith.constant 0.353553385 : f32
    %386 = vector.broadcast %cst_182 : f32 to vector<9x9xf32>
    %387 = arith.mulf %385, %386 : vector<9x9xf32>
    %388 = vector.broadcast %5 : vector<1x9xf32> to vector<9x9xf32>
    %389 = arith.addf %387, %388 : vector<9x9xf32>
    %cst_183 = arith.constant dense<0xFF800000> : vector<9xf32>
    %390 = vector.multi_reduction <maximumf>, %389, %cst_183 [1] : vector<9x9xf32> to vector<9xf32>
    %391 = vector.shape_cast %390 : vector<9xf32> to vector<9x1xf32>
    %392 = vector.broadcast %391 : vector<9x1xf32> to vector<9x9xf32>
    %393 = arith.subf %389, %392 : vector<9x9xf32>
    %394 = math.exp %393 : vector<9x9xf32>
    %cst_184 = arith.constant dense<0.000000e+00> : vector<9xf32>
    %395 = vector.multi_reduction <add>, %394, %cst_184 [1] : vector<9x9xf32> to vector<9xf32>
    %396 = vector.shape_cast %395 : vector<9xf32> to vector<9x1xf32>
    %397 = tpu.reciprocal %396 {approx = true} : vector<9x1xf32> -> vector<9x1xf32>
    %398 = vector.broadcast %397 : vector<9x1xf32> to vector<9x9xf32>
    %399 = arith.mulf %394, %398 : vector<9x9xf32>
    %cst_185 = arith.constant dense<0.000000e+00> : vector<9x8xf32>
    %400 = tpu.matmul %399, %384, %cst_185 {dimension_numbers = #tpu.dot_dimension_numbers<[1], [0], [0], [1], [0, 0, 1, 1], [], []>} : vector<9x9xf32>, vector<9x8xf32>, vector<9x8xf32> -> vector<9x8xf32>
    %401 = vector.extract_strided_slice %336 {offsets = [16, 0], sizes = [8, 32], strides = [1, 1]} : vector<32x32xf32> to vector<8x32xf32>
    %cst_186 = arith.constant dense<0.000000e+00> : vector<9x32xf32>
    %402 = tpu.matmul %400, %401, %cst_186 {dimension_numbers = #tpu.dot_dimension_numbers<[1], [0], [0], [1], [0, 0, 1, 1], [], []>} : vector<9x8xf32>, vector<8x32xf32>, vector<9x32xf32> -> vector<9x32xf32>
    %403 = arith.addf %381, %402 : vector<9x32xf32>
    %404 = vector.extract_strided_slice %320 {offsets = [0, 24], sizes = [9, 8], strides = [1, 1]} : vector<9x32xf32> to vector<9x8xf32>
    %405 = vector.extract_strided_slice %327 {offsets = [0, 24], sizes = [9, 8], strides = [1, 1]} : vector<9x32xf32> to vector<9x8xf32>
    %406 = vector.extract_strided_slice %334 {offsets = [0, 24], sizes = [9, 8], strides = [1, 1]} : vector<9x32xf32> to vector<9x8xf32>
    %cst_187 = arith.constant dense<0.000000e+00> : vector<9x9xf32>
    %407 = tpu.matmul %404, %405, %cst_187 {dimension_numbers = #tpu.dot_dimension_numbers<[1], [1], [0], [0], [0, 0, 1, 0], [], []>} : vector<9x8xf32>, vector<9x8xf32>, vector<9x9xf32> -> vector<9x9xf32>
    %cst_188 = arith.constant 0.353553385 : f32
    %408 = vector.broadcast %cst_188 : f32 to vector<9x9xf32>
    %409 = arith.mulf %407, %408 : vector<9x9xf32>
    %410 = vector.broadcast %5 : vector<1x9xf32> to vector<9x9xf32>
    %411 = arith.addf %409, %410 : vector<9x9xf32>
    %cst_189 = arith.constant dense<0xFF800000> : vector<9xf32>
    %412 = vector.multi_reduction <maximumf>, %411, %cst_189 [1] : vector<9x9xf32> to vector<9xf32>
    %413 = vector.shape_cast %412 : vector<9xf32> to vector<9x1xf32>
    %414 = vector.broadcast %413 : vector<9x1xf32> to vector<9x9xf32>
    %415 = arith.subf %411, %414 : vector<9x9xf32>
    %416 = math.exp %415 : vector<9x9xf32>
    %cst_190 = arith.constant dense<0.000000e+00> : vector<9xf32>
    %417 = vector.multi_reduction <add>, %416, %cst_190 [1] : vector<9x9xf32> to vector<9xf32>
    %418 = vector.shape_cast %417 : vector<9xf32> to vector<9x1xf32>
    %419 = tpu.reciprocal %418 {approx = true} : vector<9x1xf32> -> vector<9x1xf32>
    %420 = vector.broadcast %419 : vector<9x1xf32> to vector<9x9xf32>
    %421 = arith.mulf %416, %420 : vector<9x9xf32>
    %cst_191 = arith.constant dense<0.000000e+00> : vector<9x8xf32>
    %422 = tpu.matmul %421, %406, %cst_191 {dimension_numbers = #tpu.dot_dimension_numbers<[1], [0], [0], [1], [0, 0, 1, 1], [], []>} : vector<9x9xf32>, vector<9x8xf32>, vector<9x8xf32> -> vector<9x8xf32>
    %423 = vector.extract_strided_slice %336 {offsets = [24, 0], sizes = [8, 32], strides = [1, 1]} : vector<32x32xf32> to vector<8x32xf32>
    %cst_192 = arith.constant dense<0.000000e+00> : vector<9x32xf32>
    %424 = tpu.matmul %422, %423, %cst_192 {dimension_numbers = #tpu.dot_dimension_numbers<[1], [0], [0], [1], [0, 0, 1, 1], [], []>} : vector<9x8xf32>, vector<8x32xf32>, vector<9x32xf32> -> vector<9x32xf32>
    %425 = arith.addf %403, %424 : vector<9x32xf32>
    %426 = arith.addf %313, %425 : vector<9x32xf32>
    %c1_193 = arith.constant 1 : index
    %c0_194 = arith.constant 0 : index
    %c0_195 = arith.constant 0 : index
    %427 = vector.load %arg16[%c1_193, %c0_194, %c0_195] : memref<2x1x32xf32, #tpu.memory_space<vmem>>, vector<1x1x32xf32>
    %428 = vector.shape_cast %427 : vector<1x1x32xf32> to vector<1x32xf32>
    %429 = vector.broadcast %428 : vector<1x32xf32> to vector<9x32xf32>
    %430 = arith.addf %426, %429 : vector<9x32xf32>
    %c1_196 = arith.constant 1 : index
    %c0_197 = arith.constant 0 : index
    %c0_198 = arith.constant 0 : index
    %431 = vector.load %arg17[%c1_196, %c0_197, %c0_198] : memref<2x1x32xf32, #tpu.memory_space<vmem>>, vector<1x1x32xf32>
    %432 = vector.shape_cast %431 : vector<1x1x32xf32> to vector<1x32xf32>
    %c1_199 = arith.constant 1 : index
    %c0_200 = arith.constant 0 : index
    %c0_201 = arith.constant 0 : index
    %433 = vector.load %arg18[%c1_199, %c0_200, %c0_201] : memref<2x1x32xf32, #tpu.memory_space<vmem>>, vector<1x1x32xf32>
    %434 = vector.shape_cast %433 : vector<1x1x32xf32> to vector<1x32xf32>
    %cst_202 = arith.constant dense<0.000000e+00> : vector<9xf32>
    %435 = vector.multi_reduction <add>, %430, %cst_202 [1] : vector<9x32xf32> to vector<9xf32>
    %436 = vector.shape_cast %435 : vector<9xf32> to vector<9x1xf32>
    %cst_203 = arith.constant 3.200000e+01 : f32
    %437 = vector.broadcast %cst_203 : f32 to vector<9x1xf32>
    %438 = arith.divf %436, %437 : vector<9x1xf32>
    %439 = vector.broadcast %438 : vector<9x1xf32> to vector<9x32xf32>
    %440 = arith.subf %430, %439 : vector<9x32xf32>
    %441 = arith.mulf %440, %440 : vector<9x32xf32>
    %cst_204 = arith.constant dense<0.000000e+00> : vector<9xf32>
    %442 = vector.multi_reduction <add>, %441, %cst_204 [1] : vector<9x32xf32> to vector<9xf32>
    %443 = vector.shape_cast %442 : vector<9xf32> to vector<9x1xf32>
    %cst_205 = arith.constant 3.200000e+01 : f32
    %444 = vector.broadcast %cst_205 : f32 to vector<9x1xf32>
    %445 = arith.divf %443, %444 : vector<9x1xf32>
    %446 = vector.broadcast %438 : vector<9x1xf32> to vector<9x32xf32>
    %447 = arith.subf %430, %446 : vector<9x32xf32>
    %cst_206 = arith.constant 9.99999974E-6 : f32
    %448 = vector.broadcast %cst_206 : f32 to vector<9x1xf32>
    %449 = arith.addf %445, %448 : vector<9x1xf32>
    %450 = math.rsqrt %449 : vector<9x1xf32>
    %451 = vector.broadcast %450 : vector<9x1xf32> to vector<9x32xf32>
    %452 = arith.mulf %447, %451 : vector<9x32xf32>
    %453 = vector.broadcast %432 : vector<1x32xf32> to vector<9x32xf32>
    %454 = arith.mulf %452, %453 : vector<9x32xf32>
    %455 = vector.broadcast %434 : vector<1x32xf32> to vector<9x32xf32>
    %456 = arith.addf %454, %455 : vector<9x32xf32>
    %457 = vector.broadcast %3 : vector<9x1xf32> to vector<9x32xf32>
    %458 = arith.mulf %456, %457 : vector<9x32xf32>
    %c1_207 = arith.constant 1 : index
    %c0_208 = arith.constant 0 : index
    %c0_209 = arith.constant 0 : index
    %459 = vector.load %arg19[%c1_207, %c0_208, %c0_209] : memref<2x32x64xf32, #tpu.memory_space<vmem>>, vector<1x32x64xf32>
    %460 = vector.shape_cast %459 : vector<1x32x64xf32> to vector<32x64xf32>
    %cst_210 = arith.constant dense<0.000000e+00> : vector<9x64xf32>
    %461 = tpu.matmul %458, %460, %cst_210 {dimension_numbers = #tpu.dot_dimension_numbers<[1], [0], [0], [1], [0, 0, 1, 1], [], []>} : vector<9x32xf32>, vector<32x64xf32>, vector<9x64xf32> -> vector<9x64xf32>
    %c1_211 = arith.constant 1 : index
    %c0_212 = arith.constant 0 : index
    %c0_213 = arith.constant 0 : index
    %462 = vector.load %arg20[%c1_211, %c0_212, %c0_213] : memref<2x1x64xf32, #tpu.memory_space<vmem>>, vector<1x1x64xf32>
    %463 = vector.shape_cast %462 : vector<1x1x64xf32> to vector<1x64xf32>
    %464 = vector.broadcast %463 : vector<1x64xf32> to vector<9x64xf32>
    %465 = arith.addf %461, %464 : vector<9x64xf32>
    %466 = arith.mulf %465, %465 : vector<9x64xf32>
    %467 = arith.mulf %465, %466 : vector<9x64xf32>
    %cst_214 = arith.constant 4.471500e-02 : f32
    %468 = vector.broadcast %cst_214 : f32 to vector<9x64xf32>
    %469 = arith.mulf %468, %467 : vector<9x64xf32>
    %470 = arith.addf %465, %469 : vector<9x64xf32>
    %cst_215 = arith.constant 0.797884583 : f32
    %471 = vector.broadcast %cst_215 : f32 to vector<9x64xf32>
    %472 = arith.mulf %471, %470 : vector<9x64xf32>
    %473 = math.tanh %472 : vector<9x64xf32>
    %cst_216 = arith.constant 1.000000e+00 : f32
    %474 = vector.broadcast %cst_216 : f32 to vector<9x64xf32>
    %475 = arith.addf %474, %473 : vector<9x64xf32>
    %cst_217 = arith.constant 5.000000e-01 : f32
    %476 = vector.broadcast %cst_217 : f32 to vector<9x64xf32>
    %477 = arith.mulf %476, %475 : vector<9x64xf32>
    %478 = arith.mulf %465, %477 : vector<9x64xf32>
    %c1_218 = arith.constant 1 : index
    %c0_219 = arith.constant 0 : index
    %c0_220 = arith.constant 0 : index
    %479 = vector.load %arg21[%c1_218, %c0_219, %c0_220] : memref<2x64x32xf32, #tpu.memory_space<vmem>>, vector<1x64x32xf32>
    %480 = vector.shape_cast %479 : vector<1x64x32xf32> to vector<64x32xf32>
    %cst_221 = arith.constant dense<0.000000e+00> : vector<9x32xf32>
    %481 = tpu.matmul %478, %480, %cst_221 {dimension_numbers = #tpu.dot_dimension_numbers<[1], [0], [0], [1], [0, 0, 1, 1], [], []>} : vector<9x64xf32>, vector<64x32xf32>, vector<9x32xf32> -> vector<9x32xf32>
    %c1_222 = arith.constant 1 : index
    %c0_223 = arith.constant 0 : index
    %c0_224 = arith.constant 0 : index
    %482 = vector.load %arg22[%c1_222, %c0_223, %c0_224] : memref<2x1x32xf32, #tpu.memory_space<vmem>>, vector<1x1x32xf32>
    %483 = vector.shape_cast %482 : vector<1x1x32xf32> to vector<1x32xf32>
    %484 = vector.broadcast %483 : vector<1x32xf32> to vector<9x32xf32>
    %485 = arith.addf %481, %484 : vector<9x32xf32>
    %486 = arith.addf %458, %485 : vector<9x32xf32>
    %c1_225 = arith.constant 1 : index
    %c0_226 = arith.constant 0 : index
    %c0_227 = arith.constant 0 : index
    %487 = vector.load %arg23[%c1_225, %c0_226, %c0_227] : memref<2x1x32xf32, #tpu.memory_space<vmem>>, vector<1x1x32xf32>
    %488 = vector.shape_cast %487 : vector<1x1x32xf32> to vector<1x32xf32>
    %c1_228 = arith.constant 1 : index
    %c0_229 = arith.constant 0 : index
    %c0_230 = arith.constant 0 : index
    %489 = vector.load %arg24[%c1_228, %c0_229, %c0_230] : memref<2x1x32xf32, #tpu.memory_space<vmem>>, vector<1x1x32xf32>
    %490 = vector.shape_cast %489 : vector<1x1x32xf32> to vector<1x32xf32>
    %cst_231 = arith.constant dense<0.000000e+00> : vector<9xf32>
    %491 = vector.multi_reduction <add>, %486, %cst_231 [1] : vector<9x32xf32> to vector<9xf32>
    %492 = vector.shape_cast %491 : vector<9xf32> to vector<9x1xf32>
    %cst_232 = arith.constant 3.200000e+01 : f32
    %493 = vector.broadcast %cst_232 : f32 to vector<9x1xf32>
    %494 = arith.divf %492, %493 : vector<9x1xf32>
    %495 = vector.broadcast %494 : vector<9x1xf32> to vector<9x32xf32>
    %496 = arith.subf %486, %495 : vector<9x32xf32>
    %497 = arith.mulf %496, %496 : vector<9x32xf32>
    %cst_233 = arith.constant dense<0.000000e+00> : vector<9xf32>
    %498 = vector.multi_reduction <add>, %497, %cst_233 [1] : vector<9x32xf32> to vector<9xf32>
    %499 = vector.shape_cast %498 : vector<9xf32> to vector<9x1xf32>
    %cst_234 = arith.constant 3.200000e+01 : f32
    %500 = vector.broadcast %cst_234 : f32 to vector<9x1xf32>
    %501 = arith.divf %499, %500 : vector<9x1xf32>
    %502 = vector.broadcast %494 : vector<9x1xf32> to vector<9x32xf32>
    %503 = arith.subf %486, %502 : vector<9x32xf32>
    %cst_235 = arith.constant 9.99999974E-6 : f32
    %504 = vector.broadcast %cst_235 : f32 to vector<9x1xf32>
    %505 = arith.addf %501, %504 : vector<9x1xf32>
    %506 = math.rsqrt %505 : vector<9x1xf32>
    %507 = vector.broadcast %506 : vector<9x1xf32> to vector<9x32xf32>
    %508 = arith.mulf %503, %507 : vector<9x32xf32>
    %509 = vector.broadcast %488 : vector<1x32xf32> to vector<9x32xf32>
    %510 = arith.mulf %508, %509 : vector<9x32xf32>
    %511 = vector.broadcast %490 : vector<1x32xf32> to vector<9x32xf32>
    %512 = arith.addf %510, %511 : vector<9x32xf32>
    %513 = vector.broadcast %3 : vector<9x1xf32> to vector<9x32xf32>
    %514 = arith.mulf %512, %513 : vector<9x32xf32>
    %c0_236 = arith.constant 0 : index
    %c0_237 = arith.constant 0 : index
    %c0_238 = arith.constant 0 : index
    %515 = vector.load %arg25[%c0_236, %c0_237, %c0_238] : memref<1x9x32xf32, #tpu.memory_space<vmem>>, vector<1x9x32xf32>
    %516 = vector.shape_cast %515 : vector<1x9x32xf32> to vector<9x32xf32>
    %517 = vector.shape_cast %514 : vector<9x32xf32> to vector<1x9x32xf32>
    tpu.vector_store %arg25[%c0_236, %c0_237, %c0_238], %517 {strides = array<i32>} : memref<1x9x32xf32, #tpu.memory_space<vmem>>, vector<1x9x32xf32>,
    return
  }
  func.func @transform_0(%arg0: i32) -> (i32, i32, i32) {
    %c0_i32 = arith.constant 0 : i32
    %c0_i32_0 = arith.constant 0 : i32
    %c0_i32_1 = arith.constant 0 : i32
    return %arg0, %c0_i32, %c0_i32_0 : i32, i32, i32
  }
  func.func @transform_1(%arg0: i32) -> (i32, i32, i32) {
    %c0_i32 = arith.constant 0 : i32
    %c0_i32_0 = arith.constant 0 : i32
    %c0_i32_1 = arith.constant 0 : i32
    return %arg0, %c0_i32, %c0_i32_0 : i32, i32, i32
  }
  func.func @transform_2(%arg0: i32) -> (i32, i32, i32) {
    %c0_i32 = arith.constant 0 : i32
    %c0_i32_0 = arith.constant 0 : i32
    %c0_i32_1 = arith.constant 0 : i32
    return %arg0, %c0_i32, %c0_i32_0 : i32, i32, i32
  }
  func.func @transform_3(%arg0: i32) -> (i32, i32) {
    %c0_i32 = arith.constant 0 : i32
    %c0_i32_0 = arith.constant 0 : i32
    %c0_i32_1 = arith.constant 0 : i32
    return %c0_i32, %c0_i32_0 : i32, i32
  }
  func.func @transform_4(%arg0: i32) -> (i32, i32, i32) {
    %c0_i32 = arith.constant 0 : i32
    %c0_i32_0 = arith.constant 0 : i32
    %c0_i32_1 = arith.constant 0 : i32
    %c0_i32_2 = arith.constant 0 : i32
    return %c0_i32, %c0_i32_0, %c0_i32_1 : i32, i32, i32
  }
  func.func @transform_5(%arg0: i32) -> (i32, i32, i32) {
    %c0_i32 = arith.constant 0 : i32
    %c0_i32_0 = arith.constant 0 : i32
    %c0_i32_1 = arith.constant 0 : i32
    %c0_i32_2 = arith.constant 0 : i32
    return %c0_i32, %c0_i32_0, %c0_i32_1 : i32, i32, i32
  }
  func.func @transform_6(%arg0: i32) -> (i32, i32, i32) {
    %c0_i32 = arith.constant 0 : i32
    %c0_i32_0 = arith.constant 0 : i32
    %c0_i32_1 = arith.constant 0 : i32
    %c0_i32_2 = arith.constant 0 : i32
    return %c0_i32, %c0_i32_0, %c0_i32_1 : i32, i32, i32
  }
  func.func @transform_7(%arg0: i32) -> (i32, i32, i32) {
    %c0_i32 = arith.constant 0 : i32
    %c0_i32_0 = arith.constant 0 : i32
    %c0_i32_1 = arith.constant 0 : i32
    %c0_i32_2 = arith.constant 0 : i32
    return %c0_i32, %c0_i32_0, %c0_i32_1 : i32, i32, i32
  }
  func.func @transform_8(%arg0: i32) -> (i32, i32, i32) {
    %c0_i32 = arith.constant 0 : i32
    %c0_i32_0 = arith.constant 0 : i32
    %c0_i32_1 = arith.constant 0 : i32
    %c0_i32_2 = arith.constant 0 : i32
    return %c0_i32, %c0_i32_0, %c0_i32_1 : i32, i32, i32
  }
  func.func @transform_9(%arg0: i32) -> (i32, i32, i32) {
    %c0_i32 = arith.constant 0 : i32
    %c0_i32_0 = arith.constant 0 : i32
    %c0_i32_1 = arith.constant 0 : i32
    %c0_i32_2 = arith.constant 0 : i32
    return %c0_i32, %c0_i32_0, %c0_i32_1 : i32, i32, i32
  }
  func.func @transform_10(%arg0: i32) -> (i32, i32, i32) {
    %c0_i32 = arith.constant 0 : i32
    %c0_i32_0 = arith.constant 0 : i32
    %c0_i32_1 = arith.constant 0 : i32
    %c0_i32_2 = arith.constant 0 : i32
    return %c0_i32, %c0_i32_0, %c0_i32_1 : i32, i32, i32
  }
  func.func @transform_11(%arg0: i32) -> (i32, i32, i32) {
    %c0_i32 = arith.constant 0 : i32
    %c0_i32_0 = arith.constant 0 : i32
    %c0_i32_1 = arith.constant 0 : i32
    %c0_i32_2 = arith.constant 0 : i32
    return %c0_i32, %c0_i32_0, %c0_i32_1 : i32, i32, i32
  }
  func.func @transform_12(%arg0: i32) -> (i32, i32, i32) {
    %c0_i32 = arith.constant 0 : i32
    %c0_i32_0 = arith.constant 0 : i32
    %c0_i32_1 = arith.constant 0 : i32
    %c0_i32_2 = arith.constant 0 : i32
    return %c0_i32, %c0_i32_0, %c0_i32_1 : i32, i32, i32
  }
  func.func @transform_13(%arg0: i32) -> (i32, i32, i32) {
    %c0_i32 = arith.constant 0 : i32
    %c0_i32_0 = arith.constant 0 : i32
    %c0_i32_1 = arith.constant 0 : i32
    %c0_i32_2 = arith.constant 0 : i32
    return %c0_i32, %c0_i32_0, %c0_i32_1 : i32, i32, i32
  }
  func.func @transform_14(%arg0: i32) -> (i32, i32, i32) {
    %c0_i32 = arith.constant 0 : i32
    %c0_i32_0 = arith.constant 0 : i32
    %c0_i32_1 = arith.constant 0 : i32
    %c0_i32_2 = arith.constant 0 : i32
    return %c0_i32, %c0_i32_0, %c0_i32_1 : i32, i32, i32
  }
  func.func @transform_15(%arg0: i32) -> (i32, i32, i32) {
    %c0_i32 = arith.constant 0 : i32
    %c0_i32_0 = arith.constant 0 : i32
    %c0_i32_1 = arith.constant 0 : i32
    %c0_i32_2 = arith.constant 0 : i32
    return %c0_i32, %c0_i32_0, %c0_i32_1 : i32, i32, i32
  }
  func.func @transform_16(%arg0: i32) -> (i32, i32, i32) {
    %c0_i32 = arith.constant 0 : i32
    %c0_i32_0 = arith.constant 0 : i32
    %c0_i32_1 = arith.constant 0 : i32
    %c0_i32_2 = arith.constant 0 : i32
    return %c0_i32, %c0_i32_0, %c0_i32_1 : i32, i32, i32
  }
  func.func @transform_17(%arg0: i32) -> (i32, i32, i32) {
    %c0_i32 = arith.constant 0 : i32
    %c0_i32_0 = arith.constant 0 : i32
    %c0_i32_1 = arith.constant 0 : i32
    %c0_i32_2 = arith.constant 0 : i32
    return %c0_i32, %c0_i32_0, %c0_i32_1 : i32, i32, i32
  }
  func.func @transform_18(%arg0: i32) -> (i32, i32, i32) {
    %c0_i32 = arith.constant 0 : i32
    %c0_i32_0 = arith.constant 0 : i32
    %c0_i32_1 = arith.constant 0 : i32
    %c0_i32_2 = arith.constant 0 : i32
    return %c0_i32, %c0_i32_0, %c0_i32_1 : i32, i32, i32
  }
  func.func @transform_19(%arg0: i32) -> (i32, i32, i32) {
    %c0_i32 = arith.constant 0 : i32
    %c0_i32_0 = arith.constant 0 : i32
    %c0_i32_1 = arith.constant 0 : i32
    %c0_i32_2 = arith.constant 0 : i32
    return %c0_i32, %c0_i32_0, %c0_i32_1 : i32, i32, i32
  }
  func.func @transform_20(%arg0: i32) -> (i32, i32, i32) {
    %c0_i32 = arith.constant 0 : i32
    %c0_i32_0 = arith.constant 0 : i32
    %c0_i32_1 = arith.constant 0 : i32
    %c0_i32_2 = arith.constant 0 : i32
    return %c0_i32, %c0_i32_0, %c0_i32_1 : i32, i32, i32
  }
  func.func @transform_21(%arg0: i32) -> (i32, i32, i32) {
    %c0_i32 = arith.constant 0 : i32
    %c0_i32_0 = arith.constant 0 : i32
    %c0_i32_1 = arith.constant 0 : i32
    %c0_i32_2 = arith.constant 0 : i32
    return %c0_i32, %c0_i32_0, %c0_i32_1 : i32, i32, i32
  }
  func.func @transform_22(%arg0: i32) -> (i32, i32, i32) {
    %c0_i32 = arith.constant 0 : i32
    %c0_i32_0 = arith.constant 0 : i32
    %c0_i32_1 = arith.constant 0 : i32
    %c0_i32_2 = arith.constant 0 : i32
    return %c0_i32, %c0_i32_0, %c0_i32_1 : i32, i32, i32
  }
  func.func @transform_23(%arg0: i32) -> (i32, i32, i32) {
    %c0_i32 = arith.constant 0 : i32
    %c0_i32_0 = arith.constant 0 : i32
    %c0_i32_1 = arith.constant 0 : i32
    %c0_i32_2 = arith.constant 0 : i32
    return %c0_i32, %c0_i32_0, %c0_i32_1 : i32, i32, i32
  }
  func.func @transform_24(%arg0: i32) -> (i32, i32, i32) {
    %c0_i32 = arith.constant 0 : i32
    %c0_i32_0 = arith.constant 0 : i32
    %c0_i32_1 = arith.constant 0 : i32
    return %arg0, %c0_i32, %c0_i32_0 : i32, i32, i32
  }
}

</mosaic_0001>

<bundles_post_ra>
// kernel: stacked_encoder_forward.1
= control target key start
LH: loop header
LB: loop body
LE: loop exit
PB: predicated region body
PF: predicated region fallthrough
CT: control target
= control target key end

     0   :  { %s7065_s0 = inlined_call_operand.vmem [shape: f32[2,9,32], index: 0, kind: input, shape index: {}]   ;;  %s7066_s1 = inlined_call_operand.vmem [shape: f32[2,9,1], index: 1, kind: input, shape index: {}]   ;;  %s7067_s2 = inlined_call_operand.vmem [shape: f32[2,1,9], index: 2, kind: input, shape index: {}]   ;;  %s7068_s3 = inlined_call_operand.vmem [shape: f32[1,32], index: 3, kind: input, shape index: {}]   ;;  %s7069_s4 = inlined_call_operand.vmem [shape: f32[2,32,32], index: 4, kind: input, shape index: {}]   ;;  %s7070_s5 = inlined_call_operand.vmem [shape: f32[2,1,32], index: 5, kind: input, shape index: {}]   ;;  %s7071_s6 = inlined_call_operand.vmem [shape: f32[2,1,32], index: 6, kind: input, shape index: {}]   ;;  %s7072_s7 = inlined_call_operand.hbm [shape: f32[2,1,32], index: 7, kind: input, shape index: {}]   ;;  %s7073_s8 = inlined_call_operand.vmem [shape: f32[2,32,32], index: 8, kind: input, shape index: {}]   ;;  %s7074_s9 = inlined_call_operand.hbm [shape: f32[2,1,32], index: 9, kind: input, shape index: {}]   ;;  %s7075_s10 = inlined_call_operand.vmem [shape: f32[2,32,32], index: 10, kind: input, shape index: {}]   ;;  %s7076_s11 = inlined_call_operand.hbm [shape: f32[2,1,32], index: 11, kind: input, shape index: {}]   ;;  %s7077_s12 = inlined_call_operand.vmem [shape: f32[2,32,32], index: 12, kind: input, shape index: {}]   ;;  %s7078_s13 = inlined_call_operand.hbm [shape: f32[2,1,32], index: 13, kind: input, shape index: {}]   ;;  %s7079_s14 = inlined_call_operand.vmem [shape: f32[2,32,32], index: 14, kind: input, shape index: {}]   ;;  %s7080_s15 = inlined_call_operand.hbm [shape: f32[2,1,32], index: 15, kind: input, shape index: {}]   ;;  %s7081_s16 = inlined_call_operand.vmem [shape: f32[2,1,32], index: 16, kind: input, shape index: {}]   ;;  %s7082_s17 = inlined_call_operand.hbm [shape: f32[2,1,32], index: 17, kind: input, shape index: {}]   ;;  %s7083_s18 = inlined_call_operand.hbm [shape: f32[2,32,64], index: 18, kind: input, shape index: {}]   ;;  %s7084_s19 = inlined_call_operand.hbm [shape: f32[2,1,64], index: 19, kind: input, shape index: {}]   ;;  %s7085_s20 = inlined_call_operand.vmem [shape: f32[2,64,32], index: 20, kind: input, shape index: {}]   ;;  %s7086_s21 = inlined_call_operand.hbm [shape: f32[2,1,32], index: 21, kind: input, shape index: {}]   ;;  %s7087_s22 = inlined_call_operand.hbm [shape: f32[2,1,32], index: 22, kind: input, shape index: {}]   ;;  %s7088_s23 = inlined_call_operand.hbm [shape: f32[2,1,32], index: 23, kind: input, shape index: {}]   ;;  %s7089_s24 = inlined_call_operand.vmem [shape: f32[2,9,32], index: 24, kind: output, shape index: {}]  }
   0x1   :  { %7102 = sst [smem:[#allocation25_spill]] %s7065_s0 }
   0x2   :  { %7103 = sst [smem:[#allocation26_spill]] %s7066_s1 }
   0x3   :  { %7104 = sst [smem:[#allocation27_spill]] %s7067_s2 }
   0x4   :  { %7105 = sst [smem:[#allocation28_spill]] %s7068_s3 }
   0x5   :  { %7106 = sst [smem:[#allocation29_spill]] %s7069_s4 }
   0x6   :  { %7107 = sst [smem:[#allocation30_spill]] %s7070_s5 }
   0x7   :  { %7108 = sst [smem:[#allocation31_spill]] %s7071_s6 }
   0x8   :  { %7109 = sst [smem:[#allocation32_spill]] %s7072_s7 }
   0x9   :  { %7110 = sst [smem:[#allocation33_spill]] %s7073_s8 }
   0xa   :  { %7111 = sst [smem:[#allocation34_spill]] %s7074_s9 }
   0xb   :  { %7112 = sst [smem:[#allocation35_spill]] %s7078_s13 }
   0xc   :  { %29 = vsyncpa [#allocation3], 0 }
   0xd   :  { %30 = vsyncpa [#allocation5], 0 }
   0xe   :  { %31 = vsyncpa [#allocation8], 0 }
   0xf   :  { %32 = vsyncpa [#allocation11], 0 }
  0x10   :  { %33 = vsyncpa [#allocation14], 0 }
  0x11   :  { %34 = vsyncpa [#allocation17], 0  ;;  %s6297_s5 = smov 0  }
  0x12 LB: > { %s6303_s26 = sadd.s32 4294967295, %s6151_s5   ;;  %p4942_p0 = scmp.ge.s32.totalorder %s6151_s5, 1  ;;  %s6151_s5 = sphi %s6297_s5, %s40_s5  }
  0x13   : > { %p590_p1 = scmp.lt.s32.totalorder %s6151_s5, 3  ;;  %p5679_p2 = scmp.eq.s32.totalorder %s6303_s26, 0 }
  0x14   : > { %s6153_s28 = smov [#allocation4]   ;;  %s6154_s2 = smov [#allocation7]  }
  0x15   : > { %p6308_p3 = pnand %p4942_p0, %p590_p1  ;;  %s630_s6 = sshll.u32 %s6153_s28, 4  ;;  %s631_s6 = int_to_ptr.vmem [resolvable:$true] %s630_s6 }
  0x16   : > { %s662_s29 = sshll.u32 %s6154_s2, 4  ;;  %s6155_s7 = smov [#allocation10]   ;;  %s6314_s29 = int_to_ptr.vmem [resolvable:$true] %s662_s29 }
  0x17   : > { %p5645_p4 = pneg %p6308_p3  ;;  %s694_s30 = sshll.u32 %s6155_s7, 4  ;;  %s6322_s30 = int_to_ptr.vmem [resolvable:$true] %s694_s30 }
  0x18   : > { %s6156_s3 = smov [#allocation13]   ;;  %s5846_s4 = scalar_lea.vmem %s631_s6, 32 }
  0x19   : > { %p6318_p5 = pnand %p5679_p2, %p5645_p4  ;;  %s6324_s25 = sshll.u32 %s6156_s3, 4  ;;  %s721_s25 = int_to_ptr.vmem [resolvable:$true] %s6324_s25 }
  0x1a   : > { %p5847_p7 = scmp.ne.s32.totalorder %s631_s6, %s5846_s4  ;;  %p5854_p10 = scmp.lt.s32.totalorder %s631_s6, %s631_s6 }
  0x1b   : > { %p6328_p6 = pneg %p6318_p5  ;;  %p5855_p11 = scmp.lt.s32.totalorder %s5846_s4, %s5846_s4 }
  0x1d   : > { %p5849_p8 = pnand %p5847_p7, %p6328_p6  ;;  %p5856_p12 = por %p5855_p11, %p5854_p10 }
  0x1f   : > { %p5850_p9 = pneg %p5849_p8 }
  0x21   : > { %p5857_p13 = pnand %p5856_p12, %p5850_p9 }
  0x23   : > { %5860 = shalt.err (!%p5857_p13)
}
  0x24   : > { %s7094_s1 = smov 16   ;;  %s6158_s28 = smov 1  }
  0x25   : > { %s7116_s9 = sld [smem:[#allocation34_spill]]  ;;  %s5872_s3 = scalar_lea.vmem %s6314_s29, 32 }
  0x26   : > { %p5873_p0 = scmp.ne.s32.totalorder %s6314_s29, %s5872_s3  ;;  %p5880_p7 = scmp.lt.s32.totalorder %s6314_s29, %s6314_s29 }
  0x27   : > { %p5881_p8 = scmp.lt.s32.totalorder %s5872_s3, %s5872_s3 }
  0x28   : > { %p5875_p1 = pnand %p5873_p0, %p6328_p6 }
  0x29   : > { %p5882_p9 = por %p5881_p8, %p5880_p7 }
  0x2a   : > { %p5876_p4 = pneg %p5875_p1 }
  0x2b   : > { %5651 = dma.hbm_to_vmem [thread:$0]  (!%p6318_p5), %s7116_s9, 32, %s631_s6, [#allocation5], %s7094_s1, %s7094_s1, %s6158_s28  }
  0x2c   : > { %p5883_p10 = pnand %p5882_p9, %p5876_p4 }
  0x2e   : > { %5886 = shalt.err (!%p5883_p10)
}
  0x2f   : > { %s7117_s13 = sld [smem:[#allocation35_spill]]  ;;  %s5898_s6 = scalar_lea.vmem %s6322_s30, 32 }
  0x30   : > { %p5899_p11 = scmp.ne.s32.totalorder %s6322_s30, %s5898_s6  ;;  %p5906_p0 = scmp.lt.s32.totalorder %s6322_s30, %s6322_s30 }
  0x31   : > { %p5907_p1 = scmp.lt.s32.totalorder %s5898_s6, %s5898_s6 }
  0x32   : > { %p5901_p12 = pnand %p5899_p11, %p6328_p6 }
  0x33   : > { %p5908_p4 = por %p5907_p1, %p5906_p0 }
  0x34   : > { %p5902_p13 = pneg %p5901_p12 }
  0x35   : > { %5657 = dma.hbm_to_vmem [thread:$0]  (!%p6318_p5), %s7117_s13, 32, %s6314_s29, [#allocation8], %s7094_s1, %s7094_s1, %s6158_s28  }
  0x36   : > { %p5909_p7 = pnand %p5908_p4, %p5902_p13 }
  0x38   : > { %5912 = shalt.err (!%p5909_p7)
}
  0x39   : > { %5663 = dma.hbm_to_vmem [thread:$0]  (!%p6318_p5), %s7082_s17, 32, %s6322_s30, [#allocation11], %s7094_s1, %s7094_s1, %s6158_s28  }
  0x3a   : > { %s5924_s29 = scalar_lea.vmem %s721_s25, 32  ;;  %p5932_p11 = scmp.lt.s32.totalorder %s721_s25, %s721_s25 }
  0x3b   : > { %p5925_p8 = scmp.ne.s32.totalorder %s721_s25, %s5924_s29  ;;  %p5933_p12 = scmp.lt.s32.totalorder %s5924_s29, %s5924_s29 }
  0x3d   : > { %p5927_p9 = pnand %p5925_p8, %p6328_p6  ;;  %p5934_p13 = por %p5933_p12, %p5932_p11 }
  0x3f   : > { %p5928_p10 = pneg %p5927_p9 }
  0x41   : > { %p5935_p0 = pnand %p5934_p13, %p5928_p10 }
  0x43   : > { %5938 = shalt.err (!%p5935_p0)
}
  0x44   : > { %5669 = dma.hbm_to_vmem [thread:$0]  (!%p6318_p5), %s7084_s19, 32, %s721_s25, [#allocation14], %s7094_s1, %s7094_s1, %s6158_s28  }
  0x45   : > { %s6159_s30 = smov [#allocation16]   ;;  %s6160_s7 = smov [#allocation2]  }
  0x46   : > { %s749_s6 = sshll.u32 %s6159_s30, 4  ;;  %s614_s3 = sshll.u32 %s6160_s7, 4  ;;  %s750_s6 = int_to_ptr.vmem [resolvable:$true] %s749_s6  ;;  %s615_s3 = int_to_ptr.vmem [resolvable:$true] %s614_s3 }
  0x47   : > { %s5950_s9 = scalar_lea.vmem %s750_s6, 32  ;;  %p5958_p8 = scmp.lt.s32.totalorder %s750_s6, %s750_s6 }
  0x48   : > { %p5951_p1 = scmp.ne.s32.totalorder %s750_s6, %s5950_s9  ;;  %p5959_p9 = scmp.lt.s32.totalorder %s5950_s9, %s5950_s9 }
  0x4a   : > { %p5953_p4 = pnand %p5951_p1, %p6328_p6  ;;  %p5960_p10 = por %p5959_p9, %p5958_p8 }
  0x4c   : > { %p5954_p7 = pneg %p5953_p4 }
  0x4e   : > { %p5961_p11 = pnand %p5960_p10, %p5954_p7 }
  0x50   : > { %5964 = shalt.err (!%p5961_p11)
}
  0x51   : > { %5675 = dma.hbm_to_vmem [thread:$0]  (!%p6318_p5), %s7087_s22, 32, %s750_s6, [#allocation17], %s7094_s1, %s7094_s1, %s6158_s28  }
  0x52   : > { %s5976_s4 = scalar_lea.vmem %s615_s3, 32  ;;  %p5984_p1 = scmp.lt.s32.totalorder %s615_s3, %s615_s3 }
  0x53   : > { %p5977_p12 = scmp.ne.s32.totalorder %s615_s3, %s5976_s4  ;;  %p5985_p4 = scmp.lt.s32.totalorder %s5976_s4, %s5976_s4 }
  0x55   : > { %p5979_p13 = pnand %p5977_p12, %p6328_p6  ;;  %p5986_p7 = por %p5985_p4, %p5984_p1 }
  0x57   : > { %p5980_p0 = pneg %p5979_p13 }
  0x59   : > { %p5987_p8 = pnand %p5986_p7, %p5980_p0 }
  0x5b   : > { %5990 = shalt.err (!%p5987_p8)
}
  0x5c   : > { %s7118_s30 = sld [smem:[#allocation32_spill]]  ;;  %s6161_s6 = smov [#allocation6]  }
  0x5d   : > { %s646_s7 = sshll.u32 %s6161_s6, 4  ;;  %s6162_s25 = smov [#allocation9]   ;;  %s647_s7 = int_to_ptr.vmem [resolvable:$true] %s646_s7 }
  0x5e   : > { %s678_s29 = sshll.u32 %s6162_s25, 4  ;;  %s6002_s13 = scalar_lea.vmem %s647_s7, 32  ;;  %s679_s29 = int_to_ptr.vmem [resolvable:$true] %s678_s29 }
  0x5f   : > { %p6003_p9 = scmp.ne.s32.totalorder %s647_s7, %s6002_s13  ;;  %p6010_p12 = scmp.lt.s32.totalorder %s647_s7, %s647_s7 }
  0x60   : > { %p6011_p13 = scmp.lt.s32.totalorder %s6002_s13, %s6002_s13 }
  0x61   : > { %p6005_p10 = pnand %p6003_p9, %p6328_p6 }
  0x62   : > { %5648 = dma.hbm_to_vmem [thread:$0]  (!%p6318_p5), %s7118_s30, 32, %s615_s3, [#allocation3], %s7094_s1, %s7094_s1, %s6158_s28  }
  0x63   : > { %p6006_p11 = pneg %p6005_p10  ;;  %p6012_p0 = por %p6011_p13, %p6010_p12 }
  0x65   : > { %p6013_p1 = pnand %p6012_p0, %p6006_p11 }
  0x67   : > { %6016 = shalt.err (!%p6013_p1)
}
  0x68   : > { %5654 = dma.hbm_to_vmem [thread:$0]  (!%p6318_p5), %s7076_s11, 32, %s647_s7, [#allocation5], %s7094_s1, %s7094_s1, %s6158_s28  }
  0x69   : > { %s6028_s9 = scalar_lea.vmem %s679_s29, 32  ;;  %p6036_p9 = scmp.lt.s32.totalorder %s679_s29, %s679_s29 }
  0x6a   : > { %p6029_p4 = scmp.ne.s32.totalorder %s679_s29, %s6028_s9  ;;  %p6037_p10 = scmp.lt.s32.totalorder %s6028_s9, %s6028_s9 }
  0x6c   : > { %p6031_p7 = pnand %p6029_p4, %p6328_p6  ;;  %p6038_p11 = por %p6037_p10, %p6036_p9 }
  0x6e   : > { %p6032_p8 = pneg %p6031_p7 }
  0x70   : > { %p6039_p12 = pnand %p6038_p11, %p6032_p8 }
  0x72   : > { %6042 = shalt.err (!%p6039_p12)
}
  0x73   : > { %5660 = dma.hbm_to_vmem [thread:$0]  (!%p6318_p5), %s7080_s15, 32, %s679_s29, [#allocation8], %s7094_s1, %s7094_s1, %s6158_s28  }
  0x74   : > { %s6163_s30 = smov [#allocation12]  }
  0x75   : > { %s707_s6 = sshll.u32 %s6163_s30, 4  ;;  %s708_s6 = int_to_ptr.vmem [resolvable:$true] %s707_s6 }
  0x76   : > { %s6054_s7 = scalar_lea.vmem %s708_s6, 1024  ;;  %p6062_p4 = scmp.lt.s32.totalorder %s708_s6, %s708_s6 }
  0x77   : > { %p6055_p13 = scmp.ne.s32.totalorder %s708_s6, %s6054_s7  ;;  %p6063_p7 = scmp.lt.s32.totalorder %s6054_s7, %s6054_s7 }
  0x79   : > { %p6057_p0 = pnand %p6055_p13, %p6328_p6  ;;  %p6064_p8 = por %p6063_p7, %p6062_p4 }
  0x7b   : > { %p6058_p1 = pneg %p6057_p0 }
  0x7d   : > { %p6065_p9 = pnand %p6064_p8, %p6058_p1 }
  0x7f   : > { %6068 = shalt.err (!%p6065_p9)
}
  0x80   : > { %s6164_s25 = smov 128   ;;  %s6165_s3 = smov 8  }
  0x81   : > { %5666 = dma.hbm_to_vmem [thread:$0]  (!%p6318_p5), %s7083_s18, 1024, %s708_s6, [#allocation11], %s6164_s25, %s6164_s25, %s6165_s3  }
  0x82   : > { %s6166_s9 = smov [#allocation15]   ;;  %s6167_s2 = smov [#allocation18]  }
  0x83   : > { %s736_s13 = sshll.u32 %s6166_s9, 4  ;;  %s762_s30 = sshll.u32 %s6167_s2, 4  ;;  %s737_s13 = int_to_ptr.vmem [resolvable:$true] %s736_s13  ;;  %s763_s30 = int_to_ptr.vmem [resolvable:$true] %s762_s30 }
  0x84   : > { %s6080_s1 = scalar_lea.vmem %s737_s13, 32  ;;  %p6088_p13 = scmp.lt.s32.totalorder %s737_s13, %s737_s13 }
  0x85   : > { %p6081_p10 = scmp.ne.s32.totalorder %s737_s13, %s6080_s1  ;;  %p6089_p0 = scmp.lt.s32.totalorder %s6080_s1, %s6080_s1 }
  0x87   : > { %p6083_p11 = pnand %p6081_p10, %p6328_p6  ;;  %p6090_p1 = por %p6089_p0, %p6088_p13 }
  0x89   : > { %p6084_p12 = pneg %p6083_p11 }
  0x8b   : > { %p6091_p4 = pnand %p6090_p1, %p6084_p12 }
  0x8d   : > { %6094 = shalt.err (!%p6091_p4)
}
  0x8e   : > { %s7119_s6 = smov 16   ;;  %s6106_s3 = scalar_lea.vmem %s763_s30, 32 }
  0x8f   : > { %5672 = dma.hbm_to_vmem [thread:$0]  (!%p6318_p5), %s7086_s21, 32, %s737_s13, [#allocation14], %s7119_s6, %s7119_s6, %s6158_s28  }
  0x90   : > { %p6107_p7 = scmp.ne.s32.totalorder %s763_s30, %s6106_s3  ;;  %p6114_p10 = scmp.lt.s32.totalorder %s763_s30, %s763_s30 }
  0x91   : > { %p6115_p11 = scmp.lt.s32.totalorder %s6106_s3, %s6106_s3 }
  0x92   : > { %p6109_p8 = pnand %p6107_p7, %p6328_p6 }
  0x93   : > { %p6116_p13 = por %p6115_p11, %p6114_p10 }
  0x94   : > { %p6110_p9 = pneg %p6109_p8 }
  0x96   : > { %p6117_p12 = pnand %p6116_p13, %p6110_p9 }
  0x98   : > { %6120 = shalt.err (!%p6117_p12)
}
  0x99   : > { %5678 = dma.hbm_to_vmem [thread:$0]  (!%p6318_p5), %s7088_s23, 32, %s763_s30, [#allocation17], %s7119_s6, %s7119_s6, %s6158_s28  }
  0x9a   : > { %800 = sbr.rel (%p6308_p3) target bundleno = 8099 (0x1fa3), region = 116 }
  0x9f   : > { %6126 = dma.done.wait (%p5679_p2), [#allocation3], 32  }
  0xa0   : > { %6128 = vsyncadd (%p5679_p2), [#allocation3], 4294967264 }
  0xa1   : > { %6130 = dma.done.wait (%p5679_p2), [#allocation5], 64  }
  0xa2   : > { %6132 = vsyncadd (%p5679_p2), [#allocation5], 4294967232 }
  0xa3   : > { %6134 = dma.done.wait (%p5679_p2), [#allocation8], 64  }
  0xa4   : > { %6136 = vsyncadd (%p5679_p2), [#allocation8], 4294967232 }
  0xa5   : > { %6138 = dma.done.wait (%p5679_p2), [#allocation11], 1056  }
  0xa6   : > { %6140 = vsyncadd (%p5679_p2), [#allocation11], 4294966240 }
  0xa7   : > { %6142 = dma.done.wait (%p5679_p2), [#allocation14], 64  }
  0xa8   : > { %6144 = vsyncadd (%p5679_p2), [#allocation14], 4294967232 }
  0xa9   : > { %6146 = dma.done.wait (%p5679_p2), [#allocation17], 64  }
  0xaa   : > { %6148 = vsyncadd (%p5679_p2), [#allocation17], 4294967232  ;;  %p914_p3 = scmp.lt.s32.totalorder %s6303_s26, 1  ;;  %s7120_s28 = sld [smem:[#allocation25_spill]]  ;;  %vm948_vm0 = vcmask 261120   ;;  %vm1055_vm1 = vcmask 253952  }
  0xab   : > { %s7121_s2 = sld [smem:[#allocation29_spill]]  ;;  %v6168_v33 = vmov 0   ;;  %v4977_v61 = vld [vmem:[#allocation2] ss:$0 sm:$0xff]  ;;  %vm1556_vm3 = vcmask 64512   ;;  %s7100_s30 = smov 120  }
  0xac   : > { %s7132_s26 = smov (!%p914_p3, %s6303_s26), 1  ;;  %s7122_s8 = sld [smem:[#allocation30_spill]]  ;;  %5729 = vset.pattern.permute.xlu1 %v6168_v33  ;;  %5728 = vset.pattern.permute.xlu0 %v6168_v33  ;;  %vm1684_vm4 = vcmask 1040384   ;;  %vm1658_vm5 = vcmask 65536   ;;  %vm1654_vm6 = vcmask 72704   ;;  %vm2889_vm7 = vcmask 523264  }
  0xad   : > { %s6481_s27 = sshll.u32 %s7132_s26, 4  ;;  %s7123_s9 = sld [smem:[#allocation26_spill]] }
  0xae   : > { %s7125_s25 = sld [smem:[#allocation33_spill]]  ;;  %s7096_s4 = smov 104  }
  0xaf   : > { %s7126_s3 = sld [smem:[#allocation28_spill]]  ;;  %s7128_s0 = smov 120  }
  0xb0   : > { %s918_s29 = scalar_lea.vmem %s7120_s28, %s6481_s27  ;;  %s931_s7 = scalar_lea.vmem %s7089_s24, %s6481_s27 }
  0xb1   : > { %v940_v0 = vld [vmem:[%s7121_s2 + $0x18] sm:$0xff]  ;;  %v939_v1 = vld [vmem:[%s7121_s2 + $0x10] sm:$0xff]  ;;  %v932_v2 = vld [vmem:[%s918_s29] sm:$0xff] }
  0xb2   : > { %5301 = vmatprep.subr.mxu0 %v940_v0  ;;  %v938_v3 = vld [vmem:[%s7121_s2 + $0x8] sm:$0xff]  ;;  %5309 = vmatprep.mubr.msk.f32.mxu0 %vm948_vm0, %v932_v2  ;;  %v937_v4 = vld [vmem:[%s7121_s2] sm:$0xff]  ;;  %v4981_v46 = vld [vmem:[%s7121_s2 + $0x38] sm:$0xff] }
  0xb3   : > { %5302 = vmatpush3.msra.mxu0 %v940_v0  ;;  %v933_v5 = vld [vmem:[%s918_s29 + $0x8] sm:$0x1]  ;;  %v4973_v6 = vld [vmem:[%s7122_s8] ss:$0 sm:$0xff]  ;;  %s923_s13 = scalar_lea.vmem %s7123_s9, %s6481_s27  ;;  %v4980_v47 = vld [vmem:[%s7121_s2 + $0x30] sm:$0xff]  ;;  %5312 = vmatprep.subr.mxu1 %v4981_v46  ;;  %s7124_s9 = sld [smem:[#allocation31_spill]] }
  0xb4   : > { %5303 = vmatprep.subr.mxu0 %v939_v1  ;;  %v934_v34 = vld [vmem:[%s923_s13] sm:$0xff]  ;;  %v935_v45 = vld [vmem:[%s923_s13 + $0x8] sm:$0x1]  ;;  %5313 = vmatpush3.msra.mxu1 %v4981_v46  ;;  %v1382_v46 = vld [vmem:[%s7075_s10 + $0x10] sm:$0xff] }
  0xb5   : > { %5304 = vmatpush3.msra.mxu0 %v939_v1  ;;  %v4979_v48 = vld [vmem:[%s7121_s2 + $0x28] sm:$0xff]  ;;  %5314 = vmatprep.subr.mxu1 %v4980_v47  ;;  %v4978_v49 = vld [vmem:[%s7121_s2 + $0x20] sm:$0xff] }
  0xb6   : > { %5305 = vmatprep.subr.mxu0 %v938_v3  ;;  %5315 = vmatpush3.msra.mxu1 %v4980_v47  ;;  %v1289_v47 = vld [vmem:[%s7125_s25 + $0x8] sm:$0xff] }
  0xb7   : > { %5306 = vmatpush3.msra.mxu0 %v938_v3  ;;  %5316 = vmatprep.subr.mxu1 %v4979_v48 }
  0xb8   : > { %5307 = vmatprep.subr.mxu0 %v937_v4  ;;  %5317 = vmatpush3.msra.mxu1 %v4979_v48  ;;  %v1381_v48 = vld [vmem:[%s7075_s10 + $0x8] sm:$0xff] }
  0xb9   : > { %5308 = vmatpush3.msra.mxu0 %v937_v4  ;;  %5318 = vmatprep.subr.mxu1 %v4978_v49  ;;  %v4976_v57 = vld [vmem:[%s7124_s9] ss:$0 sm:$0xff] }
  0xba   : > { %5310 = vmatmul.mubr.msk.f32.vlgmr.msra.gmra.mxu0 %vm948_vm0, %v933_v5  ;;  %5319 = vmatpush3.msra.mxu1 %v4978_v49  ;;  %v1288_v49 = vld [vmem:[%s7125_s25] sm:$0xff] }
 0x17a   : > { %v5311_v7 = vpop.f32.mrf.mxu0 }
 0x17b   : > { %v1027_v8 = vadd.f32 %v5311_v7, %v4973_v6 }
 0x17c   : > { %v1021_v9 = vpop.f32.mrf.mxu0 }
 0x17d   : > { %v1031_v10 = vmul.f32 %v1027_v8, %v1027_v8  ;;  %v1022_v11 = vadd.f32 %v4973_v6, %v1021_v9  ;;  %v4983_v6 = vld [vmem:[%s7122_s8 + $0x1] ss:$0 sm:$0xff] }
 0x17f   : > { %v1033_v12 = vmul.f32 %v1031_v10, %v1027_v8  ;;  %v1030_v13 = vmul.f32 %v1022_v11, %v1022_v11 }
 0x181   : > { %v1035_v14 = vmul.f32 0.044715, %v1033_v12  ;;  %v1032_v15 = vmul.f32 %v1030_v13, %v1022_v11 }
 0x183   : > { %v1037_v16 = vadd.f32 %v1035_v14, %v1027_v8  ;;  %v1034_v17 = vmul.f32 0.044715, %v1032_v15 }
 0x185   : > { %v1039_v18 = vmul.f32 0.7978846, %v1037_v16  ;;  %v1036_v19 = vadd.f32 %v1034_v17, %v1022_v11 }
 0x187   : > { %5730 = vtanh.f32 %v1039_v18  ;;  %v1038_v20 = vmul.f32 0.7978846, %v1036_v19 }
 0x189   : > { %5732 = vtanh.f32 %v1038_v20 }
 0x194   : > { %v5731_v21 = vpop.eup %5730 }
 0x195   : > { %v1043_v22 = vadd.f32 1.0, %v5731_v21 }
 0x196   : > { %v5733_v23 = vpop.eup %5732 }
 0x197   : > { %v1042_v24 = vadd.f32 1.0, %v5733_v23  ;;  %v1045_v25 = vmul.f32 0.5, %v1043_v22 }
 0x199   : > { %v1044_v26 = vmul.f32 0.5, %v1042_v24  ;;  %v1047_v28 = vmul.f32 %v1045_v25, %v1027_v8 }
 0x19b   : > { %v1046_v27 = vmul.f32 %v1044_v26, %v1022_v11  ;;  %v1049_v31 = vadd.f32 %v1047_v28, %v933_v5 }
 0x19d   : > { %v1048_v29 = vadd.f32 %v1046_v27, %v932_v2  ;;  %v1056_v32 = vsel %vm1055_vm1, %v1049_v31, 0.0 }
 0x19f   : > { %v1052_v30 = vsel %vm948_vm0, %v1048_v29, 0.0 }
 0x1a0   : > { %1053 = vadd.xlane.f32.xlu0 %v1052_v30 }
 0x1a4   : > { %1057 = vadd.xlane.f32.xlu0 %v1056_v32 }
 0x1ba   : > { %1098 = vperm.xlu0 %5728, %v934_v34  }
 0x229   : > { %v1054_v35 = vpop.xlane.xlu0 %1053 }
 0x22a   : > { %v1060_v36 = vmul.f32 0.03125, %v1054_v35 }
 0x22c   : > { %v1062_v39 = vsub.f32 %v1048_v29, %v1060_v36 }
 0x22d   : > { %v1058_v37 = vpop.xlane.xlu0 %1057 }
 0x22e   : > { %v1061_v38 = vmul.f32 0.03125, %v1058_v37  ;;  %v1064_v43 = vmul.f32 %v1062_v39, %v1062_v39 }
 0x230   : > { %v1063_v40 = vsub.f32 %v1049_v31, %v1061_v38  ;;  %v1066_v44 = vsel %vm948_vm0, %v1064_v43, 0.0  ;;  %v1291_v43 = vld [vmem:[%s7125_s25 + $0x18] sm:$0xff] }
 0x231   : > { %5323 = vmatprep.subr.mxu0 %v1291_v43 }
 0x232   : > { %v1065_v41 = vmul.f32 %v1063_v40, %v1063_v40  ;;  %5324 = vmatpush3.msra.mxu0 %v1291_v43 }
 0x234   : > { %v1069_v42 = vsel %vm1055_vm1, %v1065_v41, 0.0 }
 0x235   : > { %1070 = vadd.xlane.f32.xlu1 %v1069_v42  ;;  %v6527_v0 = vpop.permute.xlu0 %1098 }
 0x239   : > { %1067 = vadd.xlane.f32.xlu1 %v1066_v44  ;;  %v1383_v44 = vld [vmem:[%s7075_s10 + $0x18] sm:$0xff] }
 0x23a   : > { %5334 = vmatprep.subr.mxu1 %v1383_v44 }
 0x24a   : > { %1103 = vperm.xlu1 %5729, %v935_v45   ;;  %v1290_v45 = vld [vmem:[%s7125_s25 + $0x10] sm:$0xff] }
 0x24b   : > { %5325 = vmatprep.subr.mxu0 %v1290_v45 }
 0x24c   : > { %5326 = vmatpush3.msra.mxu0 %v1290_v45 }
 0x24d   : > { %5327 = vmatprep.subr.mxu0 %v1289_v47 }
 0x24e   : > { %5328 = vmatpush3.msra.mxu0 %v1289_v47 }
 0x24f   : > { %5329 = vmatprep.subr.mxu0 %v1288_v49 }
 0x250   : > { %5330 = vmatpush3.msra.mxu0 %v1288_v49 }
 0x2be   : > { %v1071_v50 = vpop.xlane.xlu1 %1070 }
 0x2bf   : > { %v1073_v51 = vmul.f32 0.03125, %v1071_v50  ;;  %v1380_v50 = vld [vmem:[%s7075_s10] sm:$0xff] }
 0x2c1   : > { %v1075_v52 = vadd.f32 1e-05, %v1073_v51  ;;  %v1469_v51 = vld [vmem:[%s7077_s12 + $0x18] sm:$0xff] }
 0x2c2   : > { %v1068_v53 = vpop.xlane.xlu1 %1067  ;;  %5345 = vmatprep.subr.mxu0 %v1469_v51 }
 0x2c3   : > { %5734 = vrsqrt.f32 %v1075_v52  ;;  %v1072_v54 = vmul.f32 0.03125, %v1068_v53 }
 0x2c5   : > { %v1074_v55 = vadd.f32 1e-05, %v1072_v54 }
 0x2c6   : > { %v6529_v2 = vpop.permute.xlu1 %1103 }
 0x2c7   : > { %5736 = vrsqrt.f32 %v1074_v55 }
 0x2d0   : > { %v5735_v56 = vpop.eup %5734 }
 0x2d1   : > { %v1079_v58 = vmul.f32 %v5735_v56, %v1063_v40 }
 0x2d3   : > { %v1087_v60 = vmul.f32 %v4976_v57, %v1079_v58  ;;  %v1270_v58 = vlaneseq }
 0x2d4   : > { %v5737_v59 = vpop.eup %5736 }
 0x2d5   : > { %v1078_v62 = vmul.f32 %v5737_v59, %v1062_v39  ;;  %v1095_v1 = vadd.f32 %v4977_v61, %v1087_v60  ;;  %v4987_v60 = vld [vmem:[%s7124_s9 + $0x1] ss:$0 sm:$0xff] }
 0x2d7   : > { %v1086_v63 = vmul.f32 %v4976_v57, %v1078_v62  ;;  %v1107_v5 = vmul.f32 %v6529_v2, %v1095_v1  ;;  %v4988_v62 = vld [vmem:[#allocation2 + $0x1] ss:$0 sm:$0xff] }
 0x2d9   : > { %v1094_v3 = vadd.f32 %v4977_v61, %v1086_v63  ;;  %v1271_v63 = vshrl.u32 %v1270_v58, 7 }
 0x2db   : > { %v1106_v4 = vmul.f32 %v6527_v0, %v1094_v3  ;;  %vm1273_vm2 = vcmp.eq.s32.totalorder %v1271_v63, 0 }
 0x2dd   : > { %5320 = vmatprep.mubr.msk.f32.mxu1 %vm948_vm0, %v1106_v4 }
 0x2de   : > { %5321 = vmatmul.mubr.msk.f32.vlgmr.msra.gmra.mxu1 %vm948_vm0, %v1107_v5 }
 0x2df   : > { %5335 = vmatpush3.msra.mxu1 %v1383_v44 }
 0x2e0   : > { %5336 = vmatprep.subr.mxu1 %v1382_v46 }
 0x2e1   : > { %5337 = vmatpush3.msra.mxu1 %v1382_v46 }
 0x2e2   : > { %5338 = vmatprep.subr.mxu1 %v1381_v48 }
 0x2e3   : > { %5339 = vmatpush3.msra.mxu1 %v1381_v48 }
 0x2e4   : > { %5340 = vmatprep.subr.mxu1 %v1380_v50 }
 0x2e5   : > { %5341 = vmatpush3.msra.mxu1 %v1380_v50 }
 0x39e   : > { %v5322_v7 = vpop.f32.mrf.mxu1 }
 0x39f   : > { %v1199_v8 = vadd.f32 %v5322_v7, %v4983_v6 }
 0x3a0   : > { %v1193_v9 = vpop.f32.mrf.mxu1 }
 0x3a1   : > { %v1203_v10 = vmul.f32 %v1199_v8, %v1199_v8  ;;  %v1194_v11 = vadd.f32 %v4983_v6, %v1193_v9  ;;  %v4989_v6 = vld [vmem:[%s7126_s3] ss:$0 sm:$0xff]  ;;  %s7127_s3 = sld [smem:[#allocation27_spill]] }
 0x3a3   : > { %v1205_v12 = vmul.f32 %v1203_v10, %v1199_v8  ;;  %v1202_v13 = vmul.f32 %v1194_v11, %v1194_v11 }
 0x3a5   : > { %v1207_v14 = vmul.f32 0.044715, %v1205_v12  ;;  %v1204_v15 = vmul.f32 %v1202_v13, %v1194_v11  ;;  %v1468_v12 = vld [vmem:[%s7077_s12 + $0x10] sm:$0xff]  ;;  %v1467_v13 = vld [vmem:[%s7077_s12 + $0x8] sm:$0xff] }
 0x3a7   : > { %v1209_v16 = vadd.f32 %v1207_v14, %v1199_v8  ;;  %v1206_v17 = vmul.f32 0.044715, %v1204_v15  ;;  %v1466_v14 = vld [vmem:[%s7077_s12] sm:$0xff]  ;;  %s6650_s1 = scalar_lea.vmem %s7127_s3, %s7132_s26  ;;  %s7098_s26 = smov 112  }
 0x3a8   : > { %v4993_v15 = vld [vmem:[#allocation6] ss:$0 sm:$0xff] }
 0x3a9   : > { %v1211_v18 = vmul.f32 0.7978846, %v1209_v16  ;;  %v1208_v19 = vadd.f32 %v1206_v17, %v1194_v11 }
 0x3ab   : > { %5738 = vtanh.f32 %v1211_v18  ;;  %v1210_v20 = vmul.f32 0.7978846, %v1208_v19  ;;  %v4990_v19 = vld [vmem:[#allocation4] ss:$0 sm:$0xff] }
 0x3ad   : > { %5740 = vtanh.f32 %v1210_v20 }
 0x3b8   : > { %v5739_v21 = vpop.eup %5738 }
 0x3b9   : > { %v1215_v22 = vadd.f32 1.0, %v5739_v21 }
 0x3ba   : > { %v5741_v23 = vpop.eup %5740 }
 0x3bb   : > { %v1217_v24 = vmul.f32 0.5, %v1215_v22  ;;  %v1214_v25 = vadd.f32 1.0, %v5741_v23 }
 0x3bd   : > { %v1219_v26 = vmul.f32 %v1217_v24, %v1199_v8  ;;  %v1216_v27 = vmul.f32 0.5, %v1214_v25  ;;  %v4996_v24 = vld [vmem:[#allocation7] ss:$0 sm:$0xff] }
 0x3bf   : > { %v1221_v28 = vadd.f32 %v1219_v26, %v1107_v5  ;;  %v1218_v29 = vmul.f32 %v1216_v27, %v1194_v11 }
 0x3c1   : > { %v1229_v30 = vsel %vm1055_vm1, %v1221_v28, 0.0  ;;  %v1220_v31 = vadd.f32 %v1218_v29, %v1106_v4 }
 0x3c2   : > { %1230 = vadd.xlane.f32.xlu0 %v1229_v30 }
 0x3c3   : > { %v1226_v32 = vsel %vm948_vm0, %v1220_v31, 0.0 }
 0x3c4   : > { %1227 = vadd.xlane.f32.xlu1 %v1226_v32 }
 0x44b   : > { %v1231_v33 = vpop.xlane.xlu0 %1230 }
 0x44c   : > { %v1233_v34 = vmul.f32 0.03125, %v1231_v33 }
 0x44d   : > { %v1228_v35 = vpop.xlane.xlu1 %1227 }
 0x44e   : > { %v1232_v36 = vmul.f32 0.03125, %v1228_v35  ;;  %v1235_v37 = vsub.f32 %v1221_v28, %v1233_v34  ;;  %v6653_v34 = vld [vmem:[%s6650_s1] ss:$0 sm:$0xff] }
 0x450   : > { %v1234_v38 = vsub.f32 %v1220_v31, %v1232_v36  ;;  %v1237_v41 = vmul.f32 %v1235_v37, %v1235_v37 }
 0x452   : > { %v1236_v39 = vmul.f32 %v1234_v38, %v1234_v38  ;;  %v1241_v42 = vsel %vm1055_vm1, %v1237_v41, 0.0 }
 0x454   : > { %v1238_v40 = vsel %vm948_vm0, %v1236_v39, 0.0 }
 0x455   : > { %1239 = vadd.xlane.f32.xlu1 %v1238_v40 }
 0x459   : > { %1242 = vadd.xlane.f32.xlu1 %v1241_v42 }
 0x4de   : > { %v1240_v52 = vpop.xlane.xlu1 %1239 }
 0x4df   : > { %v1244_v53 = vmul.f32 0.03125, %v1240_v52 }
 0x4e1   : > { %v1246_v54 = vadd.f32 1e-05, %v1244_v53 }
 0x4e2   : > { %v1243_v55 = vpop.xlane.xlu1 %1242 }
 0x4e3   : > { %5742 = vrsqrt.f32 %v1246_v54  ;;  %v1245_v56 = vmul.f32 0.03125, %v1243_v55 }
 0x4e5   : > { %v1247_v57 = vadd.f32 1e-05, %v1245_v56 }
 0x4e7   : > { %5744 = vrsqrt.f32 %v1247_v57 }
 0x4f0   : > { %v5743_v59 = vpop.eup %5742 }
 0x4f1   : > { %v1250_v61 = vmul.f32 %v5743_v59, %v1234_v38 }
 0x4f3   : > { %v1258_v1 = vmul.f32 %v4987_v60, %v1250_v61 }
 0x4f4   : > { %v5745_v3 = vpop.eup %5744 }
 0x4f5   : > { %v1251_v4 = vmul.f32 %v5745_v3, %v1235_v37  ;;  %v1266_v5 = vadd.f32 %v4988_v62, %v1258_v1 }
 0x4f7   : > { %v1259_v7 = vmul.f32 %v4987_v60, %v1251_v4  ;;  %v1268_v8 = vmul.f32 %v1266_v5, %v6527_v0 }
 0x4f9   : > { %v1267_v9 = vadd.f32 %v4988_v62, %v1259_v7  ;;  %v6576_v10 = vsel %vm1273_vm2, %v4989_v6, %v1268_v8 }
 0x4fa   : > { %5331 = vmatprep.mubr.msk.f32.mxu0 %vm948_vm0, %v6576_v10  ;;  %5342 = vmatprep.mubr.msk.f32.mxu1 %vm948_vm0, %v6576_v10 }
 0x4fb   : > { %v6583_v11 = vmul.f32 %v1267_v9, %v6529_v2 }
 0x4fd   : > { %5332 = vmatmul.mubr.msk.f32.vlgmr.msra.gmra.mxu0 %vm948_vm0, %v6583_v11  ;;  %5343 = vmatmul.mubr.msk.f32.vlgmr.msra.gmra.mxu1 %vm948_vm0, %v6583_v11 }
 0x4fe   : > { %5346 = vmatpush3.msra.mxu0 %v1469_v51  ;;  %5353 = vmatprep.mubr.msk.f32.mxu0 %vm948_vm0, %v6576_v10 }
 0x4ff   : > { %5347 = vmatprep.subr.mxu0 %v1468_v12 }
 0x500   : > { %5348 = vmatpush3.msra.mxu0 %v1468_v12 }
 0x501   : > { %5349 = vmatprep.subr.mxu0 %v1467_v13 }
 0x502   : > { %5350 = vmatpush3.msra.mxu0 %v1467_v13 }
 0x503   : > { %5351 = vmatprep.subr.mxu0 %v1466_v14 }
 0x504   : > { %5352 = vmatpush3.msra.mxu0 %v1466_v14 }
 0x505   : > { %5354 = vmatmul.mubr.msk.f32.vlgmr.msra.gmra.mxu0 %vm948_vm0, %v6583_v11 }
 0x5bd   : > { %v5333_v16 = vpop.f32.mrf.mxu0  ;;  %v5344_v17 = vpop.f32.mrf.mxu1 }
 0x5be   : > { %v6602_v18 = vadd.f32 %v5344_v17, %v4993_v15  ;;  %v6624_v26 = vadd.f32 %v5333_v16, %v4990_v19 }
 0x5bf   : > { %v1371_v20 = vpop.f32.mrf.mxu0  ;;  %v1457_v21 = vpop.f32.mrf.mxu1 }
 0x5c0   : > { %v6604_v22 = vadd.f32 %v4990_v19, %v1371_v20  ;;  %v6606_v23 = vadd.f32 %v4993_v15, %v1457_v21  ;;  %1769 = vrot.lane.b32.xlu1 %v6602_v18, %s7100_s30  ;;  %5356 = vmatprep.subr.msk.mxu1 %vm1556_vm3, %v6602_v18  ;;  %v1553_v21 = vld [vmem:[%s7079_s14 + $0x8] sm:$0xff] }
 0x5c1   : > { %5357 = vmatpush3.xpose.msk.msra.mxu1 %vm1556_vm3, %v6602_v18 }
 0x5c2   : > { %1767 = vrot.lane.b32.xlu0 %v6606_v23, %s7100_s30  ;;  %5358 = vmatprep.subr.msk.mxu1 %vm1556_vm3, %v6606_v23 }
 0x5c3   : > { %5360 = vmatprep.mubr.msk.f32.mxu1 %vm1556_vm3, %v6604_v22 }
 0x5c4   : > { %1763 = vrot.lane.b32.xlu1 %v6604_v22, %s7100_s30 }
 0x5c5   : > { %v5355_v25 = vpop.f32.mrf.mxu0  ;;  %5359 = vmatpush3.xpose.msk.msra.mxu1 %vm1556_vm3, %v6606_v23 }
 0x5c6   : > { %v6626_v27 = vadd.f32 %v5355_v25, %v4996_v24 }
 0x5c7   : > { %v1543_v28 = vpop.f32.mrf.mxu0 }
 0x5c8   : > { %v6628_v29 = vadd.f32 %v4996_v24, %v1543_v28  ;;  %5363 = vmatprep.subr.msk.mxu0 %vm1684_vm4, %v6626_v27  ;;  %1765 = vrot.lane.b32.xlu1 %v6624_v26, %s7100_s30 }
 0x5c9   : > { %5364 = vmatpush3.msk.msra.mxu0 %vm1684_vm4, %v6626_v27  ;;  %5361 = vmatmul.mubr.msk.f32.vlgmr.msra.gmra.mxu1 %vm1556_vm3, %v6624_v26 }
 0x5ca   : > { %5365 = vmatprep.subr.mxu0 %v6628_v29 }
 0x5cb   : > { %5366 = vmatpush3.msra.mxu0 %v6628_v29 }
 0x632   : > { %v1770_v30 = vpop.permute.xlu1 %1769 }
 0x633   : > { %5370 = vmatprep.subr.msk.mxu1 %vm1556_vm3, %v1770_v30 }
 0x634   : > { %v1768_v31 = vpop.permute.xlu0 %1767  ;;  %5371 = vmatpush3.xpose.msk.msra.mxu1 %vm1556_vm3, %v1770_v30 }
 0x635   : > { %5372 = vmatprep.subr.msk.mxu1 %vm1556_vm3, %v1768_v31 }
 0x636   : > { %v1764_v32 = vpop.permute.xlu1 %1763 }
 0x637   : > { %5374 = vmatprep.mubr.msk.f32.mxu1 %vm1556_vm3, %v1764_v32 }
 0x638   : > { %5373 = vmatpush3.xpose.msk.msra.mxu1 %vm1556_vm3, %v1768_v31 }
 0x63a   : > { %v1766_v33 = vpop.permute.xlu1 %1765 }
 0x63b   : > { %5375 = vmatmul.mubr.msk.f32.vlgmr.msra.gmra.mxu1 %vm1556_vm3, %v1766_v33 }
 0x689   : > { %v5362_v35 = vpop.f32.mrf.mxu1 }
 0x68a   : > { %v1645_v36 = vmul.f32 0.35355338, %v5362_v35 }
 0x68b   : > { %v1635_v37 = vpop.f32.mrf.mxu1 }
 0x68c   : > { %v1644_v38 = vmul.f32 0.35355338, %v1635_v37  ;;  %v1653_v39 = vadd.f32 %v6653_v34, %v1645_v36 }
 0x68e   : > { %v1659_v40 = vsel %vm1658_vm5, %v1653_v39, -inf  ;;  %v1652_v41 = vadd.f32 %v6653_v34, %v1644_v38 }
 0x68f   : > { %1660 = vmax.xlane.f32.xlu0 %v1659_v40 }
 0x690   : > { %v1655_v42 = vsel %vm1654_vm6, %v1652_v41, -inf }
 0x691   : > { %1656 = vmax.xlane.f32.xlu1 %v1655_v42 }
 0x6fb   : > { %v5376_v43 = vpop.f32.mrf.mxu1 }
 0x6fc   : > { %v1855_v45 = vmul.f32 0.35355338, %v5376_v43 }
 0x6fd   : > { %v1845_v44 = vpop.f32.mrf.mxu1 }
 0x6fe   : > { %v1854_v46 = vmul.f32 0.35355338, %v1845_v44  ;;  %v1857_v49 = vadd.f32 %v6653_v34, %v1855_v45 }
 0x700   : > { %v1856_v47 = vadd.f32 %v6653_v34, %v1854_v46  ;;  %v1861_v50 = vsel %vm1658_vm5, %v1857_v49, -inf }
 0x702   : > { %v1858_v48 = vsel %vm1654_vm6, %v1856_v47, -inf }
 0x703   : > { %1859 = vmax.xlane.f32.xlu1 %v1858_v48 }
 0x707   : > { %1862 = vmax.xlane.f32.xlu1 %v1861_v50 }
 0x718   : > { %v1661_v51 = vpop.xlane.xlu0 %1660 }
 0x719   : > { %v1663_v52 = vsub.f32 %v1653_v39, %v1661_v51 }
 0x71a   : > { %v1657_v53 = vpop.xlane.xlu1 %1656 }
 0x71b   : > { %v1666_v54 = vmul.f32 1.442695, %v1663_v52  ;;  %v1662_v55 = vsub.f32 %v1652_v41, %v1657_v53 }
 0x71d   : > { %5746 = vpow2.f32 %v1666_v54  ;;  %v1664_v56 = vmul.f32 1.442695, %v1662_v55 }
 0x71f   : > { %5748 = vpow2.f32 %v1664_v56 }
 0x72a   : > { %v5747_v57 = vpop.eup %5746 }
 0x72b   : > { %v1671_v58 = vsel %vm1658_vm5, %v5747_v57, 0.0 }
 0x72c   : > { %v5749_v59 = vpop.eup %5748  ;;  %1672 = vadd.xlane.f32.xlu1 %v1671_v58 }
 0x72d   : > { %v1668_v60 = vsel %vm1654_vm6, %v5749_v59, 0.0 }
 0x72e   : > { %1669 = vadd.xlane.f32.xlu0 %v1668_v60 }
 0x78c   : > { %v1860_v61 = vpop.xlane.xlu1 %1859 }
 0x78d   : > { %v1864_v62 = vsub.f32 %v1856_v47, %v1860_v61 }
 0x78f   : > { %v1866_v63 = vmul.f32 1.442695, %v1864_v62 }
 0x790   : > { %v1863_v1 = vpop.xlane.xlu1 %1862 }
 0x791   : > { %5750 = vpow2.f32 %v1866_v63  ;;  %v1865_v3 = vsub.f32 %v1857_v49, %v1863_v1 }
 0x793   : > { %v1868_v4 = vmul.f32 1.442695, %v1865_v3 }
 0x795   : > { %5752 = vpow2.f32 %v1868_v4 }
 0x79e   : > { %v5751_v5 = vpop.eup %5750 }
 0x79f   : > { %v1870_v6 = vsel %vm1654_vm6, %v5751_v5, 0.0 }
 0x7a0   : > { %1871 = vadd.xlane.f32.xlu0 %v1870_v6 }
 0x7a2   : > { %v5753_v7 = vpop.eup %5752 }
 0x7a3   : > { %v1873_v8 = vsel %vm1658_vm5, %v5753_v7, 0.0 }
 0x7a4   : > { %1874 = vadd.xlane.f32.xlu1 %v1873_v8 }
 0x7b5   : > { %v1673_v9 = vpop.xlane.xlu1 %1672  ;;  %1881 = vrot.lane.b32.xlu1 %v6628_v29, %s7100_s30 }
 0x7b6   : > { %1883 = vrot.lane.b32.xlu0 %v6626_v27, %s7100_s30  ;;  %5754 = vrcp.f32 %v1673_v9 }
 0x7b7   : > { %v1670_v12 = vpop.xlane.xlu0 %1669 }
 0x7b8   : > { %5756 = vrcp.f32 %v1670_v12 }
 0x7b9   : > { %2137 = vrot.lane.b32.xlu1 %v6602_v18, %s7098_s26 }
 0x7ba   : > { %2135 = vrot.lane.b32.xlu0 %v6606_v23, %s7098_s26 }
 0x7bd   : > { %2131 = vrot.lane.b32.xlu1 %v6604_v22, %s7098_s26 }
 0x7be   : > { %2133 = vrot.lane.b32.xlu0 %v6624_v26, %s7098_s26 }
 0x7c1   : > { %2425 = vrot.lane.b32.xlu1 %v6602_v18, %s7096_s4 }
 0x7c2   : > { %2423 = vrot.lane.b32.xlu0 %v6606_v23, %s7096_s4 }
 0x7c3   : > { %v5755_v13 = vpop.eup %5754 }
 0x7c4   : > { %v1677_v16 = vmul.f32 %v5755_v13, %v5747_v57 }
 0x7c5   : > { %v5757_v14 = vpop.eup %5756  ;;  %2419 = vrot.lane.b32.xlu1 %v6604_v22, %s7096_s4 }
 0x7c6   : > { %2421 = vrot.lane.b32.xlu0 %v6624_v26, %s7096_s4  ;;  %v1676_v15 = vmul.f32 %v5757_v14, %v5749_v59  ;;  %v1552_v26 = vld [vmem:[%s7079_s14] sm:$0xff] }
 0x7c8   : > { %5367 = vmatprep.mubr.msk.f32.mxu0 %vm1654_vm6, %v1676_v15 }
 0x7c9   : > { %5368 = vmatmul.mubr.msk.f32.vlgmr.msra.gmra.mxu0 %vm1654_vm6, %v1677_v16 }
 0x829   : > { %v1872_v17 = vpop.xlane.xlu0 %1871 }
 0x82a   : > { %5758 = vrcp.f32 %v1872_v17 }
 0x82d   : > { %v1884_v18 = vpop.permute.xlu0 %1883  ;;  %v1875_v19 = vpop.xlane.xlu1 %1874 }
 0x82e   : > { %5760 = vrcp.f32 %v1875_v19  ;;  %5377 = vmatprep.subr.msk.mxu0 %vm1684_vm4, %v1884_v18 }
 0x82f   : > { %5378 = vmatpush3.msk.msra.mxu0 %vm1684_vm4, %v1884_v18 }
 0x831   : > { %v1882_v20 = vpop.permute.xlu1 %1881  ;;  %v2136_v36 = vpop.permute.xlu0 %2135 }
 0x832   : > { %5379 = vmatprep.subr.mxu0 %v1882_v20 }
 0x833   : > { %5380 = vmatpush3.msra.mxu0 %v1882_v20 }
 0x834   : > { %5384 = vmatprep.subr.mxu0 %v1553_v21 }
 0x835   : > { %v2138_v30 = vpop.permute.xlu1 %2137  ;;  %v2134_v38 = vpop.permute.xlu0 %2133 }
 0x837   : > { %v5759_v22 = vpop.eup %5758 }
 0x838   : > { %v1878_v23 = vmul.f32 %v5759_v22, %v5751_v5 }
 0x839   : > { %v2132_v35 = vpop.permute.xlu1 %2131  ;;  %v2424_v40 = vpop.permute.xlu0 %2423 }
 0x83a   : > { %5381 = vmatprep.mubr.msk.f32.mxu0 %vm1654_vm6, %v1878_v23 }
 0x83b   : > { %v5761_v24 = vpop.eup %5760 }
 0x83c   : > { %v1879_v25 = vmul.f32 %v5761_v24, %v5753_v7 }
 0x83d   : > { %v2426_v37 = vpop.permute.xlu1 %2425  ;;  %v2422_v41 = vpop.permute.xlu0 %2421 }
 0x83e   : > { %5382 = vmatmul.mubr.msk.f32.vlgmr.msra.gmra.mxu0 %vm1654_vm6, %v1879_v25 }
 0x83f   : > { %5385 = vmatpush3.msra.mxu0 %v1553_v21 }
 0x840   : > { %5389 = vmatprep.subr.mxu0 %v1552_v26 }
 0x841   : > { %v2420_v39 = vpop.permute.xlu1 %2419 }
 0x889   : > { %v5369_v28 = vpop.f32.mrf.mxu0 }
 0x88b   : > { %v1754_v31 = vpop.f32.mrf.mxu0 }
 0x8fe   : > { %v5383_v32 = vpop.f32.mrf.mxu0 }
 0x900   : > { %v1960_v33 = vpop.f32.mrf.mxu0 }
 0x901   : > { %5386 = vmatprep.mubr.msk.f32.mxu0 %vm1556_vm3, %v1960_v33 }
 0x902   : > { %5387 = vmatmul.mubr.msk.f32.vlgmr.msra.gmra.mxu0 %vm1556_vm3, %v5383_v32 }
 0x903   : > { %5390 = vmatpush3.msra.mxu0 %v1552_v26  ;;  %5391 = vmatprep.mubr.msk.f32.mxu0 %vm1556_vm3, %v1754_v31 }
 0x904   : > { %5394 = vmatprep.subr.msk.mxu0 %vm1556_vm3, %v2138_v30 }
 0x906   : > { %5392 = vmatmul.mubr.msk.f32.vlgmr.msra.gmra.mxu0 %vm1556_vm3, %v5369_v28 }
 0x907   : > { %5395 = vmatpush3.xpose.msk.msra.mxu0 %vm1556_vm3, %v2138_v30  ;;  %5398 = vmatprep.mubr.msk.f32.mxu0 %vm1556_vm3, %v2132_v35  ;;  %v1554_v35 = vld [vmem:[%s7079_s14 + $0x10] sm:$0xff] }
 0x908   : > { %5396 = vmatprep.subr.msk.mxu0 %vm1556_vm3, %v2136_v36 }
 0x90b   : > { %5397 = vmatpush3.xpose.msk.msra.mxu0 %vm1556_vm3, %v2136_v36 }
 0x90c   : > { %5413 = vmatprep.subr.msk.mxu0 %vm1556_vm3, %v2426_v37 }
 0x90e   : > { %5399 = vmatmul.mubr.msk.f32.vlgmr.msra.gmra.mxu0 %vm1556_vm3, %v2134_v38 }
 0x90f   : > { %5414 = vmatpush3.xpose.msk.msra.mxu0 %vm1556_vm3, %v2426_v37  ;;  %5417 = vmatprep.mubr.msk.f32.mxu0 %vm1556_vm3, %v2420_v39 }
 0x910   : > { %5415 = vmatprep.subr.msk.mxu0 %vm1556_vm3, %v2424_v40 }
 0x913   : > { %5416 = vmatpush3.xpose.msk.msra.mxu0 %vm1556_vm3, %v2424_v40 }
 0x916   : > { %5418 = vmatmul.mubr.msk.f32.vlgmr.msra.gmra.mxu0 %vm1556_vm3, %v2422_v41 }
 0x9c2   : > { %v5388_v42 = vpop.f32.mrf.mxu0 }
 0x9c4   : > { %v2041_v43 = vpop.f32.mrf.mxu0 }
 0x9c6   : > { %v5393_v44 = vpop.f32.mrf.mxu0 }
 0x9c7   : > { %v6715_v45 = vadd.f32 %v5393_v44, %v5388_v42  ;;  %v1555_v44 = vld [vmem:[%s7079_s14 + $0x18] sm:$0xff] }
 0x9c8   : > { %v2122_v46 = vpop.f32.mrf.mxu0 }
 0x9c9   : > { %v6717_v47 = vadd.f32 %v2122_v46, %v2041_v43 }
 0x9ce   : > { %v5400_v48 = vpop.f32.mrf.mxu0 }
 0x9cf   : > { %v2223_v49 = vmul.f32 0.35355338, %v5400_v48 }
 0x9d0   : > { %v2213_v50 = vpop.f32.mrf.mxu0 }
 0x9d1   : > { %v2222_v51 = vmul.f32 0.35355338, %v2213_v50  ;;  %v2225_v52 = vadd.f32 %v6653_v34, %v2223_v49 }
 0x9d3   : > { %v2229_v53 = vsel %vm1658_vm5, %v2225_v52, -inf  ;;  %v2224_v54 = vadd.f32 %v6653_v34, %v2222_v51 }
 0x9d4   : > { %2230 = vmax.xlane.f32.xlu0 %v2229_v53 }
 0x9d5   : > { %v2226_v55 = vsel %vm1654_vm6, %v2224_v54, -inf }
 0x9d6   : > { %2227 = vmax.xlane.f32.xlu1 %v2226_v55  ;;  %v5419_v4 = vpop.f32.mrf.mxu0 }
 0x9d7   : > { %v2511_v7 = vmul.f32 0.35355338, %v5419_v4 }
 0x9d8   : > { %v2501_v5 = vpop.f32.mrf.mxu0 }
 0x9d9   : > { %v2510_v6 = vmul.f32 0.35355338, %v2501_v5  ;;  %v2513_v9 = vadd.f32 %v6653_v34, %v2511_v7 }
 0x9db   : > { %v2512_v8 = vadd.f32 %v6653_v34, %v2510_v6  ;;  %v2517_v13 = vsel %vm1658_vm5, %v2513_v9, -inf }
 0x9dd   : > { %v2514_v12 = vsel %vm1654_vm6, %v2512_v8, -inf }
 0xa5d   : > { %v2231_v56 = vpop.xlane.xlu0 %2230 }
 0xa5e   : > { %v2233_v57 = vsub.f32 %v2225_v52, %v2231_v56  ;;  %v5036_v56 = vld [vmem:[#allocation9] ss:$0 sm:$0xff] }
 0xa5f   : > { %v2228_v58 = vpop.xlane.xlu1 %2227 }
 0xa60   : > { %v2236_v59 = vmul.f32 1.442695, %v2233_v57  ;;  %v2232_v60 = vsub.f32 %v2224_v54, %v2228_v58 }
 0xa62   : > { %5762 = vpow2.f32 %v2236_v59  ;;  %v2234_v61 = vmul.f32 1.442695, %v2232_v60 }
 0xa64   : > { %5764 = vpow2.f32 %v2234_v61 }
 0xa6f   : > { %v5763_v62 = vpop.eup %5762 }
 0xa70   : > { %v2241_v63 = vsel %vm1658_vm5, %v5763_v62, 0.0 }
 0xa71   : > { %v5765_v1 = vpop.eup %5764  ;;  %2242 = vadd.xlane.f32.xlu1 %v2241_v63 }
 0xa72   : > { %v2238_v3 = vsel %vm1654_vm6, %v5765_v1, 0.0 }
 0xa73   : > { %2239 = vadd.xlane.f32.xlu0 %v2238_v3 }
 0xa82   : > { %2248 = vrot.lane.b32.xlu1 %v6628_v29, %s7098_s26 }
 0xa89   : > { %2250 = vrot.lane.b32.xlu0 %v6626_v27, %s7098_s26  ;;  %s7130_s26 = smov 104  }
 0xaa6   : > { %2515 = vmax.xlane.f32.xlu1 %v2514_v12  ;;  %v2765_v12 = vld [vmem:[#allocation12 + $0x8] sm:$0xff] }
 0xaa8   : > { %2518 = vmax.xlane.f32.xlu0 %v2517_v13  ;;  %v2764_v13 = vld [vmem:[#allocation12] sm:$0xff] }
 0xafa   : > { %v2243_v14 = vpop.xlane.xlu1 %2242 }
 0xafb   : > { %5766 = vrcp.f32 %v2243_v14 }
 0xafc   : > { %v2240_v15 = vpop.xlane.xlu0 %2239 }
 0xafd   : > { %5768 = vrcp.f32 %v2240_v15 }
 0xafe   : > { %v2249_v17 = vpop.permute.xlu1 %2248 }
 0xb00   : > { %v2251_v16 = vpop.permute.xlu0 %2250 }
 0xb01   : > { %5401 = vmatprep.subr.msk.mxu1 %vm1684_vm4, %v2251_v16 }
 0xb02   : > { %5402 = vmatpush3.msk.msra.mxu1 %vm1684_vm4, %v2251_v16 }
 0xb03   : > { %5403 = vmatprep.subr.mxu1 %v2249_v17 }
 0xb04   : > { %5404 = vmatpush3.msra.mxu1 %v2249_v17 }
 0xb05   : > { %5408 = vmatprep.subr.mxu1 %v1554_v35 }
 0xb08   : > { %v5767_v18 = vpop.eup %5766 }
 0xb09   : > { %v2247_v21 = vmul.f32 %v5767_v18, %v5763_v62 }
 0xb0a   : > { %v5769_v19 = vpop.eup %5768 }
 0xb0b   : > { %v2246_v20 = vmul.f32 %v5769_v19, %v5765_v1 }
 0xb0d   : > { %5405 = vmatprep.mubr.msk.f32.mxu1 %vm1654_vm6, %v2246_v20 }
 0xb0e   : > { %5406 = vmatmul.mubr.msk.f32.vlgmr.msra.gmra.mxu1 %vm1654_vm6, %v2247_v21  ;;  %v5037_v21 = vld [vmem:[%s7081_s16] ss:$0 sm:$0xff] }
 0xb0f   : > { %5409 = vmatpush3.msra.mxu1 %v1554_v35  ;;  %v2881_v35 = vld [vmem:[%s7085_s20 + $0x38] sm:$0xff] }
 0xb2f   : > { %v2516_v22 = vpop.xlane.xlu1 %2515 }
 0xb30   : > { %v2520_v23 = vsub.f32 %v2512_v8, %v2516_v22  ;;  %v2767_v8 = vld [vmem:[#allocation12 + $0x18] sm:$0xff] }
 0xb31   : > { %v2519_v24 = vpop.xlane.xlu0 %2518  ;;  %5432 = vmatprep.subr.mxu0 %v2767_v8 }
 0xb32   : > { %v2522_v25 = vmul.f32 1.442695, %v2520_v23  ;;  %v2521_v26 = vsub.f32 %v2513_v9, %v2519_v24  ;;  %v2766_v9 = vld [vmem:[#allocation12 + $0x10] sm:$0xff]  ;;  %5433 = vmatpush3.msra.mxu0 %v2767_v8  ;;  %v5038_v24 = vld [vmem:[#allocation10] ss:$0 sm:$0xff] }
 0xb33   : > { %5434 = vmatprep.subr.mxu0 %v2766_v9 }
 0xb34   : > { %5770 = vpow2.f32 %v2522_v25  ;;  %v2524_v28 = vmul.f32 1.442695, %v2521_v26  ;;  %5435 = vmatpush3.msra.mxu0 %v2766_v9 }
 0xb35   : > { %5436 = vmatprep.subr.mxu0 %v2765_v12 }
 0xb36   : > { %5772 = vpow2.f32 %v2524_v28  ;;  %5437 = vmatpush3.msra.mxu0 %v2765_v12 }
 0xb37   : > { %5438 = vmatprep.subr.mxu0 %v2764_v13 }
 0xb38   : > { %5439 = vmatpush3.msra.mxu0 %v2764_v13 }
 0xb41   : > { %v5771_v30 = vpop.eup %5770 }
 0xb42   : > { %v2526_v31 = vsel %vm1654_vm6, %v5771_v30, 0.0 }
 0xb43   : > { %v5773_v32 = vpop.eup %5772  ;;  %2527 = vadd.xlane.f32.xlu0 %v2526_v31 }
 0xb44   : > { %v2529_v33 = vsel %vm1658_vm5, %v5773_v32, 0.0 }
 0xb45   : > { %2530 = vadd.xlane.f32.xlu1 %v2529_v33 }
 0xb56   : > { %2536 = vrot.lane.b32.xlu1 %v6628_v29, %s7096_s4 }
 0xb59   : > { %2538 = vrot.lane.b32.xlu0 %v6626_v27, %s7096_s4 }
 0xbcc   : > { %v2528_v36 = vpop.xlane.xlu0 %2527 }
 0xbcd   : > { %5774 = vrcp.f32 %v2528_v36  ;;  %v2880_v36 = vld [vmem:[%s7085_s20 + $0x30] sm:$0xff] }
 0xbce   : > { %v5407_v37 = vpop.f32.mrf.mxu1  ;;  %v2531_v38 = vpop.xlane.xlu1 %2530 }
 0xbcf   : > { %5776 = vrcp.f32 %v2531_v38  ;;  %v2878_v38 = vld [vmem:[%s7085_s20 + $0x20] sm:$0xff] }
 0xbd0   : > { %v2327_v39 = vpop.f32.mrf.mxu1  ;;  %v2539_v40 = vpop.permute.xlu0 %2538 }
 0xbd1   : > { %5410 = vmatprep.mubr.msk.f32.mxu1 %vm1556_vm3, %v2327_v39  ;;  %5420 = vmatprep.subr.msk.mxu1 %vm1684_vm4, %v2539_v40  ;;  %v2877_v39 = vld [vmem:[%s7085_s20 + $0x18] sm:$0xff] }
 0xbd2   : > { %5411 = vmatmul.mubr.msk.f32.vlgmr.msra.gmra.mxu1 %vm1556_vm3, %v5407_v37  ;;  %v2537_v41 = vpop.permute.xlu1 %2536  ;;  %v2879_v37 = vld [vmem:[%s7085_s20 + $0x28] sm:$0xff] }
 0xbd3   : > { %5421 = vmatpush3.msk.msra.mxu1 %vm1684_vm4, %v2539_v40  ;;  %v2876_v40 = vld [vmem:[%s7085_s20 + $0x10] sm:$0xff] }
 0xbd4   : > { %5422 = vmatprep.subr.mxu1 %v2537_v41 }
 0xbd5   : > { %5423 = vmatpush3.msra.mxu1 %v2537_v41  ;;  %v2875_v41 = vld [vmem:[%s7085_s20 + $0x8] sm:$0xff] }
 0xbd6   : > { %5427 = vmatprep.subr.mxu1 %v1555_v44 }
 0xbda   : > { %v5775_v29 = vpop.eup %5774 }
 0xbdb   : > { %v2534_v27 = vmul.f32 %v5775_v29, %v5771_v30  ;;  %v2874_v29 = vld [vmem:[%s7085_s20] sm:$0xff] }
 0xbdc   : > { %v5777_v42 = vpop.eup %5776 }
 0xbdd   : > { %5424 = vmatprep.mubr.msk.f32.mxu1 %vm1654_vm6, %v2534_v27  ;;  %v2535_v43 = vmul.f32 %v5777_v42, %v5773_v32  ;;  %v5039_v27 = vld [vmem:[#allocation13] ss:$0 sm:$0xff] }
 0xbdf   : > { %5425 = vmatmul.mubr.msk.f32.vlgmr.msra.gmra.mxu1 %vm1654_vm6, %v2535_v43 }
 0xbe0   : > { %5428 = vmatpush3.msra.mxu1 %v1555_v44 }
 0xbe1   : > { %5443 = vmatprep.subr.mxu1 %v2881_v35 }
 0xc92   : > { %v5412_v46 = vpop.f32.mrf.mxu1 }
 0xc93   : > { %v2418_v48 = vadd.f32 %v5412_v46, %v6715_v45 }
 0xc94   : > { %v2408_v49 = vpop.f32.mrf.mxu1 }
 0xc95   : > { %v2417_v50 = vadd.f32 %v2408_v49, %v6717_v47 }
 0xc9f   : > { %v5426_v51 = vpop.f32.mrf.mxu1 }
 0xca1   : > { %v2615_v52 = vpop.f32.mrf.mxu1 }
 0xca2   : > { %5429 = vmatprep.mubr.msk.f32.mxu1 %vm1556_vm3, %v2615_v52 }
 0xca3   : > { %5430 = vmatmul.mubr.msk.f32.vlgmr.msra.gmra.mxu1 %vm1556_vm3, %v5426_v51 }
 0xca4   : > { %5444 = vmatpush3.msra.mxu1 %v2881_v35 }
 0xca5   : > { %5445 = vmatprep.subr.mxu1 %v2880_v36 }
 0xca6   : > { %5446 = vmatpush3.msra.mxu1 %v2880_v36 }
 0xca7   : > { %5447 = vmatprep.subr.mxu1 %v2879_v37 }
 0xca8   : > { %5448 = vmatpush3.msra.mxu1 %v2879_v37 }
 0xca9   : > { %5449 = vmatprep.subr.mxu1 %v2878_v38 }
 0xcaa   : > { %5450 = vmatpush3.msra.mxu1 %v2878_v38 }
 0xcab   : > { %5451 = vmatprep.subr.mxu1 %v2877_v39 }
 0xcac   : > { %5452 = vmatpush3.msra.mxu1 %v2877_v39 }
 0xcad   : > { %5453 = vmatprep.subr.mxu1 %v2876_v40 }
 0xcae   : > { %5454 = vmatpush3.msra.mxu1 %v2876_v40  ;;  %v5045_v40 = vld [vmem:[#allocation16] ss:$0 sm:$0xff] }
 0xcaf   : > { %5455 = vmatprep.subr.mxu1 %v2875_v41 }
 0xcb0   : > { %5456 = vmatpush3.msra.mxu1 %v2875_v41 }
 0xcb1   : > { %5457 = vmatprep.subr.mxu1 %v2874_v29 }
 0xcb2   : > { %5458 = vmatpush3.msra.mxu1 %v2874_v29 }
 0xd63   : > { %v5431_v53 = vpop.f32.mrf.mxu1 }
 0xd64   : > { %v2706_v54 = vadd.f32 %v5431_v53, %v2418_v48 }
 0xd65   : > { %v2696_v55 = vpop.f32.mrf.mxu1 }
 0xd66   : > { %v2708_v57 = vadd.f32 %v2706_v54, %v6583_v11  ;;  %v2705_v58 = vadd.f32 %v2696_v55, %v2417_v50 }
 0xd68   : > { %v2707_v59 = vadd.f32 %v2705_v58, %v6576_v10  ;;  %v2717_v60 = vadd.f32 %v5036_v56, %v2708_v57 }
 0xd6a   : > { %v2723_v45 = vsel %vm1055_vm1, %v2717_v60, 0.0  ;;  %v2716_v61 = vadd.f32 %v5036_v56, %v2707_v59 }
 0xd6b   : > { %2724 = vadd.xlane.f32.xlu0 %v2723_v45 }
 0xd6c   : > { %v2720_v47 = vsel %vm948_vm0, %v2716_v61, 0.0 }
 0xd6d   : > { %2721 = vadd.xlane.f32.xlu1 %v2720_v47 }
 0xdf4   : > { %v2725_v62 = vpop.xlane.xlu0 %2724 }
 0xdf5   : > { %v2727_v63 = vmul.f32 0.03125, %v2725_v62 }
 0xdf6   : > { %v2722_v1 = vpop.xlane.xlu1 %2721 }
 0xdf7   : > { %v2729_v3 = vsub.f32 %v2717_v60, %v2727_v63  ;;  %v2726_v4 = vmul.f32 0.03125, %v2722_v1  ;;  %v5042_v1 = vld [vmem:[#allocation15] ss:$0 sm:$0xff] }
 0xdf9   : > { %v2728_v5 = vsub.f32 %v2716_v61, %v2726_v4  ;;  %v2731_v6 = vmul.f32 %v2729_v3, %v2729_v3 }
 0xdfb   : > { %v2735_v11 = vsel %vm1055_vm1, %v2731_v6, 0.0  ;;  %v2730_v7 = vmul.f32 %v2728_v5, %v2728_v5 }
 0xdfc   : > { %2736 = vadd.xlane.f32.xlu1 %v2735_v11 }
 0xdfd   : > { %v2732_v10 = vsel %vm948_vm0, %v2730_v7, 0.0 }
 0xdfe   : > { %2733 = vadd.xlane.f32.xlu0 %v2732_v10 }
 0xe85   : > { %v2737_v14 = vpop.xlane.xlu1 %2736 }
 0xe86   : > { %v2739_v15 = vmul.f32 0.03125, %v2737_v14 }
 0xe87   : > { %v2734_v16 = vpop.xlane.xlu0 %2733 }
 0xe88   : > { %v2741_v17 = vadd.f32 1e-05, %v2739_v15  ;;  %v2738_v18 = vmul.f32 0.03125, %v2734_v16 }
 0xe8a   : > { %5778 = vrsqrt.f32 %v2741_v17  ;;  %v2740_v19 = vadd.f32 1e-05, %v2738_v18 }
 0xe8c   : > { %5780 = vrsqrt.f32 %v2740_v19 }
 0xe97   : > { %v5779_v20 = vpop.eup %5778 }
 0xe98   : > { %v2745_v22 = vmul.f32 %v5779_v20, %v2729_v3 }
 0xe99   : > { %v5781_v23 = vpop.eup %5780 }
 0xe9a   : > { %v2744_v25 = vmul.f32 %v5781_v23, %v2728_v5  ;;  %v2753_v26 = vmul.f32 %v5037_v21, %v2745_v22  ;;  %v5064_v22 = vld [vmem:[%s7077_s12 + $0x38] sm:$0xff]  ;;  %v5049_v23 = vld [vmem:[%s7125_s25 + $0x30] sm:$0xff] }
 0xe9b   : > { %5484 = vmatprep.subr.mxu1 %v5064_v22 }
 0xe9c   : > { %v2752_v28 = vmul.f32 %v5037_v21, %v2744_v25  ;;  %v2761_v30 = vadd.f32 %v5038_v24, %v2753_v26  ;;  %v5050_v21 = vld [vmem:[%s7125_s25 + $0x38] sm:$0xff]  ;;  %v5048_v25 = vld [vmem:[%s7125_s25 + $0x28] sm:$0xff] }
 0xe9d   : > { %5462 = vmatprep.subr.mxu0 %v5050_v21  ;;  %v5062_v26 = vld [vmem:[%s7077_s12 + $0x28] sm:$0xff] }
 0xe9e   : > { %v2760_v31 = vadd.f32 %v5038_v24, %v2752_v28  ;;  %v2763_v33 = vmul.f32 %v2761_v30, %v6529_v2  ;;  %v5063_v24 = vld [vmem:[%s7077_s12 + $0x30] sm:$0xff]  ;;  %v5047_v28 = vld [vmem:[%s7125_s25 + $0x20] sm:$0xff] }
 0xe9f   : > { %v5061_v30 = vld [vmem:[%s7077_s12 + $0x20] sm:$0xff] }
 0xea0   : > { %v6769_v32 = vmul.f32 %v2760_v31, %v6527_v0  ;;  %v5057_v31 = vld [vmem:[%s7075_s10 + $0x38] sm:$0xff] }
 0xea2   : > { %5440 = vmatprep.mubr.msk.f32.mxu0 %vm948_vm0, %v6769_v32 }
 0xea3   : > { %5441 = vmatmul.mubr.msk.f32.vlgmr.msra.gmra.mxu0 %vm948_vm0, %v2763_v33 }
 0xea4   : > { %5463 = vmatpush3.msra.mxu0 %v5050_v21 }
 0xea5   : > { %5464 = vmatprep.subr.mxu0 %v5049_v23 }
 0xea6   : > { %5465 = vmatpush3.msra.mxu0 %v5049_v23 }
 0xea7   : > { %5466 = vmatprep.subr.mxu0 %v5048_v25 }
 0xea8   : > { %5467 = vmatpush3.msra.mxu0 %v5048_v25 }
 0xea9   : > { %5468 = vmatprep.subr.mxu0 %v5047_v28 }
 0xeaa   : > { %5469 = vmatpush3.msra.mxu0 %v5047_v28 }
 0xeab   : > { %5473 = vmatprep.subr.mxu0 %v5057_v31 }
 0xf63   : > { %v5442_v42 = vpop.f32.mrf.mxu0 }
 0xf64   : > { %v2853_v43 = vadd.f32 %v5442_v42, %v5039_v27 }
 0xf65   : > { %v2847_v44 = vpop.f32.mrf.mxu0 }
 0xf66   : > { %v2857_v46 = vmul.f32 %v2853_v43, %v2853_v43  ;;  %v2848_v48 = vadd.f32 %v5039_v27, %v2847_v44  ;;  %v5046_v27 = vld [vmem:[#allocation18] ss:$0 sm:$0xff] }
 0xf68   : > { %v2859_v49 = vmul.f32 %v2857_v46, %v2853_v43  ;;  %v2856_v50 = vmul.f32 %v2848_v48, %v2848_v48 }
 0xf6a   : > { %v2861_v51 = vmul.f32 0.044715, %v2859_v49  ;;  %v2858_v52 = vmul.f32 %v2856_v50, %v2848_v48 }
 0xf6c   : > { %v2863_v53 = vadd.f32 %v2861_v51, %v2853_v43  ;;  %v2860_v54 = vmul.f32 0.044715, %v2858_v52  ;;  %v5056_v51 = vld [vmem:[%s7075_s10 + $0x30] sm:$0xff]  ;;  %v5055_v52 = vld [vmem:[%s7075_s10 + $0x28] sm:$0xff] }
 0xf6e   : > { %v2865_v55 = vmul.f32 0.7978846, %v2863_v53  ;;  %v2862_v56 = vadd.f32 %v2860_v54, %v2848_v48  ;;  %v5054_v53 = vld [vmem:[%s7075_s10 + $0x20] sm:$0xff] }
 0xf6f   : > { %v5065_v54 = vld [vmem:[#allocation7 + $0x1] ss:$0 sm:$0xff] }
 0xf70   : > { %5782 = vtanh.f32 %v2865_v55  ;;  %v2864_v57 = vmul.f32 0.7978846, %v2862_v56 }
 0xf72   : > { %5784 = vtanh.f32 %v2864_v57 }
 0xf7d   : > { %v5783_v58 = vpop.eup %5782 }
 0xf7e   : > { %v2869_v59 = vadd.f32 1.0, %v5783_v58  ;;  %v5051_v58 = vld [vmem:[#allocation4 + $0x1] ss:$0 sm:$0xff] }
 0xf7f   : > { %v5785_v60 = vpop.eup %5784 }
 0xf80   : > { %v2868_v45 = vadd.f32 1.0, %v5785_v60  ;;  %v2871_v61 = vmul.f32 0.5, %v2869_v59 }
 0xf82   : > { %v2870_v47 = vmul.f32 0.5, %v2868_v45  ;;  %v2873_v63 = vmul.f32 %v2871_v61, %v2853_v43 }
 0xf84   : > { %v2872_v62 = vmul.f32 %v2870_v47, %v2848_v48  ;;  %v5058_v47 = vld [vmem:[#allocation6 + $0x1] ss:$0 sm:$0xff] }
 0xf86   : > { %5459 = vmatprep.mubr.msk.f32.mxu1 %vm2889_vm7, %v2872_v62 }
 0xf87   : > { %5460 = vmatmul.mubr.msk.f32.vlgmr.msra.gmra.mxu1 %vm2889_vm7, %v2873_v63 }
 0xf88   : > { %5485 = vmatpush3.msra.mxu1 %v5064_v22 }
 0xf89   : > { %5486 = vmatprep.subr.mxu1 %v5063_v24 }
 0xf8a   : > { %5487 = vmatpush3.msra.mxu1 %v5063_v24 }
 0xf8b   : > { %5488 = vmatprep.subr.mxu1 %v5062_v26 }
 0xf8c   : > { %5489 = vmatpush3.msra.mxu1 %v5062_v26 }
 0xf8d   : > { %5490 = vmatprep.subr.mxu1 %v5061_v30 }
 0xf8e   : > { %5491 = vmatpush3.msra.mxu1 %v5061_v30 }
0x1047   : > { %v5461_v3 = vpop.f32.mrf.mxu1 }
0x1048   : > { %v2968_v4 = vadd.f32 %v5461_v3, %v5042_v1 }
0x1049   : > { %v2962_v5 = vpop.f32.mrf.mxu1 }
0x104a   : > { %v2963_v6 = vadd.f32 %v5042_v1, %v2962_v5  ;;  %v2972_v11 = vadd.f32 %v2968_v4, %v2763_v33 }
0x104c   : > { %v2978_v7 = vsel %vm1055_vm1, %v2972_v11, 0.0  ;;  %v2971_v10 = vadd.f32 %v2963_v6, %v6769_v32 }
0x104d   : > { %2979 = vadd.xlane.f32.xlu1 %v2978_v7 }
0x104e   : > { %v2975_v8 = vsel %vm948_vm0, %v2971_v10, 0.0 }
0x104f   : > { %2976 = vadd.xlane.f32.xlu0 %v2975_v8 }
0x10d6   : > { %v2980_v9 = vpop.xlane.xlu1 %2979 }
0x10d7   : > { %v2982_v12 = vmul.f32 0.03125, %v2980_v9 }
0x10d8   : > { %v2977_v13 = vpop.xlane.xlu0 %2976 }
0x10d9   : > { %v2984_v14 = vsub.f32 %v2972_v11, %v2982_v12  ;;  %v2981_v15 = vmul.f32 0.03125, %v2977_v13 }
0x10db   : > { %v2983_v16 = vsub.f32 %v2971_v10, %v2981_v15  ;;  %v2986_v17 = vmul.f32 %v2984_v14, %v2984_v14 }
0x10dd   : > { %v2990_v18 = vsel %vm1055_vm1, %v2986_v17, 0.0  ;;  %v2985_v19 = vmul.f32 %v2983_v16, %v2983_v16 }
0x10de   : > { %2991 = vadd.xlane.f32.xlu1 %v2990_v18 }
0x10df   : > { %v2987_v20 = vsel %vm948_vm0, %v2985_v19, 0.0 }
0x10e0   : > { %2988 = vadd.xlane.f32.xlu0 %v2987_v20 }
0x1167   : > { %v2992_v32 = vpop.xlane.xlu1 %2991 }
0x1168   : > { %v2994_v33 = vmul.f32 0.03125, %v2992_v32 }
0x1169   : > { %v2989_v35 = vpop.xlane.xlu0 %2988 }
0x116a   : > { %v2996_v36 = vadd.f32 1e-05, %v2994_v33  ;;  %v2993_v37 = vmul.f32 0.03125, %v2989_v35 }
0x116c   : > { %5786 = vrsqrt.f32 %v2996_v36  ;;  %v2995_v38 = vadd.f32 1e-05, %v2993_v37  ;;  %v5068_v36 = vld [vmem:[%s7079_s14 + $0x20] sm:$0xff] }
0x116e   : > { %5788 = vrsqrt.f32 %v2995_v38 }
0x1179   : > { %v5787_v39 = vpop.eup %5786 }
0x117a   : > { %v3000_v41 = vmul.f32 %v5787_v39, %v2984_v14 }
0x117b   : > { %v5789_v29 = vpop.eup %5788 }
0x117c   : > { %v2999_v42 = vmul.f32 %v5789_v29, %v2983_v16  ;;  %v3008_v43 = vmul.f32 %v5045_v40, %v3000_v41 }
0x117e   : > { %v3007_v44 = vmul.f32 %v5045_v40, %v2999_v42  ;;  %v3016_v46 = vadd.f32 %v5046_v27, %v3008_v43  ;;  %v6920_v43 = vld [vmem:[%s6650_s1] ss:$0 sm:$0xff]  ;;  %s7129_s1 = smov 112  }
0x1180   : > { %v3015_v48 = vadd.f32 %v5046_v27, %v3007_v44  ;;  %v6837_v50 = vmul.f32 %v3016_v46, %v6529_v2 }
0x1182   : > { %v6834_v49 = vmul.f32 %v3015_v48, %v6527_v0 }
0x1184   : > { %5470 = vmatprep.mubr.msk.f32.mxu0 %vm948_vm0, %v6834_v49  ;;  %5492 = vmatprep.mubr.msk.f32.mxu1 %vm948_vm0, %v6834_v49 }
0x1185   : > { %5471 = vmatmul.mubr.msk.f32.vlgmr.msra.gmra.mxu0 %vm948_vm0, %v6837_v50  ;;  %5493 = vmatmul.mubr.msk.f32.vlgmr.msra.gmra.mxu1 %vm948_vm0, %v6837_v50 }
0x1186   : > { %5474 = vmatpush3.msra.mxu0 %v5057_v31  ;;  %5481 = vmatprep.mubr.msk.f32.mxu0 %vm948_vm0, %v6834_v49 }
0x1187   : > { %5475 = vmatprep.subr.mxu0 %v5056_v51 }
0x1188   : > { %5476 = vmatpush3.msra.mxu0 %v5056_v51 }
0x1189   : > { %5477 = vmatprep.subr.mxu0 %v5055_v52 }
0x118a   : > { %5478 = vmatpush3.msra.mxu0 %v5055_v52 }
0x118b   : > { %5479 = vmatprep.subr.mxu0 %v5054_v53 }
0x118c   : > { %5480 = vmatpush3.msra.mxu0 %v5054_v53 }
0x118d   : > { %5482 = vmatmul.mubr.msk.f32.vlgmr.msra.gmra.mxu0 %vm948_vm0, %v6837_v50 }
0x1245   : > { %v5472_v55 = vpop.f32.mrf.mxu0  ;;  %v5494_v56 = vpop.f32.mrf.mxu1 }
0x1246   : > { %v6860_v57 = vadd.f32 %v5494_v56, %v5065_v54  ;;  %v6886_v4 = vadd.f32 %v5472_v55, %v5051_v58 }
0x1247   : > { %v3104_v59 = vpop.f32.mrf.mxu0  ;;  %v3280_v60 = vpop.f32.mrf.mxu1 }
0x1248   : > { %v6862_v45 = vadd.f32 %v5051_v58, %v3104_v59  ;;  %v6864_v61 = vadd.f32 %v5065_v54, %v3280_v60  ;;  %5502 = vmatprep.subr.msk.mxu1 %vm1684_vm4, %v6860_v57 }
0x1249   : > { %5503 = vmatpush3.msk.msra.mxu1 %vm1684_vm4, %v6860_v57 }
0x124a   : > { %5499 = vmatprep.mubr.msk.f32.mxu0 %vm1556_vm3, %v6862_v45  ;;  %5504 = vmatprep.subr.mxu1 %v6864_v61 }
0x124b   : > { %5505 = vmatpush3.msra.mxu1 %v6864_v61 }
0x124d   : > { %v5483_v62 = vpop.f32.mrf.mxu0 }
0x124e   : > { %v6874_v63 = vadd.f32 %v5483_v62, %v5058_v47 }
0x124f   : > { %v3192_v1 = vpop.f32.mrf.mxu0 }
0x1250   : > { %v6876_v3 = vadd.f32 %v5058_v47, %v3192_v1  ;;  %5495 = vmatprep.subr.msk.mxu0 %vm1556_vm3, %v6874_v63 }
0x1251   : > { %5496 = vmatpush3.xpose.msk.msra.mxu0 %vm1556_vm3, %v6874_v63 }
0x1252   : > { %5497 = vmatprep.subr.msk.mxu0 %vm1556_vm3, %v6876_v3 }
0x1255   : > { %5498 = vmatpush3.xpose.msk.msra.mxu0 %vm1556_vm3, %v6876_v3 }
0x1258   : > { %5500 = vmatmul.mubr.msk.f32.vlgmr.msra.gmra.mxu0 %vm1556_vm3, %v6886_v4 }
0x1318   : > { %v5501_v5 = vpop.f32.mrf.mxu0 }
0x1319   : > { %v3382_v6 = vmul.f32 0.35355338, %v5501_v5 }
0x131a   : > { %v3372_v11 = vpop.f32.mrf.mxu0 }
0x131b   : > { %v3381_v7 = vmul.f32 0.35355338, %v3372_v11  ;;  %v3384_v10 = vadd.f32 %v6653_v34, %v3382_v6 }
0x131d   : > { %v3388_v8 = vsel %vm1658_vm5, %v3384_v10, -inf  ;;  %v3383_v9 = vadd.f32 %v6653_v34, %v3381_v7 }
0x131e   : > { %3389 = vmax.xlane.f32.xlu1 %v3388_v8 }
0x131f   : > { %v3385_v12 = vsel %vm1654_vm6, %v3383_v9, -inf }
0x1320   : > { %3386 = vmax.xlane.f32.xlu0 %v3385_v12 }
0x13a7   : > { %v3390_v13 = vpop.xlane.xlu1 %3389 }
0x13a8   : > { %v3392_v14 = vsub.f32 %v3384_v10, %v3390_v13 }
0x13a9   : > { %v3387_v15 = vpop.xlane.xlu0 %3386 }
0x13aa   : > { %v3395_v16 = vmul.f32 1.442695, %v3392_v14  ;;  %v3391_v17 = vsub.f32 %v3383_v9, %v3387_v15 }
0x13ac   : > { %5790 = vpow2.f32 %v3395_v16  ;;  %v3393_v18 = vmul.f32 1.442695, %v3391_v17 }
0x13ae   : > { %5792 = vpow2.f32 %v3393_v18 }
0x13b9   : > { %v5791_v19 = vpop.eup %5790 }
0x13ba   : > { %v3400_v20 = vsel %vm1658_vm5, %v5791_v19, 0.0 }
0x13bb   : > { %v5793_v21 = vpop.eup %5792  ;;  %3401 = vadd.xlane.f32.xlu1 %v3400_v20 }
0x13bc   : > { %v3397_v22 = vsel %vm1654_vm6, %v5793_v21, 0.0 }
0x13bd   : > { %3398 = vadd.xlane.f32.xlu0 %v3397_v22 }
0x13cc   : > { %3495 = vrot.lane.b32.xlu1 %v6876_v3, %s7128_s0 }
0x13d0   : > { %3491 = vrot.lane.b32.xlu1 %v6862_v45, %s7128_s0 }
0x13d3   : > { %3497 = vrot.lane.b32.xlu0 %v6874_v63, %s7128_s0 }
0x13d7   : > { %3493 = vrot.lane.b32.xlu0 %v6886_v4, %s7128_s0 }
0x1444   : > { %v3402_v23 = vpop.xlane.xlu1 %3401 }
0x1445   : > { %5794 = vrcp.f32 %v3402_v23 }
0x1446   : > { %v3399_v24 = vpop.xlane.xlu0 %3398 }
0x1447   : > { %5796 = vrcp.f32 %v3399_v24 }
0x1448   : > { %v3496_v26 = vpop.permute.xlu1 %3495 }
0x144a   : > { %v3498_v25 = vpop.permute.xlu0 %3497 }
0x144b   : > { %5509 = vmatprep.subr.msk.mxu1 %vm1556_vm3, %v3498_v25 }
0x144c   : > { %v3492_v33 = vpop.permute.xlu1 %3491 }
0x144e   : > { %v3494_v35 = vpop.permute.xlu0 %3493 }
0x1452   : > { %v5795_v28 = vpop.eup %5794 }
0x1453   : > { %v3406_v32 = vmul.f32 %v5795_v28, %v5791_v19 }
0x1454   : > { %v5797_v30 = vpop.eup %5796 }
0x1455   : > { %v3405_v31 = vmul.f32 %v5797_v30, %v5793_v21 }
0x1457   : > { %5506 = vmatprep.mubr.msk.f32.mxu1 %vm1654_vm6, %v3405_v31 }
0x1458   : > { %5507 = vmatmul.mubr.msk.f32.vlgmr.msra.gmra.mxu1 %vm1654_vm6, %v3406_v32 }
0x1459   : > { %5510 = vmatpush3.xpose.msk.msra.mxu1 %vm1556_vm3, %v3498_v25  ;;  %5513 = vmatprep.mubr.msk.f32.mxu1 %vm1556_vm3, %v3492_v33 }
0x145a   : > { %5511 = vmatprep.subr.msk.mxu1 %vm1556_vm3, %v3496_v26 }
0x145d   : > { %5512 = vmatpush3.xpose.msk.msra.mxu1 %vm1556_vm3, %v3496_v26 }
0x145e   : > { %5528 = vmatprep.subr.mxu1 %v5068_v36 }
0x1460   : > { %5514 = vmatmul.mubr.msk.f32.vlgmr.msra.gmra.mxu1 %vm1556_vm3, %v3494_v35 }
0x1461   : > { %5529 = vmatpush3.msra.mxu1 %v5068_v36 }
0x1518   : > { %v5508_v37 = vpop.f32.mrf.mxu1 }
0x151a   : > { %v3482_v38 = vpop.f32.mrf.mxu1 }
0x151b   : > { %5530 = vmatprep.mubr.msk.f32.mxu1 %vm1556_vm3, %v3482_v38 }
0x151c   : > { %5531 = vmatmul.mubr.msk.f32.vlgmr.msra.gmra.mxu1 %vm1556_vm3, %v5508_v37 }
0x1520   : > { %v5515_v39 = vpop.f32.mrf.mxu1 }
0x1521   : > { %v3583_v40 = vmul.f32 0.35355338, %v5515_v39 }
0x1522   : > { %v3573_v41 = vpop.f32.mrf.mxu1 }
0x1523   : > { %v3582_v29 = vmul.f32 0.35355338, %v3573_v41  ;;  %v3585_v27 = vadd.f32 %v6653_v34, %v3583_v40 }
0x1525   : > { %v3589_v42 = vsel %vm1658_vm5, %v3585_v27, -inf  ;;  %v3584_v44 = vadd.f32 %v6920_v43, %v3582_v29 }
0x1526   : > { %3590 = vmax.xlane.f32.xlu0 %v3589_v42 }
0x1527   : > { %v3586_v46 = vsel %vm1654_vm6, %v3584_v44, -inf }
0x1528   : > { %3587 = vmax.xlane.f32.xlu1 %v3586_v46 }
0x15af   : > { %v3591_v48 = vpop.xlane.xlu0 %3590 }
0x15b0   : > { %v3593_v51 = vsub.f32 %v3585_v27, %v3591_v48 }
0x15b1   : > { %v3588_v52 = vpop.xlane.xlu1 %3587 }
0x15b2   : > { %v3596_v53 = vmul.f32 1.442695, %v3593_v51  ;;  %v3592_v54 = vsub.f32 %v3584_v44, %v3588_v52 }
0x15b4   : > { %5798 = vpow2.f32 %v3596_v53  ;;  %v3594_v55 = vmul.f32 1.442695, %v3592_v54 }
0x15b6   : > { %5800 = vpow2.f32 %v3594_v55 }
0x15c1   : > { %v5799_v56 = vpop.eup %5798 }
0x15c2   : > { %v3601_v34 = vsel %vm1658_vm5, %v5799_v56, 0.0 }
0x15c3   : > { %v5801_v58 = vpop.eup %5800  ;;  %3602 = vadd.xlane.f32.xlu1 %v3601_v34 }
0x15c4   : > { %v3598_v59 = vsel %vm1654_vm6, %v5801_v58, 0.0 }
0x15c5   : > { %3599 = vadd.xlane.f32.xlu0 %v3598_v59 }
0x15d4   : > { %3609 = vrot.lane.b32.xlu1 %v6864_v61, %s7128_s0 }
0x15d8   : > { %3865 = vrot.lane.b32.xlu1 %v6874_v63, %s7129_s1 }
0x15db   : > { %3611 = vrot.lane.b32.xlu0 %v6860_v57, %s7128_s0 }
0x15dc   : > { %3859 = vrot.lane.b32.xlu1 %v6862_v45, %s7129_s1 }
0x15df   : > { %3863 = vrot.lane.b32.xlu0 %v6876_v3, %s7129_s1 }
0x15e0   : > { %4153 = vrot.lane.b32.xlu1 %v6874_v63, %s7130_s26 }
0x15e3   : > { %3861 = vrot.lane.b32.xlu0 %v6886_v4, %s7129_s1 }
0x15e4   : > { %4147 = vrot.lane.b32.xlu1 %v6862_v45, %s7130_s26  ;;  %v5069_v45 = vld [vmem:[%s7079_s14 + $0x28] sm:$0xff] }
0x15e7   : > { %4151 = vrot.lane.b32.xlu0 %v6876_v3, %s7130_s26 }
0x15eb   : > { %4149 = vrot.lane.b32.xlu0 %v6886_v4, %s7130_s26 }
0x164c   : > { %v3603_v60 = vpop.xlane.xlu1 %3602 }
0x164d   : > { %5802 = vrcp.f32 %v3603_v60 }
0x164e   : > { %v3600_v47 = vpop.xlane.xlu0 %3599 }
0x164f   : > { %5804 = vrcp.f32 %v3600_v47 }
0x1650   : > { %v3610_v63 = vpop.permute.xlu1 %3609 }
0x1652   : > { %v3612_v62 = vpop.permute.xlu0 %3611 }
0x1653   : > { %5516 = vmatprep.subr.msk.mxu0 %vm1684_vm4, %v3612_v62 }
0x1654   : > { %5517 = vmatpush3.msk.msra.mxu0 %vm1684_vm4, %v3612_v62  ;;  %v3866_v6 = vpop.permute.xlu1 %3865 }
0x1655   : > { %5518 = vmatprep.subr.mxu0 %v3610_v63 }
0x1656   : > { %5519 = vmatpush3.msra.mxu0 %v3610_v63  ;;  %v3864_v10 = vpop.permute.xlu0 %3863 }
0x1657   : > { %5523 = vmatprep.subr.mxu0 %v5069_v45 }
0x1658   : > { %v3860_v11 = vpop.permute.xlu1 %3859 }
0x165a   : > { %v5803_v1 = vpop.eup %5802  ;;  %v3862_v12 = vpop.permute.xlu0 %3861 }
0x165b   : > { %v3607_v5 = vmul.f32 %v5803_v1, %v5799_v56 }
0x165c   : > { %v5805_v3 = vpop.eup %5804  ;;  %v4154_v9 = vpop.permute.xlu1 %4153 }
0x165d   : > { %v3606_v4 = vmul.f32 %v5805_v3, %v5801_v58 }
0x165e   : > { %v4152_v14 = vpop.permute.xlu0 %4151 }
0x165f   : > { %5520 = vmatprep.mubr.msk.f32.mxu0 %vm1654_vm6, %v3606_v4  ;;  %v5070_v4 = vld [vmem:[%s7079_s14 + $0x30] sm:$0xff] }
0x1660   : > { %5521 = vmatmul.mubr.msk.f32.vlgmr.msra.gmra.mxu0 %vm1654_vm6, %v3607_v5  ;;  %v4148_v13 = vpop.permute.xlu1 %4147  ;;  %v5532_v5 = vpop.f32.mrf.mxu1 }
0x1661   : > { %5524 = vmatpush3.msra.mxu0 %v5069_v45 }
0x1662   : > { %5533 = vmatprep.subr.msk.mxu0 %vm1556_vm3, %v3866_v6  ;;  %v4150_v15 = vpop.permute.xlu0 %4149 }
0x1720   : > { %v5522_v7 = vpop.f32.mrf.mxu0 }
0x1722   : > { %v3688_v8 = vpop.f32.mrf.mxu0 }
0x1723   : > { %5525 = vmatprep.mubr.msk.f32.mxu0 %vm1556_vm3, %v3688_v8 }
0x1724   : > { %5526 = vmatmul.mubr.msk.f32.vlgmr.msra.gmra.mxu0 %vm1556_vm3, %v5522_v7 }
0x1725   : > { %5534 = vmatpush3.xpose.msk.msra.mxu0 %vm1556_vm3, %v3866_v6  ;;  %5537 = vmatprep.mubr.msk.f32.mxu0 %vm1556_vm3, %v3860_v11  ;;  %v3850_v6 = vpop.f32.mrf.mxu1 }
0x1726   : > { %5535 = vmatprep.subr.msk.mxu0 %vm1556_vm3, %v3864_v10 }
0x1729   : > { %5536 = vmatpush3.xpose.msk.msra.mxu0 %vm1556_vm3, %v3864_v10 }
0x172a   : > { %5552 = vmatprep.subr.msk.mxu0 %vm1556_vm3, %v4154_v9 }
0x172c   : > { %5538 = vmatmul.mubr.msk.f32.vlgmr.msra.gmra.mxu0 %vm1556_vm3, %v3862_v12 }
0x172d   : > { %5553 = vmatpush3.xpose.msk.msra.mxu0 %vm1556_vm3, %v4154_v9  ;;  %5556 = vmatprep.mubr.msk.f32.mxu0 %vm1556_vm3, %v4148_v13 }
0x172e   : > { %5554 = vmatprep.subr.msk.mxu0 %vm1556_vm3, %v4152_v14 }
0x1731   : > { %5555 = vmatpush3.xpose.msk.msra.mxu0 %vm1556_vm3, %v4152_v14 }
0x1734   : > { %5557 = vmatmul.mubr.msk.f32.vlgmr.msra.gmra.mxu0 %vm1556_vm3, %v4150_v15  ;;  %v5071_v15 = vld [vmem:[%s7079_s14 + $0x38] sm:$0xff] }
0x17e4   : > { %v6967_v16 = vpop.f32.mrf.mxu0 }
0x17e6   : > { %v6969_v17 = vpop.f32.mrf.mxu0 }
0x17ec   : > { %v5539_v18 = vpop.f32.mrf.mxu0 }
0x17ed   : > { %v3951_v19 = vmul.f32 0.35355338, %v5539_v18  ;;  %v3856_v18 = vadd.f32 %v5532_v5, %v6967_v16 }
0x17ee   : > { %v3941_v20 = vpop.f32.mrf.mxu0 }
0x17ef   : > { %v3950_v21 = vmul.f32 0.35355338, %v3941_v20  ;;  %v3953_v22 = vadd.f32 %v6920_v43, %v3951_v19  ;;  %v3851_v20 = vadd.f32 %v3850_v6, %v6969_v17 }
0x17f1   : > { %v3957_v23 = vsel %vm1658_vm5, %v3953_v22, -inf  ;;  %v3952_v24 = vadd.f32 %v6920_v43, %v3950_v21 }
0x17f2   : > { %3958 = vmax.xlane.f32.xlu0 %v3957_v23 }
0x17f3   : > { %v3954_v25 = vsel %vm1654_vm6, %v3952_v24, -inf }
0x17f4   : > { %3955 = vmax.xlane.f32.xlu1 %v3954_v25  ;;  %v5558_v39 = vpop.f32.mrf.mxu0 }
0x17f5   : > { %v4239_v29 = vmul.f32 0.35355338, %v5558_v39 }
0x17f6   : > { %v4229_v40 = vpop.f32.mrf.mxu0 }
0x17f7   : > { %v4238_v41 = vmul.f32 0.35355338, %v4229_v40  ;;  %v4241_v42 = vadd.f32 %v6920_v43, %v4239_v29 }
0x17f9   : > { %v4240_v27 = vadd.f32 %v6920_v43, %v4238_v41  ;;  %v4245_v46 = vsel %vm1658_vm5, %v4241_v42, -inf }
0x17fb   : > { %v4242_v44 = vsel %vm1654_vm6, %v4240_v27, -inf }
0x187b   : > { %v3959_v26 = vpop.xlane.xlu0 %3958 }
0x187c   : > { %v3961_v28 = vsub.f32 %v3953_v22, %v3959_v26 }
0x187d   : > { %v3956_v30 = vpop.xlane.xlu1 %3955 }
0x187e   : > { %v3964_v31 = vmul.f32 1.442695, %v3961_v28  ;;  %v3960_v32 = vsub.f32 %v3952_v24, %v3956_v30 }
0x1880   : > { %5806 = vpow2.f32 %v3964_v31  ;;  %v3962_v33 = vmul.f32 1.442695, %v3960_v32  ;;  %v5108_v31 = vld [vmem:[#allocation9 + $0x1] ss:$0 sm:$0xff] }
0x1882   : > { %5808 = vpow2.f32 %v3962_v33 }
0x188d   : > { %v5807_v35 = vpop.eup %5806 }
0x188e   : > { %v3969_v36 = vsel %vm1658_vm5, %v5807_v35, 0.0 }
0x188f   : > { %v5809_v37 = vpop.eup %5808  ;;  %3970 = vadd.xlane.f32.xlu1 %v3969_v36 }
0x1890   : > { %v3966_v38 = vsel %vm1654_vm6, %v5809_v37, 0.0 }
0x1891   : > { %3967 = vadd.xlane.f32.xlu0 %v3966_v38 }
0x18a0   : > { %3976 = vrot.lane.b32.xlu1 %v6864_v61, %s7129_s1 }
0x18a7   : > { %3978 = vrot.lane.b32.xlu0 %v6860_v57, %s7129_s1 }
0x18c4   : > { %4243 = vmax.xlane.f32.xlu1 %v4242_v44 }
0x18c6   : > { %4246 = vmax.xlane.f32.xlu0 %v4245_v46  ;;  %v4499_v46 = vld [vmem:[#allocation12 + $0x38] sm:$0xff] }
0x18c7   : > { %5571 = vmatprep.subr.mxu0 %v4499_v46 }
0x18c8   : > { %5572 = vmatpush3.msra.mxu0 %v4499_v46 }
0x1918   : > { %v3971_v48 = vpop.xlane.xlu1 %3970 }
0x1919   : > { %5810 = vrcp.f32 %v3971_v48  ;;  %v4498_v48 = vld [vmem:[#allocation12 + $0x30] sm:$0xff] }
0x191a   : > { %v3968_v51 = vpop.xlane.xlu0 %3967  ;;  %5573 = vmatprep.subr.mxu0 %v4498_v48 }
0x191b   : > { %5812 = vrcp.f32 %v3968_v51  ;;  %v4497_v51 = vld [vmem:[#allocation12 + $0x28] sm:$0xff]  ;;  %5574 = vmatpush3.msra.mxu0 %v4498_v48 }
0x191c   : > { %v3977_v53 = vpop.permute.xlu1 %3976  ;;  %5575 = vmatprep.subr.mxu0 %v4497_v51 }
0x191d   : > { %5576 = vmatpush3.msra.mxu0 %v4497_v51 }
0x191e   : > { %v3979_v52 = vpop.permute.xlu0 %3978 }
0x191f   : > { %5540 = vmatprep.subr.msk.mxu1 %vm1684_vm4, %v3979_v52 }
0x1920   : > { %5541 = vmatpush3.msk.msra.mxu1 %vm1684_vm4, %v3979_v52  ;;  %v4496_v52 = vld [vmem:[#allocation12 + $0x20] sm:$0xff] }
0x1921   : > { %5542 = vmatprep.subr.mxu1 %v3977_v53  ;;  %5577 = vmatprep.subr.mxu0 %v4496_v52 }
0x1922   : > { %5543 = vmatpush3.msra.mxu1 %v3977_v53  ;;  %5578 = vmatpush3.msra.mxu0 %v4496_v52 }
0x1923   : > { %5547 = vmatprep.subr.mxu1 %v5070_v4 }
0x1926   : > { %v5811_v54 = vpop.eup %5810 }
0x1927   : > { %v3975_v56 = vmul.f32 %v5811_v54, %v5807_v35 }
0x1928   : > { %v5813_v43 = vpop.eup %5812 }
0x1929   : > { %v3974_v55 = vmul.f32 %v5813_v43, %v5809_v37 }
0x192b   : > { %5544 = vmatprep.mubr.msk.f32.mxu1 %vm1654_vm6, %v3974_v55 }
0x192c   : > { %5545 = vmatmul.mubr.msk.f32.vlgmr.msra.gmra.mxu1 %vm1654_vm6, %v3975_v56 }
0x192d   : > { %5548 = vmatpush3.msra.mxu1 %v5070_v4 }
0x194d   : > { %v4244_v34 = vpop.xlane.xlu1 %4243 }
0x194e   : > { %v4248_v58 = vsub.f32 %v4240_v27, %v4244_v34 }
0x194f   : > { %v4247_v59 = vpop.xlane.xlu0 %4246 }
0x1950   : > { %v4250_v60 = vmul.f32 1.442695, %v4248_v58  ;;  %v4249_v47 = vsub.f32 %v4241_v42, %v4247_v59  ;;  %v5110_v59 = vld [vmem:[%s7081_s16 + $0x1] ss:$0 sm:$0xff] }
0x1952   : > { %5814 = vpow2.f32 %v4250_v60  ;;  %v4252_v62 = vmul.f32 1.442695, %v4249_v47 }
0x1954   : > { %5816 = vpow2.f32 %v4252_v62  ;;  %v5111_v62 = vld [vmem:[#allocation10 + $0x1] ss:$0 sm:$0xff] }
0x195f   : > { %v5815_v63 = vpop.eup %5814 }
0x1960   : > { %v4254_v45 = vsel %vm1654_vm6, %v5815_v63, 0.0 }
0x1961   : > { %v5817_v1 = vpop.eup %5816  ;;  %4255 = vadd.xlane.f32.xlu0 %v4254_v45 }
0x1962   : > { %v4257_v3 = vsel %vm1658_vm5, %v5817_v1, 0.0 }
0x1963   : > { %4258 = vadd.xlane.f32.xlu1 %v4257_v3 }
0x1974   : > { %4264 = vrot.lane.b32.xlu1 %v6864_v61, %s7130_s26 }
0x1977   : > { %4266 = vrot.lane.b32.xlu0 %v6860_v57, %s7130_s26 }
0x19ea   : > { %v4256_v11 = vpop.xlane.xlu0 %4255 }
0x19eb   : > { %5818 = vrcp.f32 %v4256_v11  ;;  %v5122_v11 = vld [vmem:[%s7085_s20 + $0x78] sm:$0xff] }
0x19ec   : > { %v5546_v7 = vpop.f32.mrf.mxu1  ;;  %v4259_v10 = vpop.xlane.xlu1 %4258 }
0x19ed   : > { %5820 = vrcp.f32 %v4259_v10  ;;  %v5120_v10 = vld [vmem:[%s7085_s20 + $0x68] sm:$0xff] }
0x19ee   : > { %v4055_v8 = vpop.f32.mrf.mxu1  ;;  %v4267_v9 = vpop.permute.xlu0 %4266 }
0x19ef   : > { %5549 = vmatprep.mubr.msk.f32.mxu1 %vm1556_vm3, %v4055_v8  ;;  %5559 = vmatprep.subr.msk.mxu1 %vm1684_vm4, %v4267_v9  ;;  %v5119_v8 = vld [vmem:[%s7085_s20 + $0x60] sm:$0xff] }
0x19f0   : > { %5550 = vmatmul.mubr.msk.f32.vlgmr.msra.gmra.mxu1 %vm1556_vm3, %v5546_v7  ;;  %v4265_v12 = vpop.permute.xlu1 %4264  ;;  %v5121_v7 = vld [vmem:[%s7085_s20 + $0x70] sm:$0xff] }
0x19f1   : > { %5560 = vmatpush3.msk.msra.mxu1 %vm1684_vm4, %v4267_v9  ;;  %v5118_v9 = vld [vmem:[%s7085_s20 + $0x58] sm:$0xff] }
0x19f2   : > { %5561 = vmatprep.subr.mxu1 %v4265_v12 }
0x19f3   : > { %5562 = vmatpush3.msra.mxu1 %v4265_v12  ;;  %v5117_v12 = vld [vmem:[%s7085_s20 + $0x50] sm:$0xff] }
0x19f4   : > { %5566 = vmatprep.subr.mxu1 %v5071_v15 }
0x19f8   : > { %v5819_v57 = vpop.eup %5818 }
0x19f9   : > { %v4262_v61 = vmul.f32 %v5819_v57, %v5815_v63  ;;  %v5116_v57 = vld [vmem:[%s7085_s20 + $0x48] sm:$0xff] }
0x19fa   : > { %v5821_v13 = vpop.eup %5820 }
0x19fb   : > { %5563 = vmatprep.mubr.msk.f32.mxu1 %vm1654_vm6, %v4262_v61  ;;  %v4263_v14 = vmul.f32 %v5821_v13, %v5817_v1  ;;  %v5115_v61 = vld [vmem:[%s7085_s20 + $0x40] sm:$0xff]  ;;  %v5112_v13 = vld [vmem:[#allocation13 + $0x1] ss:$0 sm:$0xff] }
0x19fd   : > { %5564 = vmatmul.mubr.msk.f32.vlgmr.msra.gmra.mxu1 %vm1654_vm6, %v4263_v14 }
0x19fe   : > { %5567 = vmatpush3.msra.mxu1 %v5071_v15 }
0x19ff   : > { %5582 = vmatprep.subr.mxu1 %v5122_v11 }
0x1ab0   : > { %v5551_v19 = vpop.f32.mrf.mxu1 }
0x1ab1   : > { %v4146_v21 = vadd.f32 %v5551_v19, %v3856_v18 }
0x1ab2   : > { %v4136_v22 = vpop.f32.mrf.mxu1 }
0x1ab3   : > { %v4145_v23 = vadd.f32 %v4136_v22, %v3851_v20 }
0x1abd   : > { %v5565_v24 = vpop.f32.mrf.mxu1 }
0x1abf   : > { %v4343_v25 = vpop.f32.mrf.mxu1 }
0x1ac0   : > { %5568 = vmatprep.mubr.msk.f32.mxu1 %vm1556_vm3, %v4343_v25 }
0x1ac1   : > { %5569 = vmatmul.mubr.msk.f32.vlgmr.msra.gmra.mxu1 %vm1556_vm3, %v5565_v24 }
0x1ac2   : > { %5583 = vmatpush3.msra.mxu1 %v5122_v11 }
0x1ac3   : > { %5584 = vmatprep.subr.mxu1 %v5121_v7 }
0x1ac4   : > { %5585 = vmatpush3.msra.mxu1 %v5121_v7 }
0x1ac5   : > { %5586 = vmatprep.subr.mxu1 %v5120_v10 }
0x1ac6   : > { %5587 = vmatpush3.msra.mxu1 %v5120_v10 }
0x1ac7   : > { %5588 = vmatprep.subr.mxu1 %v5119_v8 }
0x1ac8   : > { %5589 = vmatpush3.msra.mxu1 %v5119_v8 }
0x1ac9   : > { %5590 = vmatprep.subr.mxu1 %v5118_v9 }
0x1aca   : > { %5591 = vmatpush3.msra.mxu1 %v5118_v9 }
0x1acb   : > { %5592 = vmatprep.subr.mxu1 %v5117_v12 }
0x1acc   : > { %5593 = vmatpush3.msra.mxu1 %v5117_v12 }
0x1acd   : > { %5594 = vmatprep.subr.mxu1 %v5116_v57 }
0x1ace   : > { %5595 = vmatpush3.msra.mxu1 %v5116_v57 }
0x1acf   : > { %5596 = vmatprep.subr.mxu1 %v5115_v61 }
0x1ad0   : > { %5597 = vmatpush3.msra.mxu1 %v5115_v61 }
0x1b81   : > { %v5570_v26 = vpop.f32.mrf.mxu1 }
0x1b82   : > { %v4434_v28 = vadd.f32 %v5570_v26, %v4146_v21 }
0x1b83   : > { %v4424_v30 = vpop.f32.mrf.mxu1 }
0x1b84   : > { %v4436_v32 = vadd.f32 %v4434_v28, %v6837_v50  ;;  %v4433_v33 = vadd.f32 %v4424_v30, %v4145_v23 }
0x1b86   : > { %v4435_v16 = vadd.f32 %v4433_v33, %v6834_v49  ;;  %v4446_v35 = vadd.f32 %v5108_v31, %v4436_v32 }
0x1b88   : > { %v4454_v17 = vsel %vm1055_vm1, %v4446_v35, 0.0  ;;  %v4445_v36 = vadd.f32 %v5108_v31, %v4435_v16 }
0x1b89   : > { %4455 = vadd.xlane.f32.xlu0 %v4454_v17 }
0x1b8a   : > { %v4451_v37 = vsel %vm948_vm0, %v4445_v36, 0.0 }
0x1b8b   : > { %4452 = vadd.xlane.f32.xlu1 %v4451_v37 }
0x1c12   : > { %v4456_v38 = vpop.xlane.xlu0 %4455 }
0x1c13   : > { %v4458_v39 = vmul.f32 0.03125, %v4456_v38 }
0x1c14   : > { %v4453_v40 = vpop.xlane.xlu1 %4452 }
0x1c15   : > { %v4460_v41 = vsub.f32 %v4446_v35, %v4458_v39  ;;  %v4457_v29 = vmul.f32 0.03125, %v4453_v40  ;;  %v5123_v39 = vld [vmem:[#allocation15 + $0x1] ss:$0 sm:$0xff] }
0x1c17   : > { %v4459_v27 = vsub.f32 %v4445_v36, %v4457_v29  ;;  %v4462_v42 = vmul.f32 %v4460_v41, %v4460_v41 }
0x1c19   : > { %v4466_v50 = vsel %vm1055_vm1, %v4462_v42, 0.0  ;;  %v4461_v44 = vmul.f32 %v4459_v27, %v4459_v27 }
0x1c1a   : > { %4467 = vadd.xlane.f32.xlu1 %v4466_v50 }
0x1c1b   : > { %v4463_v49 = vsel %vm948_vm0, %v4461_v44, 0.0 }
0x1c1c   : > { %4464 = vadd.xlane.f32.xlu0 %v4463_v49 }
0x1ca3   : > { %v4468_v53 = vpop.xlane.xlu1 %4467 }
0x1ca4   : > { %v4470_v54 = vmul.f32 0.03125, %v4468_v53 }
0x1ca5   : > { %v4465_v43 = vpop.xlane.xlu0 %4464 }
0x1ca6   : > { %v4472_v55 = vadd.f32 1e-05, %v4470_v54  ;;  %v4469_v56 = vmul.f32 0.03125, %v4465_v43 }
0x1ca8   : > { %5822 = vrsqrt.f32 %v4472_v55  ;;  %v4471_v34 = vadd.f32 1e-05, %v4469_v56 }
0x1caa   : > { %5824 = vrsqrt.f32 %v4471_v34 }
0x1cb5   : > { %v5823_v58 = vpop.eup %5822 }
0x1cb6   : > { %v4476_v60 = vmul.f32 %v5823_v58, %v4460_v41 }
0x1cb7   : > { %v5825_v47 = vpop.eup %5824 }
0x1cb8   : > { %v4475_v63 = vmul.f32 %v5825_v47, %v4459_v27  ;;  %v4484_v45 = vmul.f32 %v5110_v59, %v4476_v60 }
0x1cba   : > { %v4483_v1 = vmul.f32 %v5110_v59, %v4475_v63  ;;  %v4492_v3 = vadd.f32 %v5111_v62, %v4484_v45 }
0x1cbc   : > { %v4491_v4 = vadd.f32 %v5111_v62, %v4483_v1  ;;  %v4494_v6 = vmul.f32 %v4492_v3, %v6529_v2  ;;  %v5126_v1 = vld [vmem:[#allocation16 + $0x1] ss:$0 sm:$0xff] }
0x1cbe   : > { %v4493_v5 = vmul.f32 %v4491_v4, %v6527_v0 }
0x1cc0   : > { %5579 = vmatprep.mubr.msk.f32.mxu0 %vm948_vm0, %v4493_v5 }
0x1cc1   : > { %5580 = vmatmul.mubr.msk.f32.vlgmr.msra.gmra.mxu0 %vm948_vm0, %v4494_v6 }
0x1d81   : > { %v5581_v14 = vpop.f32.mrf.mxu0 }
0x1d82   : > { %v4586_v15 = vadd.f32 %v5581_v14, %v5112_v13 }
0x1d83   : > { %v4580_v18 = vpop.f32.mrf.mxu0 }
0x1d84   : > { %v4590_v19 = vmul.f32 %v4586_v15, %v4586_v15  ;;  %v4581_v20 = vadd.f32 %v5112_v13, %v4580_v18 }
0x1d86   : > { %v4592_v21 = vmul.f32 %v4590_v19, %v4586_v15  ;;  %v4589_v22 = vmul.f32 %v4581_v20, %v4581_v20 }
0x1d88   : > { %v4594_v23 = vmul.f32 0.044715, %v4592_v21  ;;  %v4591_v24 = vmul.f32 %v4589_v22, %v4581_v20 }
0x1d8a   : > { %v4596_v25 = vadd.f32 %v4594_v23, %v4586_v15  ;;  %v4593_v26 = vmul.f32 0.044715, %v4591_v24 }
0x1d8c   : > { %v4598_v28 = vmul.f32 0.7978846, %v4596_v25  ;;  %v4595_v30 = vadd.f32 %v4593_v26, %v4581_v20 }
0x1d8e   : > { %5826 = vtanh.f32 %v4598_v28  ;;  %v4597_v31 = vmul.f32 0.7978846, %v4595_v30 }
0x1d90   : > { %5828 = vtanh.f32 %v4597_v31 }
0x1d9b   : > { %v5827_v32 = vpop.eup %5826 }
0x1d9c   : > { %v4602_v33 = vadd.f32 1.0, %v5827_v32 }
0x1d9d   : > { %v5829_v16 = vpop.eup %5828 }
0x1d9e   : > { %v4601_v35 = vadd.f32 1.0, %v5829_v16  ;;  %v4604_v17 = vmul.f32 0.5, %v4602_v33 }
0x1da0   : > { %v4603_v36 = vmul.f32 0.5, %v4601_v35  ;;  %v4606_v38 = vmul.f32 %v4604_v17, %v4586_v15 }
0x1da2   : > { %v4605_v37 = vmul.f32 %v4603_v36, %v4581_v20 }
0x1da4   : > { %5598 = vmatprep.mubr.msk.f32.mxu1 %vm2889_vm7, %v4605_v37 }
0x1da5   : > { %5599 = vmatmul.mubr.msk.f32.vlgmr.msra.gmra.mxu1 %vm2889_vm7, %v4606_v38 }
0x1e65   : > { %v5600_v40 = vpop.f32.mrf.mxu1 }
0x1e66   : > { %v4702_v41 = vadd.f32 %v5600_v40, %v5123_v39 }
0x1e67   : > { %v4696_v29 = vpop.f32.mrf.mxu1 }
0x1e68   : > { %v4697_v27 = vadd.f32 %v5123_v39, %v4696_v29  ;;  %v4706_v42 = vadd.f32 %v4702_v41, %v4494_v6 }
0x1e6a   : > { %v4714_v50 = vsel %vm1055_vm1, %v4706_v42, 0.0  ;;  %v4705_v44 = vadd.f32 %v4697_v27, %v4493_v5  ;;  %v5127_v5 = vld [vmem:[#allocation18 + $0x1] ss:$0 sm:$0xff] }
0x1e6b   : > { %4715 = vadd.xlane.f32.xlu1 %v4714_v50 }
0x1e6c   : > { %v4711_v49 = vsel %vm948_vm0, %v4705_v44, 0.0 }
0x1e6d   : > { %4712 = vadd.xlane.f32.xlu0 %v4711_v49 }
0x1ef4   : > { %v4716_v46 = vpop.xlane.xlu1 %4715 }
0x1ef5   : > { %v4718_v48 = vmul.f32 0.03125, %v4716_v46 }
0x1ef6   : > { %v4713_v51 = vpop.xlane.xlu0 %4712 }
0x1ef7   : > { %v4720_v52 = vsub.f32 %v4706_v42, %v4718_v48  ;;  %v4717_v53 = vmul.f32 0.03125, %v4713_v51 }
0x1ef9   : > { %v4719_v54 = vsub.f32 %v4705_v44, %v4717_v53  ;;  %v4722_v43 = vmul.f32 %v4720_v52, %v4720_v52 }
0x1efb   : > { %v4726_v55 = vsel %vm1055_vm1, %v4722_v43, 0.0  ;;  %v4721_v56 = vmul.f32 %v4719_v54, %v4719_v54 }
0x1efc   : > { %4727 = vadd.xlane.f32.xlu1 %v4726_v55 }
0x1efd   : > { %v4723_v34 = vsel %vm948_vm0, %v4721_v56, 0.0 }
0x1efe   : > { %4724 = vadd.xlane.f32.xlu0 %v4723_v34 }
0x1f85   : > { %v4728_v58 = vpop.xlane.xlu1 %4727 }
0x1f86   : > { %v4730_v59 = vmul.f32 0.03125, %v4728_v58 }
0x1f87   : > { %v4725_v60 = vpop.xlane.xlu0 %4724 }
0x1f88   : > { %v4732_v47 = vadd.f32 1e-05, %v4730_v59  ;;  %v4729_v62 = vmul.f32 0.03125, %v4725_v60 }
0x1f8a   : > { %5830 = vrsqrt.f32 %v4732_v47  ;;  %v4731_v63 = vadd.f32 1e-05, %v4729_v62 }
0x1f8c   : > { %5832 = vrsqrt.f32 %v4731_v63 }
0x1f97   : > { %v5831_v45 = vpop.eup %5830 }
0x1f98   : > { %v4736_v3 = vmul.f32 %v5831_v45, %v4720_v52 }
0x1f99   : > { %v5833_v4 = vpop.eup %5832 }
0x1f9a   : > { %v4744_v6 = vmul.f32 %v5126_v1, %v4736_v3  ;;  %v4735_v11 = vmul.f32 %v5833_v4, %v4719_v54 }
0x1f9c   : > { %v4752_v7 = vadd.f32 %v5127_v5, %v4744_v6  ;;  %v4743_v10 = vmul.f32 %v5126_v1, %v4735_v11 }
0x1f9e   : > { %v4754_v8 = vmul.f32 %v4752_v7, %v6529_v2  ;;  %v4751_v9 = vadd.f32 %v5127_v5, %v4743_v10 }
0x1fa0   : > { %4756 = vst.msk [vmem:[%s931_s7 + $0x8] sm:$0x1] %vm1055_vm1, %v4754_v8  ;;  %v4753_v12 = vmul.f32 %v4751_v9, %v6527_v0 }
0x1fa2   : > { %4755 = vst.msk [vmem:[%s931_s7] sm:$0xff] %vm948_vm0, %v4753_v12 }
0x1fa3 PF: > { %s40_s5 = sadd.s32 1, %s6151_s5  }
0x1fa4   : > { %p37_p2 = scmp.ge.s32.totalorder %s40_s5, 4  }
0x1fa6   :  { %39 = sbr.rel (!%p37_p2) target bundleno = 18 (0x12), region = 217 }
0x1fab   :  { %4778 = vsyncpa [#allocation3], 1 }
0x1fac   :  { %4780 = vsyncpa [#allocation3 + $0x1], 1 }
0x1fad   :  { %4781 = vsyncpa [#allocation5], 1 }
0x1fae   :  { %4782 = vsyncpa [#allocation8], 1 }
0x1faf   :  { %4783 = vsyncpa [#allocation11], 1 }
0x1fb0   :  { %4784 = vsyncpa [#allocation14], 1 }
0x1fb1   :  { %4785 = vsyncpa [#allocation17], 1 }

</bundles_post_ra>
